<compile_context>
chip_gen: v7x
topology: tpu7x:2x2x1
jax: 0.10.0
libtpu: 0.0.40
codegen_flags: <defaults>
</compile_context>

<pallas_src>
import functools

import jax
import jax.numpy as jnp
from jax import lax
from jax.experimental import pallas as pl
from jax.experimental.pallas import tpu as pltpu


# ---------------------------------------------------------------------------
# Fused forward-pass kernel
# Layout convention inside the kernel: activations are [C, n_img*H*W] with the
# flat lane index p = n*H*W + h*W + w (H, W powers of two -> cheap bit decode).
# ---------------------------------------------------------------------------
def _fused_cnn_kernel(x_ref, w1_ref, b1_ref, w2_ref, b2_ref, wfc_ref, bfc_ref,
                      out_ref,
                      x1p_ref, a1_ref, y1p_ref, x2p_ref, a2_ref, y2p_ref,
                      *, n_img):
    f32 = jnp.float32
    bf16 = jnp.bfloat16

    # ------------------ conv1: 4 -> 8 channels, 3x3, pad 1, ReLU ------------
    H1, W1 = 16, 16
    M1 = n_img * H1 * W1          # 512 lanes
    PAD1 = W1 + 1                 # max |flat shift| for a 3x3 window

    x1p_ref[...] = jnp.zeros_like(x1p_ref)              # zero-padded input
    x1p_ref[:, PAD1:PAD1 + M1] = x_ref[...]

    lane1 = lax.broadcasted_iota(jnp.int32, (4, M1), 1)
    h1 = (lane1 >> 4) & (H1 - 1)                         # row inside image
    w1 = lane1 & (W1 - 1)                                # col inside image

    # in-kernel im2col: 9 shifted views (static slices of the padded scratch),
    # out-of-image taps masked to 0.  Row order of A1 is (kh, kw, ci), which
    # matches the weight matrix layout prepared in the wrapper.
    for dh in (-1, 0, 1):
        for dw in (-1, 0, 1):
            idx = (dh + 1) * 3 + (dw + 1)
            s = dh * W1 + dw
            shifted = x1p_ref[:, PAD1 + s:PAD1 + s + M1]
            valid = ((h1 + dh >= 0) & (h1 + dh < H1) &
                     (w1 + dw >= 0) & (w1 + dw < W1))
            a1_ref[idx * 4:(idx + 1) * 4, :] = jnp.where(valid, shifted, 0.0)

    y1 = jnp.dot(w1_ref[...], a1_ref[...].astype(bf16),
                 preferred_element_type=f32)             # [8, 512], lane-dense
    y1 = jnp.maximum(y1 + b1_ref[...], 0.0)

    # ------------------ maxpool 2x2: [8, 512] -> [8, 128] -------------------
    y1p_ref[...] = jnp.zeros_like(y1p_ref)
    y1p_ref[:, 0:M1] = y1
    m1 = jnp.maximum(
        jnp.maximum(y1p_ref[:, 0:M1], y1p_ref[:, 1:1 + M1]),
        jnp.maximum(y1p_ref[:, W1:W1 + M1], y1p_ref[:, W1 + 1:W1 + 1 + M1]))

    M2 = n_img * 8 * 8            # 128 lanes after pooling
    p_i = lax.broadcasted_iota(jnp.int32, (M1, M2), 0)
    q_i = lax.broadcasted_iota(jnp.int32, (M1, M2), 1)
    # q = n*64 + ho*8 + wo  ->  source = n*256 + (2*ho)*16 + 2*wo
    src1 = ((q_i >> 6) << 8) + (((q_i >> 3) & 7) << 5) + ((q_i & 7) << 1)
    sel1 = (p_i == src1).astype(f32)                     # exact 0/1 selection
    x2 = jnp.dot(m1, sel1, preferred_element_type=f32)   # [8, 128]

    # ------------------ conv2: 8 -> 16 channels, 3x3, pad 1, ReLU -----------
    H2, W2 = 8, 8
    PAD2 = W2 + 1
    x2p_ref[...] = jnp.zeros_like(x2p_ref)
    x2p_ref[:, PAD2:PAD2 + M2] = x2

    lane2 = lax.broadcasted_iota(jnp.int32, (8, M2), 1)
    h2 = (lane2 >> 3) & (H2 - 1)
    w2 = lane2 & (W2 - 1)

    for dh in (-1, 0, 1):
        for dw in (-1, 0, 1):
            idx = (dh + 1) * 3 + (dw + 1)
            s = dh * W2 + dw
            shifted = x2p_ref[:, PAD2 + s:PAD2 + s + M2]
            valid = ((h2 + dh >= 0) & (h2 + dh < H2) &
                     (w2 + dw >= 0) & (w2 + dw < W2))
            a2_ref[idx * 8:(idx + 1) * 8, :] = jnp.where(valid, shifted, 0.0)

    y2 = jnp.dot(w2_ref[...], a2_ref[...].astype(bf16),
                 preferred_element_type=f32)             # [16, 128]
    y2 = jnp.maximum(y2 + b2_ref[...], 0.0)

    # ------------------ maxpool 2x2: [16, 128] -> [16, 32] ------------------
    y2p_ref[...] = jnp.zeros_like(y2p_ref)
    y2p_ref[:, 0:M2] = y2
    m2 = jnp.maximum(
        jnp.maximum(y2p_ref[:, 0:M2], y2p_ref[:, 1:1 + M2]),
        jnp.maximum(y2p_ref[:, W2:W2 + M2], y2p_ref[:, W2 + 1:W2 + 1 + M2]))

    M3 = n_img * 4 * 4            # 32 lanes
    p_j = lax.broadcasted_iota(jnp.int32, (M2, M3), 0)
    q_j = lax.broadcasted_iota(jnp.int32, (M2, M3), 1)
    # q = n*16 + ho*4 + wo  ->  source = n*64 + (2*ho)*8 + 2*wo
    src2 = ((q_j >> 4) << 6) + (((q_j >> 2) & 3) << 4) + ((q_j & 3) << 1)
    sel2 = (p_j == src2).astype(f32)
    x3 = jnp.dot(m2, sel2, preferred_element_type=f32)   # [16, 32]  (c, n*16+r)

    # ------------------ flatten (PyTorch C,H,W order) + Linear(256 -> 10) ---
    # wfc_ref[o, c, p] = fc_w[o, c*16 + (p % 16)], p = n*16 + h*4 + w, so the
    # per-lane weighted sum over channels followed by a per-image lane-group
    # reduction reproduces logits[n, o] = fc_w[o, :] . flatten(features[n]).
    u = jnp.sum(wfc_ref[...] * x3[None, :, :], axis=1)   # [10, n_img*16]
    g_p = lax.broadcasted_iota(jnp.int32, (M3, n_img), 0)
    g_n = lax.broadcasted_iota(jnp.int32, (M3, n_img), 1)
    group = ((g_p >> 4) == g_n).astype(f32)               # [32, n_img]
    out_ref[...] = (jnp.dot(u, group, preferred_element_type=f32)
                    + bfc_ref[...])                        # [10, n_img]


# ---------------------------------------------------------------------------
# Wrapper: tiny one-off layout prep in XLA, then a single fused Pallas kernel.
# ---------------------------------------------------------------------------
def _prep_params(params, n_img):
    # conv weights -> [Cout, (kh, kw, ci)] matmul layout, bf16 MXU inputs.
    w1m = jnp.transpose(params["conv1_w"], (0, 2, 3, 1)).reshape(8, 36)
    w2m = jnp.transpose(params["conv2_w"], (0, 2, 3, 1)).reshape(16, 72)
    w1m = w1m.astype(jnp.bfloat16)
    w2m = w2m.astype(jnp.bfloat16)
    b1 = params["conv1_b"].reshape(8, 1).astype(jnp.float32)
    b2 = params["conv2_b"].reshape(16, 1).astype(jnp.float32)
    # fc weight -> per-lane layout [o, c, n*16 + (h*4+w)] (tiled over images).
    wr = params["fc_w"].reshape(10, 16, 16).astype(jnp.float32)
    wfc = jnp.tile(wr, (1, 1, n_img))
    bfc = params["fc_b"].reshape(10, 1).astype(jnp.float32)
    return w1m, b1, w2m, b2, wfc, bfc


def deep_classifier_forward(x_nchw, params):
    n_img, cin, H, W = x_nchw.shape
    assert (cin, H, W) == (4, 16, 16), "kernel specialized to the assignment CNN"

    # layout prep (cheap, one XLA op each) — all compute happens in the kernel
    x_flat = (jnp.transpose(x_nchw, (1, 0, 2, 3))
              .reshape(cin, n_img * H * W).astype(jnp.float32))
    w1m, b1, w2m, b2, wfc, bfc = _prep_params(params, n_img)

    m1 = n_img * 16 * 16
    m2 = n_img * 8 * 8
    m3 = n_img * 4 * 4

    flops = (2 * 8 * 36 * m1 + 2 * 8 * m1 * m2 +       # conv1 + pool1 select
             2 * 16 * 72 * m2 + 2 * 16 * m2 * m3 +     # conv2 + pool2 select
             2 * 10 * 16 * m3 + 2 * 10 * m3 * n_img)   # fc
    bytes_accessed = (4 * (x_flat.size + b1.size + b2.size + wfc.size +
                           bfc.size + 10 * n_img)
                      + 2 * (w1m.size + w2m.size))

    kernel = functools.partial(_fused_cnn_kernel, n_img=n_img)

    logits_t = pl.pallas_call(
        kernel,
        out_shape=jax.ShapeDtypeStruct((10, n_img), jnp.float32),
        grid=(1,),
        in_specs=[
            pl.BlockSpec((4, m1), lambda i: (0, 0)),        # input  [C, N*H*W]
            pl.BlockSpec((8, 36), lambda i: (0, 0)),        # conv1 weight (bf16)
            pl.BlockSpec((8, 1), lambda i: (0, 0)),         # conv1 bias
            pl.BlockSpec((16, 72), lambda i: (0, 0)),       # conv2 weight (bf16)
            pl.BlockSpec((16, 1), lambda i: (0, 0)),        # conv2 bias
            pl.BlockSpec((10, 16, m3), lambda i: (0, 0, 0)),  # fc weight (per-lane)
            pl.BlockSpec((10, 1), lambda i: (0, 0)),        # fc bias
        ],
        out_specs=pl.BlockSpec((10, n_img), lambda i: (0, 0)),
        scratch_shapes=[
            pltpu.VMEM((4, m1 + 2 * 17), jnp.float32),   # zero-padded conv1 input
            pltpu.VMEM((36, m1), jnp.float32),           # conv1 im2col (in VMEM)
            pltpu.VMEM((8, m1 + 17), jnp.float32),       # conv1 out, padded for pool
            pltpu.VMEM((8, m2 + 2 * 9), jnp.float32),    # zero-padded conv2 input
            pltpu.VMEM((72, m2), jnp.float32),           # conv2 im2col (in VMEM)
            pltpu.VMEM((16, m2 + 9), jnp.float32),       # conv2 out, padded for pool
        ],
        compiler_params=pltpu.CompilerParams(
            dimension_semantics=("arbitrary",)),
        cost_estimate=pl.CostEstimate(
            flops=flops, transcendentals=0, bytes_accessed=bytes_accessed),
    )(x_flat, w1m, b1, w2m, b2, wfc, bfc)

    # back to PyTorch's [N, num_classes] layout (80-byte transpose)
    return logits_t.T


# ---------------------------------------------------------------------------
# DeepClassifier.forward == self.net(x)
# ---------------------------------------------------------------------------
def init_params(key):
    keys = jax.random.split(key, 6)
    return {
        "conv1_w": 0.1 * jax.random.normal(keys[0], (8, 4, 3, 3), jnp.float32),
        "conv1_b": 0.1 * jax.random.normal(keys[1], (8,), jnp.float32),
        "conv2_w": 0.1 * jax.random.normal(keys[2], (16, 8, 3, 3), jnp.float32),
        "conv2_b": 0.1 * jax.random.normal(keys[3], (16,), jnp.float32),
        "fc_w":    0.1 * jax.random.normal(keys[4], (10, 16 * 4 * 4), jnp.float32),
        "fc_b":    0.1 * jax.random.normal(keys[5], (10,), jnp.float32),
    }


if __name__ == "__main__":
    # TODO(synk): DeepClassifier.save/load are file I/O, not kernel work.
    key = jax.random.PRNGKey(0)
    k_x, k_p = jax.random.split(key)
    x = jax.random.normal(k_x, (2, 4, 16, 16), jnp.float32)   # NCHW, PyTorch-style
    params = init_params(k_p)

    logits = jax.jit(deep_classifier_forward)(x, params)
    jax.block_until_ready(logits)
    assert logits.shape == (2, 10) and logits.dtype == jnp.float32
    print("KERNEL_OK")
</pallas_src>

<mosaic_0001>
module attributes {stable_mosaic.version = 11 : i64} {
  func.func @_fused_cnn_kernel(%arg0: i32, %arg1: memref<4x512xf32, #tpu.memory_space<vmem>>, %arg2: memref<8x36xbf16, #tpu.memory_space<vmem>>, %arg3: memref<8x1xf32, #tpu.memory_space<vmem>>, %arg4: memref<16x72xbf16, #tpu.memory_space<vmem>>, %arg5: memref<16x1xf32, #tpu.memory_space<vmem>>, %arg6: memref<10x16x32xf32, #tpu.memory_space<vmem>>, %arg7: memref<10x1xf32, #tpu.memory_space<vmem>>, %arg8: memref<10x2xf32, #tpu.memory_space<vmem>>, %arg9: memref<4x546xf32, #tpu.memory_space<vmem>>, %arg10: memref<36x512xf32, #tpu.memory_space<vmem>>, %arg11: memref<8x529xf32, #tpu.memory_space<vmem>>, %arg12: memref<8x146xf32, #tpu.memory_space<vmem>>, %arg13: memref<72x128xf32, #tpu.memory_space<vmem>>, %arg14: memref<16x137xf32, #tpu.memory_space<vmem>>) attributes {dimension_semantics = [#tpu.dimension_semantics<arbitrary>], iteration_bounds = array<i64: 1>, scalar_prefetch = 0 : i64, scratch_operands = 6 : i64, tpu.core_type = #tpu.core_type<tc>, window_params = [{pipeline_mode = #tpu.pipeline_mode<synchronous>, transform_indices = @transform_0, window_bounds = array<i64: 4, 512>}, {pipeline_mode = #tpu.pipeline_mode<synchronous>, transform_indices = @transform_1, window_bounds = array<i64: 8, 36>}, {pipeline_mode = #tpu.pipeline_mode<synchronous>, transform_indices = @transform_2, window_bounds = array<i64: 8, 1>}, {pipeline_mode = #tpu.pipeline_mode<synchronous>, transform_indices = @transform_3, window_bounds = array<i64: 16, 72>}, {pipeline_mode = #tpu.pipeline_mode<synchronous>, transform_indices = @transform_4, window_bounds = array<i64: 16, 1>}, {pipeline_mode = #tpu.pipeline_mode<synchronous>, transform_indices = @transform_5, window_bounds = array<i64: 10, 16, 32>}, {pipeline_mode = #tpu.pipeline_mode<synchronous>, transform_indices = @transform_6, window_bounds = array<i64: 10, 1>}, {pipeline_mode = #tpu.pipeline_mode<synchronous>, transform_indices = @transform_7, window_bounds = array<i64: 10, 2>}]} {
    %cst = arith.constant 0.000000e+00 : f32
    %0 = vector.broadcast %cst : f32 to vector<4x546xf32>
    %c0 = arith.constant 0 : index
    %c0_0 = arith.constant 0 : index
    %1 = vector.load %arg9[%c0, %c0_0] : memref<4x546xf32, #tpu.memory_space<vmem>>, vector<4x546xf32>
    tpu.vector_store %arg9[%c0, %c0_0], %0 {strides = array<i32>} : memref<4x546xf32, #tpu.memory_space<vmem>>, vector<4x546xf32>,
    %c0_1 = arith.constant 0 : index
    %c0_2 = arith.constant 0 : index
    %2 = vector.load %arg1[%c0_1, %c0_2] : memref<4x512xf32, #tpu.memory_space<vmem>>, vector<4x512xf32>
    %c0_3 = arith.constant 0 : index
    %c17 = arith.constant 17 : index
    %3 = vector.load %arg9[%c0_3, %c17] : memref<4x546xf32, #tpu.memory_space<vmem>>, vector<4x512xf32>
    tpu.vector_store %arg9[%c0_3, %c17], %2 {strides = array<i32>} : memref<4x546xf32, #tpu.memory_space<vmem>>, vector<4x512xf32>,
    %4 = tpu.iota {dimensions = array<i32: 1>} : vector<4x512xi32>
    %c4_i32 = arith.constant 4 : i32
    %5 = vector.broadcast %c4_i32 : i32 to vector<4x512xi32>
    %6 = arith.shrsi %4, %5 : vector<4x512xi32>
    %c15_i32 = arith.constant 15 : i32
    %7 = vector.broadcast %c15_i32 : i32 to vector<4x512xi32>
    %8 = arith.andi %6, %7 : vector<4x512xi32>
    %c15_i32_4 = arith.constant 15 : i32
    %9 = vector.broadcast %c15_i32_4 : i32 to vector<4x512xi32>
    %10 = arith.andi %4, %9 : vector<4x512xi32>
    %c0_5 = arith.constant 0 : index
    %c0_6 = arith.constant 0 : index
    %11 = vector.load %arg9[%c0_5, %c0_6] : memref<4x546xf32, #tpu.memory_space<vmem>>, vector<4x512xf32>
    %c-1_i32 = arith.constant -1 : i32
    %12 = vector.broadcast %c-1_i32 : i32 to vector<4x512xi32>
    %13 = arith.addi %8, %12 : vector<4x512xi32>
    %c0_i32 = arith.constant 0 : i32
    %14 = vector.broadcast %c0_i32 : i32 to vector<4x512xi32>
    %15 = arith.cmpi sge, %13, %14 : vector<4x512xi32>
    %c-1_i32_7 = arith.constant -1 : i32
    %16 = vector.broadcast %c-1_i32_7 : i32 to vector<4x512xi32>
    %17 = arith.addi %8, %16 : vector<4x512xi32>
    %c16_i32 = arith.constant 16 : i32
    %18 = vector.broadcast %c16_i32 : i32 to vector<4x512xi32>
    %19 = arith.cmpi slt, %17, %18 : vector<4x512xi32>
    %20 = arith.andi %15, %19 : vector<4x512xi1>
    %c-1_i32_8 = arith.constant -1 : i32
    %21 = vector.broadcast %c-1_i32_8 : i32 to vector<4x512xi32>
    %22 = arith.addi %10, %21 : vector<4x512xi32>
    %c0_i32_9 = arith.constant 0 : i32
    %23 = vector.broadcast %c0_i32_9 : i32 to vector<4x512xi32>
    %24 = arith.cmpi sge, %22, %23 : vector<4x512xi32>
    %25 = arith.andi %20, %24 : vector<4x512xi1>
    %c-1_i32_10 = arith.constant -1 : i32
    %26 = vector.broadcast %c-1_i32_10 : i32 to vector<4x512xi32>
    %27 = arith.addi %10, %26 : vector<4x512xi32>
    %c16_i32_11 = arith.constant 16 : i32
    %28 = vector.broadcast %c16_i32_11 : i32 to vector<4x512xi32>
    %29 = arith.cmpi slt, %27, %28 : vector<4x512xi32>
    %30 = arith.andi %25, %29 : vector<4x512xi1>
    %cst_12 = arith.constant 0.000000e+00 : f32
    %31 = vector.broadcast %cst_12 : f32 to vector<4x512xf32>
    %32 = arith.select %30, %11, %31 : vector<4x512xi1>, vector<4x512xf32>
    %c0_13 = arith.constant 0 : index
    %c0_14 = arith.constant 0 : index
    %33 = vector.load %arg10[%c0_13, %c0_14] : memref<36x512xf32, #tpu.memory_space<vmem>>, vector<4x512xf32>
    tpu.vector_store %arg10[%c0_13, %c0_14], %32 {strides = array<i32>} : memref<36x512xf32, #tpu.memory_space<vmem>>, vector<4x512xf32>,
    %c0_15 = arith.constant 0 : index
    %c1 = arith.constant 1 : index
    %34 = vector.load %arg9[%c0_15, %c1] : memref<4x546xf32, #tpu.memory_space<vmem>>, vector<4x512xf32>
    %c-1_i32_16 = arith.constant -1 : i32
    %35 = vector.broadcast %c-1_i32_16 : i32 to vector<4x512xi32>
    %36 = arith.addi %8, %35 : vector<4x512xi32>
    %c0_i32_17 = arith.constant 0 : i32
    %37 = vector.broadcast %c0_i32_17 : i32 to vector<4x512xi32>
    %38 = arith.cmpi sge, %36, %37 : vector<4x512xi32>
    %c-1_i32_18 = arith.constant -1 : i32
    %39 = vector.broadcast %c-1_i32_18 : i32 to vector<4x512xi32>
    %40 = arith.addi %8, %39 : vector<4x512xi32>
    %c16_i32_19 = arith.constant 16 : i32
    %41 = vector.broadcast %c16_i32_19 : i32 to vector<4x512xi32>
    %42 = arith.cmpi slt, %40, %41 : vector<4x512xi32>
    %43 = arith.andi %38, %42 : vector<4x512xi1>
    %c0_i32_20 = arith.constant 0 : i32
    %44 = vector.broadcast %c0_i32_20 : i32 to vector<4x512xi32>
    %45 = arith.addi %10, %44 : vector<4x512xi32>
    %c0_i32_21 = arith.constant 0 : i32
    %46 = vector.broadcast %c0_i32_21 : i32 to vector<4x512xi32>
    %47 = arith.cmpi sge, %45, %46 : vector<4x512xi32>
    %48 = arith.andi %43, %47 : vector<4x512xi1>
    %c0_i32_22 = arith.constant 0 : i32
    %49 = vector.broadcast %c0_i32_22 : i32 to vector<4x512xi32>
    %50 = arith.addi %10, %49 : vector<4x512xi32>
    %c16_i32_23 = arith.constant 16 : i32
    %51 = vector.broadcast %c16_i32_23 : i32 to vector<4x512xi32>
    %52 = arith.cmpi slt, %50, %51 : vector<4x512xi32>
    %53 = arith.andi %48, %52 : vector<4x512xi1>
    %cst_24 = arith.constant 0.000000e+00 : f32
    %54 = vector.broadcast %cst_24 : f32 to vector<4x512xf32>
    %55 = arith.select %53, %34, %54 : vector<4x512xi1>, vector<4x512xf32>
    %c4 = arith.constant 4 : index
    %c0_25 = arith.constant 0 : index
    %56 = vector.load %arg10[%c4, %c0_25] : memref<36x512xf32, #tpu.memory_space<vmem>>, vector<4x512xf32>
    tpu.vector_store %arg10[%c4, %c0_25], %55 {strides = array<i32>} : memref<36x512xf32, #tpu.memory_space<vmem>>, vector<4x512xf32>,
    %c0_26 = arith.constant 0 : index
    %c2 = arith.constant 2 : index
    %57 = vector.load %arg9[%c0_26, %c2] : memref<4x546xf32, #tpu.memory_space<vmem>>, vector<4x512xf32>
    %c-1_i32_27 = arith.constant -1 : i32
    %58 = vector.broadcast %c-1_i32_27 : i32 to vector<4x512xi32>
    %59 = arith.addi %8, %58 : vector<4x512xi32>
    %c0_i32_28 = arith.constant 0 : i32
    %60 = vector.broadcast %c0_i32_28 : i32 to vector<4x512xi32>
    %61 = arith.cmpi sge, %59, %60 : vector<4x512xi32>
    %c-1_i32_29 = arith.constant -1 : i32
    %62 = vector.broadcast %c-1_i32_29 : i32 to vector<4x512xi32>
    %63 = arith.addi %8, %62 : vector<4x512xi32>
    %c16_i32_30 = arith.constant 16 : i32
    %64 = vector.broadcast %c16_i32_30 : i32 to vector<4x512xi32>
    %65 = arith.cmpi slt, %63, %64 : vector<4x512xi32>
    %66 = arith.andi %61, %65 : vector<4x512xi1>
    %c1_i32 = arith.constant 1 : i32
    %67 = vector.broadcast %c1_i32 : i32 to vector<4x512xi32>
    %68 = arith.addi %10, %67 : vector<4x512xi32>
    %c0_i32_31 = arith.constant 0 : i32
    %69 = vector.broadcast %c0_i32_31 : i32 to vector<4x512xi32>
    %70 = arith.cmpi sge, %68, %69 : vector<4x512xi32>
    %71 = arith.andi %66, %70 : vector<4x512xi1>
    %c1_i32_32 = arith.constant 1 : i32
    %72 = vector.broadcast %c1_i32_32 : i32 to vector<4x512xi32>
    %73 = arith.addi %10, %72 : vector<4x512xi32>
    %c16_i32_33 = arith.constant 16 : i32
    %74 = vector.broadcast %c16_i32_33 : i32 to vector<4x512xi32>
    %75 = arith.cmpi slt, %73, %74 : vector<4x512xi32>
    %76 = arith.andi %71, %75 : vector<4x512xi1>
    %cst_34 = arith.constant 0.000000e+00 : f32
    %77 = vector.broadcast %cst_34 : f32 to vector<4x512xf32>
    %78 = arith.select %76, %57, %77 : vector<4x512xi1>, vector<4x512xf32>
    %c8 = arith.constant 8 : index
    %c0_35 = arith.constant 0 : index
    %79 = vector.load %arg10[%c8, %c0_35] : memref<36x512xf32, #tpu.memory_space<vmem>>, vector<4x512xf32>
    tpu.vector_store %arg10[%c8, %c0_35], %78 {strides = array<i32>} : memref<36x512xf32, #tpu.memory_space<vmem>>, vector<4x512xf32>,
    %c0_36 = arith.constant 0 : index
    %c16 = arith.constant 16 : index
    %80 = vector.load %arg9[%c0_36, %c16] : memref<4x546xf32, #tpu.memory_space<vmem>>, vector<4x512xf32>
    %c0_i32_37 = arith.constant 0 : i32
    %81 = vector.broadcast %c0_i32_37 : i32 to vector<4x512xi32>
    %82 = arith.addi %8, %81 : vector<4x512xi32>
    %c0_i32_38 = arith.constant 0 : i32
    %83 = vector.broadcast %c0_i32_38 : i32 to vector<4x512xi32>
    %84 = arith.cmpi sge, %82, %83 : vector<4x512xi32>
    %c0_i32_39 = arith.constant 0 : i32
    %85 = vector.broadcast %c0_i32_39 : i32 to vector<4x512xi32>
    %86 = arith.addi %8, %85 : vector<4x512xi32>
    %c16_i32_40 = arith.constant 16 : i32
    %87 = vector.broadcast %c16_i32_40 : i32 to vector<4x512xi32>
    %88 = arith.cmpi slt, %86, %87 : vector<4x512xi32>
    %89 = arith.andi %84, %88 : vector<4x512xi1>
    %c-1_i32_41 = arith.constant -1 : i32
    %90 = vector.broadcast %c-1_i32_41 : i32 to vector<4x512xi32>
    %91 = arith.addi %10, %90 : vector<4x512xi32>
    %c0_i32_42 = arith.constant 0 : i32
    %92 = vector.broadcast %c0_i32_42 : i32 to vector<4x512xi32>
    %93 = arith.cmpi sge, %91, %92 : vector<4x512xi32>
    %94 = arith.andi %89, %93 : vector<4x512xi1>
    %c-1_i32_43 = arith.constant -1 : i32
    %95 = vector.broadcast %c-1_i32_43 : i32 to vector<4x512xi32>
    %96 = arith.addi %10, %95 : vector<4x512xi32>
    %c16_i32_44 = arith.constant 16 : i32
    %97 = vector.broadcast %c16_i32_44 : i32 to vector<4x512xi32>
    %98 = arith.cmpi slt, %96, %97 : vector<4x512xi32>
    %99 = arith.andi %94, %98 : vector<4x512xi1>
    %cst_45 = arith.constant 0.000000e+00 : f32
    %100 = vector.broadcast %cst_45 : f32 to vector<4x512xf32>
    %101 = arith.select %99, %80, %100 : vector<4x512xi1>, vector<4x512xf32>
    %c12 = arith.constant 12 : index
    %c0_46 = arith.constant 0 : index
    %102 = vector.load %arg10[%c12, %c0_46] : memref<36x512xf32, #tpu.memory_space<vmem>>, vector<4x512xf32>
    tpu.vector_store %arg10[%c12, %c0_46], %101 {strides = array<i32>} : memref<36x512xf32, #tpu.memory_space<vmem>>, vector<4x512xf32>,
    %c0_47 = arith.constant 0 : index
    %c17_48 = arith.constant 17 : index
    %103 = vector.load %arg9[%c0_47, %c17_48] : memref<4x546xf32, #tpu.memory_space<vmem>>, vector<4x512xf32>
    %c0_i32_49 = arith.constant 0 : i32
    %104 = vector.broadcast %c0_i32_49 : i32 to vector<4x512xi32>
    %105 = arith.addi %8, %104 : vector<4x512xi32>
    %c0_i32_50 = arith.constant 0 : i32
    %106 = vector.broadcast %c0_i32_50 : i32 to vector<4x512xi32>
    %107 = arith.cmpi sge, %105, %106 : vector<4x512xi32>
    %c0_i32_51 = arith.constant 0 : i32
    %108 = vector.broadcast %c0_i32_51 : i32 to vector<4x512xi32>
    %109 = arith.addi %8, %108 : vector<4x512xi32>
    %c16_i32_52 = arith.constant 16 : i32
    %110 = vector.broadcast %c16_i32_52 : i32 to vector<4x512xi32>
    %111 = arith.cmpi slt, %109, %110 : vector<4x512xi32>
    %112 = arith.andi %107, %111 : vector<4x512xi1>
    %c0_i32_53 = arith.constant 0 : i32
    %113 = vector.broadcast %c0_i32_53 : i32 to vector<4x512xi32>
    %114 = arith.addi %10, %113 : vector<4x512xi32>
    %c0_i32_54 = arith.constant 0 : i32
    %115 = vector.broadcast %c0_i32_54 : i32 to vector<4x512xi32>
    %116 = arith.cmpi sge, %114, %115 : vector<4x512xi32>
    %117 = arith.andi %112, %116 : vector<4x512xi1>
    %c0_i32_55 = arith.constant 0 : i32
    %118 = vector.broadcast %c0_i32_55 : i32 to vector<4x512xi32>
    %119 = arith.addi %10, %118 : vector<4x512xi32>
    %c16_i32_56 = arith.constant 16 : i32
    %120 = vector.broadcast %c16_i32_56 : i32 to vector<4x512xi32>
    %121 = arith.cmpi slt, %119, %120 : vector<4x512xi32>
    %122 = arith.andi %117, %121 : vector<4x512xi1>
    %cst_57 = arith.constant 0.000000e+00 : f32
    %123 = vector.broadcast %cst_57 : f32 to vector<4x512xf32>
    %124 = arith.select %122, %103, %123 : vector<4x512xi1>, vector<4x512xf32>
    %c16_58 = arith.constant 16 : index
    %c0_59 = arith.constant 0 : index
    %125 = vector.load %arg10[%c16_58, %c0_59] : memref<36x512xf32, #tpu.memory_space<vmem>>, vector<4x512xf32>
    tpu.vector_store %arg10[%c16_58, %c0_59], %124 {strides = array<i32>} : memref<36x512xf32, #tpu.memory_space<vmem>>, vector<4x512xf32>,
    %c0_60 = arith.constant 0 : index
    %c18 = arith.constant 18 : index
    %126 = vector.load %arg9[%c0_60, %c18] : memref<4x546xf32, #tpu.memory_space<vmem>>, vector<4x512xf32>
    %c0_i32_61 = arith.constant 0 : i32
    %127 = vector.broadcast %c0_i32_61 : i32 to vector<4x512xi32>
    %128 = arith.addi %8, %127 : vector<4x512xi32>
    %c0_i32_62 = arith.constant 0 : i32
    %129 = vector.broadcast %c0_i32_62 : i32 to vector<4x512xi32>
    %130 = arith.cmpi sge, %128, %129 : vector<4x512xi32>
    %c0_i32_63 = arith.constant 0 : i32
    %131 = vector.broadcast %c0_i32_63 : i32 to vector<4x512xi32>
    %132 = arith.addi %8, %131 : vector<4x512xi32>
    %c16_i32_64 = arith.constant 16 : i32
    %133 = vector.broadcast %c16_i32_64 : i32 to vector<4x512xi32>
    %134 = arith.cmpi slt, %132, %133 : vector<4x512xi32>
    %135 = arith.andi %130, %134 : vector<4x512xi1>
    %c1_i32_65 = arith.constant 1 : i32
    %136 = vector.broadcast %c1_i32_65 : i32 to vector<4x512xi32>
    %137 = arith.addi %10, %136 : vector<4x512xi32>
    %c0_i32_66 = arith.constant 0 : i32
    %138 = vector.broadcast %c0_i32_66 : i32 to vector<4x512xi32>
    %139 = arith.cmpi sge, %137, %138 : vector<4x512xi32>
    %140 = arith.andi %135, %139 : vector<4x512xi1>
    %c1_i32_67 = arith.constant 1 : i32
    %141 = vector.broadcast %c1_i32_67 : i32 to vector<4x512xi32>
    %142 = arith.addi %10, %141 : vector<4x512xi32>
    %c16_i32_68 = arith.constant 16 : i32
    %143 = vector.broadcast %c16_i32_68 : i32 to vector<4x512xi32>
    %144 = arith.cmpi slt, %142, %143 : vector<4x512xi32>
    %145 = arith.andi %140, %144 : vector<4x512xi1>
    %cst_69 = arith.constant 0.000000e+00 : f32
    %146 = vector.broadcast %cst_69 : f32 to vector<4x512xf32>
    %147 = arith.select %145, %126, %146 : vector<4x512xi1>, vector<4x512xf32>
    %c20 = arith.constant 20 : index
    %c0_70 = arith.constant 0 : index
    %148 = vector.load %arg10[%c20, %c0_70] : memref<36x512xf32, #tpu.memory_space<vmem>>, vector<4x512xf32>
    tpu.vector_store %arg10[%c20, %c0_70], %147 {strides = array<i32>} : memref<36x512xf32, #tpu.memory_space<vmem>>, vector<4x512xf32>,
    %c0_71 = arith.constant 0 : index
    %c32 = arith.constant 32 : index
    %149 = vector.load %arg9[%c0_71, %c32] : memref<4x546xf32, #tpu.memory_space<vmem>>, vector<4x512xf32>
    %c1_i32_72 = arith.constant 1 : i32
    %150 = vector.broadcast %c1_i32_72 : i32 to vector<4x512xi32>
    %151 = arith.addi %8, %150 : vector<4x512xi32>
    %c0_i32_73 = arith.constant 0 : i32
    %152 = vector.broadcast %c0_i32_73 : i32 to vector<4x512xi32>
    %153 = arith.cmpi sge, %151, %152 : vector<4x512xi32>
    %c1_i32_74 = arith.constant 1 : i32
    %154 = vector.broadcast %c1_i32_74 : i32 to vector<4x512xi32>
    %155 = arith.addi %8, %154 : vector<4x512xi32>
    %c16_i32_75 = arith.constant 16 : i32
    %156 = vector.broadcast %c16_i32_75 : i32 to vector<4x512xi32>
    %157 = arith.cmpi slt, %155, %156 : vector<4x512xi32>
    %158 = arith.andi %153, %157 : vector<4x512xi1>
    %c-1_i32_76 = arith.constant -1 : i32
    %159 = vector.broadcast %c-1_i32_76 : i32 to vector<4x512xi32>
    %160 = arith.addi %10, %159 : vector<4x512xi32>
    %c0_i32_77 = arith.constant 0 : i32
    %161 = vector.broadcast %c0_i32_77 : i32 to vector<4x512xi32>
    %162 = arith.cmpi sge, %160, %161 : vector<4x512xi32>
    %163 = arith.andi %158, %162 : vector<4x512xi1>
    %c-1_i32_78 = arith.constant -1 : i32
    %164 = vector.broadcast %c-1_i32_78 : i32 to vector<4x512xi32>
    %165 = arith.addi %10, %164 : vector<4x512xi32>
    %c16_i32_79 = arith.constant 16 : i32
    %166 = vector.broadcast %c16_i32_79 : i32 to vector<4x512xi32>
    %167 = arith.cmpi slt, %165, %166 : vector<4x512xi32>
    %168 = arith.andi %163, %167 : vector<4x512xi1>
    %cst_80 = arith.constant 0.000000e+00 : f32
    %169 = vector.broadcast %cst_80 : f32 to vector<4x512xf32>
    %170 = arith.select %168, %149, %169 : vector<4x512xi1>, vector<4x512xf32>
    %c24 = arith.constant 24 : index
    %c0_81 = arith.constant 0 : index
    %171 = vector.load %arg10[%c24, %c0_81] : memref<36x512xf32, #tpu.memory_space<vmem>>, vector<4x512xf32>
    tpu.vector_store %arg10[%c24, %c0_81], %170 {strides = array<i32>} : memref<36x512xf32, #tpu.memory_space<vmem>>, vector<4x512xf32>,
    %c0_82 = arith.constant 0 : index
    %c33 = arith.constant 33 : index
    %172 = vector.load %arg9[%c0_82, %c33] : memref<4x546xf32, #tpu.memory_space<vmem>>, vector<4x512xf32>
    %c1_i32_83 = arith.constant 1 : i32
    %173 = vector.broadcast %c1_i32_83 : i32 to vector<4x512xi32>
    %174 = arith.addi %8, %173 : vector<4x512xi32>
    %c0_i32_84 = arith.constant 0 : i32
    %175 = vector.broadcast %c0_i32_84 : i32 to vector<4x512xi32>
    %176 = arith.cmpi sge, %174, %175 : vector<4x512xi32>
    %c1_i32_85 = arith.constant 1 : i32
    %177 = vector.broadcast %c1_i32_85 : i32 to vector<4x512xi32>
    %178 = arith.addi %8, %177 : vector<4x512xi32>
    %c16_i32_86 = arith.constant 16 : i32
    %179 = vector.broadcast %c16_i32_86 : i32 to vector<4x512xi32>
    %180 = arith.cmpi slt, %178, %179 : vector<4x512xi32>
    %181 = arith.andi %176, %180 : vector<4x512xi1>
    %c0_i32_87 = arith.constant 0 : i32
    %182 = vector.broadcast %c0_i32_87 : i32 to vector<4x512xi32>
    %183 = arith.addi %10, %182 : vector<4x512xi32>
    %c0_i32_88 = arith.constant 0 : i32
    %184 = vector.broadcast %c0_i32_88 : i32 to vector<4x512xi32>
    %185 = arith.cmpi sge, %183, %184 : vector<4x512xi32>
    %186 = arith.andi %181, %185 : vector<4x512xi1>
    %c0_i32_89 = arith.constant 0 : i32
    %187 = vector.broadcast %c0_i32_89 : i32 to vector<4x512xi32>
    %188 = arith.addi %10, %187 : vector<4x512xi32>
    %c16_i32_90 = arith.constant 16 : i32
    %189 = vector.broadcast %c16_i32_90 : i32 to vector<4x512xi32>
    %190 = arith.cmpi slt, %188, %189 : vector<4x512xi32>
    %191 = arith.andi %186, %190 : vector<4x512xi1>
    %cst_91 = arith.constant 0.000000e+00 : f32
    %192 = vector.broadcast %cst_91 : f32 to vector<4x512xf32>
    %193 = arith.select %191, %172, %192 : vector<4x512xi1>, vector<4x512xf32>
    %c28 = arith.constant 28 : index
    %c0_92 = arith.constant 0 : index
    %194 = vector.load %arg10[%c28, %c0_92] : memref<36x512xf32, #tpu.memory_space<vmem>>, vector<4x512xf32>
    tpu.vector_store %arg10[%c28, %c0_92], %193 {strides = array<i32>} : memref<36x512xf32, #tpu.memory_space<vmem>>, vector<4x512xf32>,
    %c0_93 = arith.constant 0 : index
    %c34 = arith.constant 34 : index
    %195 = vector.load %arg9[%c0_93, %c34] : memref<4x546xf32, #tpu.memory_space<vmem>>, vector<4x512xf32>
    %c1_i32_94 = arith.constant 1 : i32
    %196 = vector.broadcast %c1_i32_94 : i32 to vector<4x512xi32>
    %197 = arith.addi %8, %196 : vector<4x512xi32>
    %c0_i32_95 = arith.constant 0 : i32
    %198 = vector.broadcast %c0_i32_95 : i32 to vector<4x512xi32>
    %199 = arith.cmpi sge, %197, %198 : vector<4x512xi32>
    %c1_i32_96 = arith.constant 1 : i32
    %200 = vector.broadcast %c1_i32_96 : i32 to vector<4x512xi32>
    %201 = arith.addi %8, %200 : vector<4x512xi32>
    %c16_i32_97 = arith.constant 16 : i32
    %202 = vector.broadcast %c16_i32_97 : i32 to vector<4x512xi32>
    %203 = arith.cmpi slt, %201, %202 : vector<4x512xi32>
    %204 = arith.andi %199, %203 : vector<4x512xi1>
    %c1_i32_98 = arith.constant 1 : i32
    %205 = vector.broadcast %c1_i32_98 : i32 to vector<4x512xi32>
    %206 = arith.addi %10, %205 : vector<4x512xi32>
    %c0_i32_99 = arith.constant 0 : i32
    %207 = vector.broadcast %c0_i32_99 : i32 to vector<4x512xi32>
    %208 = arith.cmpi sge, %206, %207 : vector<4x512xi32>
    %209 = arith.andi %204, %208 : vector<4x512xi1>
    %c1_i32_100 = arith.constant 1 : i32
    %210 = vector.broadcast %c1_i32_100 : i32 to vector<4x512xi32>
    %211 = arith.addi %10, %210 : vector<4x512xi32>
    %c16_i32_101 = arith.constant 16 : i32
    %212 = vector.broadcast %c16_i32_101 : i32 to vector<4x512xi32>
    %213 = arith.cmpi slt, %211, %212 : vector<4x512xi32>
    %214 = arith.andi %209, %213 : vector<4x512xi1>
    %cst_102 = arith.constant 0.000000e+00 : f32
    %215 = vector.broadcast %cst_102 : f32 to vector<4x512xf32>
    %216 = arith.select %214, %195, %215 : vector<4x512xi1>, vector<4x512xf32>
    %c32_103 = arith.constant 32 : index
    %c0_104 = arith.constant 0 : index
    %217 = vector.load %arg10[%c32_103, %c0_104] : memref<36x512xf32, #tpu.memory_space<vmem>>, vector<4x512xf32>
    tpu.vector_store %arg10[%c32_103, %c0_104], %216 {strides = array<i32>} : memref<36x512xf32, #tpu.memory_space<vmem>>, vector<4x512xf32>,
    %c0_105 = arith.constant 0 : index
    %c0_106 = arith.constant 0 : index
    %218 = vector.load %arg2[%c0_105, %c0_106] : memref<8x36xbf16, #tpu.memory_space<vmem>>, vector<8x36xbf16>
    %c0_107 = arith.constant 0 : index
    %c0_108 = arith.constant 0 : index
    %219 = vector.load %arg10[%c0_107, %c0_108] : memref<36x512xf32, #tpu.memory_space<vmem>>, vector<36x512xf32>
    %220 = arith.truncf %219 : vector<36x512xf32> to vector<36x512xbf16>
    %cst_109 = arith.constant dense<0.000000e+00> : vector<8x512xf32>
    %221 = tpu.matmul %218, %220, %cst_109 {dimension_numbers = #tpu.dot_dimension_numbers<[1], [0], [0], [1], [0, 0, 1, 1], [], []>} : vector<8x36xbf16>, vector<36x512xbf16>, vector<8x512xf32> -> vector<8x512xf32>
    %c0_110 = arith.constant 0 : index
    %c0_111 = arith.constant 0 : index
    %222 = vector.load %arg3[%c0_110, %c0_111] : memref<8x1xf32, #tpu.memory_space<vmem>>, vector<8x1xf32>
    %223 = vector.broadcast %222 : vector<8x1xf32> to vector<8x512xf32>
    %224 = arith.addf %221, %223 : vector<8x512xf32>
    %cst_112 = arith.constant 0.000000e+00 : f32
    %225 = vector.broadcast %cst_112 : f32 to vector<8x512xf32>
    %226 = arith.maximumf %224, %225 : vector<8x512xf32>
    %cst_113 = arith.constant 0.000000e+00 : f32
    %227 = vector.broadcast %cst_113 : f32 to vector<8x529xf32>
    %c0_114 = arith.constant 0 : index
    %c0_115 = arith.constant 0 : index
    %228 = vector.load %arg11[%c0_114, %c0_115] : memref<8x529xf32, #tpu.memory_space<vmem>>, vector<8x529xf32>
    tpu.vector_store %arg11[%c0_114, %c0_115], %227 {strides = array<i32>} : memref<8x529xf32, #tpu.memory_space<vmem>>, vector<8x529xf32>,
    %c0_116 = arith.constant 0 : index
    %c0_117 = arith.constant 0 : index
    %229 = vector.load %arg11[%c0_116, %c0_117] : memref<8x529xf32, #tpu.memory_space<vmem>>, vector<8x512xf32>
    tpu.vector_store %arg11[%c0_116, %c0_117], %226 {strides = array<i32>} : memref<8x529xf32, #tpu.memory_space<vmem>>, vector<8x512xf32>,
    %c0_118 = arith.constant 0 : index
    %c0_119 = arith.constant 0 : index
    %230 = vector.load %arg11[%c0_118, %c0_119] : memref<8x529xf32, #tpu.memory_space<vmem>>, vector<8x512xf32>
    %c0_120 = arith.constant 0 : index
    %c1_121 = arith.constant 1 : index
    %231 = vector.load %arg11[%c0_120, %c1_121] : memref<8x529xf32, #tpu.memory_space<vmem>>, vector<8x512xf32>
    %232 = arith.maximumf %230, %231 : vector<8x512xf32>
    %c0_122 = arith.constant 0 : index
    %c16_123 = arith.constant 16 : index
    %233 = vector.load %arg11[%c0_122, %c16_123] : memref<8x529xf32, #tpu.memory_space<vmem>>, vector<8x512xf32>
    %c0_124 = arith.constant 0 : index
    %c17_125 = arith.constant 17 : index
    %234 = vector.load %arg11[%c0_124, %c17_125] : memref<8x529xf32, #tpu.memory_space<vmem>>, vector<8x512xf32>
    %235 = arith.maximumf %233, %234 : vector<8x512xf32>
    %236 = arith.maximumf %232, %235 : vector<8x512xf32>
    %237 = tpu.iota {dimensions = array<i32: 0>} : vector<512x128xi32>
    %238 = tpu.iota {dimensions = array<i32: 1>} : vector<512x128xi32>
    %c6_i32 = arith.constant 6 : i32
    %239 = vector.broadcast %c6_i32 : i32 to vector<512x128xi32>
    %240 = arith.shrsi %238, %239 : vector<512x128xi32>
    %c8_i32 = arith.constant 8 : i32
    %241 = vector.broadcast %c8_i32 : i32 to vector<512x128xi32>
    %242 = arith.shli %240, %241 : vector<512x128xi32>
    %c3_i32 = arith.constant 3 : i32
    %243 = vector.broadcast %c3_i32 : i32 to vector<512x128xi32>
    %244 = arith.shrsi %238, %243 : vector<512x128xi32>
    %c7_i32 = arith.constant 7 : i32
    %245 = vector.broadcast %c7_i32 : i32 to vector<512x128xi32>
    %246 = arith.andi %244, %245 : vector<512x128xi32>
    %c5_i32 = arith.constant 5 : i32
    %247 = vector.broadcast %c5_i32 : i32 to vector<512x128xi32>
    %248 = arith.shli %246, %247 : vector<512x128xi32>
    %249 = arith.addi %242, %248 : vector<512x128xi32>
    %c7_i32_126 = arith.constant 7 : i32
    %250 = vector.broadcast %c7_i32_126 : i32 to vector<512x128xi32>
    %251 = arith.andi %238, %250 : vector<512x128xi32>
    %c1_i32_127 = arith.constant 1 : i32
    %252 = vector.broadcast %c1_i32_127 : i32 to vector<512x128xi32>
    %253 = arith.shli %251, %252 : vector<512x128xi32>
    %254 = arith.addi %249, %253 : vector<512x128xi32>
    %255 = arith.cmpi eq, %237, %254 : vector<512x128xi32>
    %256 = arith.extui %255 : vector<512x128xi1> to vector<512x128xi32>
    %257 = arith.sitofp %256 : vector<512x128xi32> to vector<512x128xf32>
    %cst_128 = arith.constant dense<0.000000e+00> : vector<8x128xf32>
    %258 = tpu.matmul %236, %257, %cst_128 {dimension_numbers = #tpu.dot_dimension_numbers<[1], [0], [0], [1], [0, 0, 1, 1], [], []>} : vector<8x512xf32>, vector<512x128xf32>, vector<8x128xf32> -> vector<8x128xf32>
    %cst_129 = arith.constant 0.000000e+00 : f32
    %259 = vector.broadcast %cst_129 : f32 to vector<8x146xf32>
    %c0_130 = arith.constant 0 : index
    %c0_131 = arith.constant 0 : index
    %260 = vector.load %arg12[%c0_130, %c0_131] : memref<8x146xf32, #tpu.memory_space<vmem>>, vector<8x146xf32>
    tpu.vector_store %arg12[%c0_130, %c0_131], %259 {strides = array<i32>} : memref<8x146xf32, #tpu.memory_space<vmem>>, vector<8x146xf32>,
    %c0_132 = arith.constant 0 : index
    %c9 = arith.constant 9 : index
    %261 = vector.load %arg12[%c0_132, %c9] : memref<8x146xf32, #tpu.memory_space<vmem>>, vector<8x128xf32>
    tpu.vector_store %arg12[%c0_132, %c9], %258 {strides = array<i32>} : memref<8x146xf32, #tpu.memory_space<vmem>>, vector<8x128xf32>,
    %262 = tpu.iota {dimensions = array<i32: 1>} : vector<8x128xi32>
    %c3_i32_133 = arith.constant 3 : i32
    %263 = vector.broadcast %c3_i32_133 : i32 to vector<8x128xi32>
    %264 = arith.shrsi %262, %263 : vector<8x128xi32>
    %c7_i32_134 = arith.constant 7 : i32
    %265 = vector.broadcast %c7_i32_134 : i32 to vector<8x128xi32>
    %266 = arith.andi %264, %265 : vector<8x128xi32>
    %c7_i32_135 = arith.constant 7 : i32
    %267 = vector.broadcast %c7_i32_135 : i32 to vector<8x128xi32>
    %268 = arith.andi %262, %267 : vector<8x128xi32>
    %c0_136 = arith.constant 0 : index
    %c0_137 = arith.constant 0 : index
    %269 = vector.load %arg12[%c0_136, %c0_137] : memref<8x146xf32, #tpu.memory_space<vmem>>, vector<8x128xf32>
    %c-1_i32_138 = arith.constant -1 : i32
    %270 = vector.broadcast %c-1_i32_138 : i32 to vector<8x128xi32>
    %271 = arith.addi %266, %270 : vector<8x128xi32>
    %c0_i32_139 = arith.constant 0 : i32
    %272 = vector.broadcast %c0_i32_139 : i32 to vector<8x128xi32>
    %273 = arith.cmpi sge, %271, %272 : vector<8x128xi32>
    %c-1_i32_140 = arith.constant -1 : i32
    %274 = vector.broadcast %c-1_i32_140 : i32 to vector<8x128xi32>
    %275 = arith.addi %266, %274 : vector<8x128xi32>
    %c8_i32_141 = arith.constant 8 : i32
    %276 = vector.broadcast %c8_i32_141 : i32 to vector<8x128xi32>
    %277 = arith.cmpi slt, %275, %276 : vector<8x128xi32>
    %278 = arith.andi %273, %277 : vector<8x128xi1>
    %c-1_i32_142 = arith.constant -1 : i32
    %279 = vector.broadcast %c-1_i32_142 : i32 to vector<8x128xi32>
    %280 = arith.addi %268, %279 : vector<8x128xi32>
    %c0_i32_143 = arith.constant 0 : i32
    %281 = vector.broadcast %c0_i32_143 : i32 to vector<8x128xi32>
    %282 = arith.cmpi sge, %280, %281 : vector<8x128xi32>
    %283 = arith.andi %278, %282 : vector<8x128xi1>
    %c-1_i32_144 = arith.constant -1 : i32
    %284 = vector.broadcast %c-1_i32_144 : i32 to vector<8x128xi32>
    %285 = arith.addi %268, %284 : vector<8x128xi32>
    %c8_i32_145 = arith.constant 8 : i32
    %286 = vector.broadcast %c8_i32_145 : i32 to vector<8x128xi32>
    %287 = arith.cmpi slt, %285, %286 : vector<8x128xi32>
    %288 = arith.andi %283, %287 : vector<8x128xi1>
    %cst_146 = arith.constant 0.000000e+00 : f32
    %289 = vector.broadcast %cst_146 : f32 to vector<8x128xf32>
    %290 = arith.select %288, %269, %289 : vector<8x128xi1>, vector<8x128xf32>
    %c0_147 = arith.constant 0 : index
    %c0_148 = arith.constant 0 : index
    %291 = vector.load %arg13[%c0_147, %c0_148] : memref<72x128xf32, #tpu.memory_space<vmem>>, vector<8x128xf32>
    tpu.vector_store %arg13[%c0_147, %c0_148], %290 {strides = array<i32>} : memref<72x128xf32, #tpu.memory_space<vmem>>, vector<8x128xf32>,
    %c0_149 = arith.constant 0 : index
    %c1_150 = arith.constant 1 : index
    %292 = vector.load %arg12[%c0_149, %c1_150] : memref<8x146xf32, #tpu.memory_space<vmem>>, vector<8x128xf32>
    %c-1_i32_151 = arith.constant -1 : i32
    %293 = vector.broadcast %c-1_i32_151 : i32 to vector<8x128xi32>
    %294 = arith.addi %266, %293 : vector<8x128xi32>
    %c0_i32_152 = arith.constant 0 : i32
    %295 = vector.broadcast %c0_i32_152 : i32 to vector<8x128xi32>
    %296 = arith.cmpi sge, %294, %295 : vector<8x128xi32>
    %c-1_i32_153 = arith.constant -1 : i32
    %297 = vector.broadcast %c-1_i32_153 : i32 to vector<8x128xi32>
    %298 = arith.addi %266, %297 : vector<8x128xi32>
    %c8_i32_154 = arith.constant 8 : i32
    %299 = vector.broadcast %c8_i32_154 : i32 to vector<8x128xi32>
    %300 = arith.cmpi slt, %298, %299 : vector<8x128xi32>
    %301 = arith.andi %296, %300 : vector<8x128xi1>
    %c0_i32_155 = arith.constant 0 : i32
    %302 = vector.broadcast %c0_i32_155 : i32 to vector<8x128xi32>
    %303 = arith.addi %268, %302 : vector<8x128xi32>
    %c0_i32_156 = arith.constant 0 : i32
    %304 = vector.broadcast %c0_i32_156 : i32 to vector<8x128xi32>
    %305 = arith.cmpi sge, %303, %304 : vector<8x128xi32>
    %306 = arith.andi %301, %305 : vector<8x128xi1>
    %c0_i32_157 = arith.constant 0 : i32
    %307 = vector.broadcast %c0_i32_157 : i32 to vector<8x128xi32>
    %308 = arith.addi %268, %307 : vector<8x128xi32>
    %c8_i32_158 = arith.constant 8 : i32
    %309 = vector.broadcast %c8_i32_158 : i32 to vector<8x128xi32>
    %310 = arith.cmpi slt, %308, %309 : vector<8x128xi32>
    %311 = arith.andi %306, %310 : vector<8x128xi1>
    %cst_159 = arith.constant 0.000000e+00 : f32
    %312 = vector.broadcast %cst_159 : f32 to vector<8x128xf32>
    %313 = arith.select %311, %292, %312 : vector<8x128xi1>, vector<8x128xf32>
    %c8_160 = arith.constant 8 : index
    %c0_161 = arith.constant 0 : index
    %314 = vector.load %arg13[%c8_160, %c0_161] : memref<72x128xf32, #tpu.memory_space<vmem>>, vector<8x128xf32>
    tpu.vector_store %arg13[%c8_160, %c0_161], %313 {strides = array<i32>} : memref<72x128xf32, #tpu.memory_space<vmem>>, vector<8x128xf32>,
    %c0_162 = arith.constant 0 : index
    %c2_163 = arith.constant 2 : index
    %315 = vector.load %arg12[%c0_162, %c2_163] : memref<8x146xf32, #tpu.memory_space<vmem>>, vector<8x128xf32>
    %c-1_i32_164 = arith.constant -1 : i32
    %316 = vector.broadcast %c-1_i32_164 : i32 to vector<8x128xi32>
    %317 = arith.addi %266, %316 : vector<8x128xi32>
    %c0_i32_165 = arith.constant 0 : i32
    %318 = vector.broadcast %c0_i32_165 : i32 to vector<8x128xi32>
    %319 = arith.cmpi sge, %317, %318 : vector<8x128xi32>
    %c-1_i32_166 = arith.constant -1 : i32
    %320 = vector.broadcast %c-1_i32_166 : i32 to vector<8x128xi32>
    %321 = arith.addi %266, %320 : vector<8x128xi32>
    %c8_i32_167 = arith.constant 8 : i32
    %322 = vector.broadcast %c8_i32_167 : i32 to vector<8x128xi32>
    %323 = arith.cmpi slt, %321, %322 : vector<8x128xi32>
    %324 = arith.andi %319, %323 : vector<8x128xi1>
    %c1_i32_168 = arith.constant 1 : i32
    %325 = vector.broadcast %c1_i32_168 : i32 to vector<8x128xi32>
    %326 = arith.addi %268, %325 : vector<8x128xi32>
    %c0_i32_169 = arith.constant 0 : i32
    %327 = vector.broadcast %c0_i32_169 : i32 to vector<8x128xi32>
    %328 = arith.cmpi sge, %326, %327 : vector<8x128xi32>
    %329 = arith.andi %324, %328 : vector<8x128xi1>
    %c1_i32_170 = arith.constant 1 : i32
    %330 = vector.broadcast %c1_i32_170 : i32 to vector<8x128xi32>
    %331 = arith.addi %268, %330 : vector<8x128xi32>
    %c8_i32_171 = arith.constant 8 : i32
    %332 = vector.broadcast %c8_i32_171 : i32 to vector<8x128xi32>
    %333 = arith.cmpi slt, %331, %332 : vector<8x128xi32>
    %334 = arith.andi %329, %333 : vector<8x128xi1>
    %cst_172 = arith.constant 0.000000e+00 : f32
    %335 = vector.broadcast %cst_172 : f32 to vector<8x128xf32>
    %336 = arith.select %334, %315, %335 : vector<8x128xi1>, vector<8x128xf32>
    %c16_173 = arith.constant 16 : index
    %c0_174 = arith.constant 0 : index
    %337 = vector.load %arg13[%c16_173, %c0_174] : memref<72x128xf32, #tpu.memory_space<vmem>>, vector<8x128xf32>
    tpu.vector_store %arg13[%c16_173, %c0_174], %336 {strides = array<i32>} : memref<72x128xf32, #tpu.memory_space<vmem>>, vector<8x128xf32>,
    %c0_175 = arith.constant 0 : index
    %c8_176 = arith.constant 8 : index
    %338 = vector.load %arg12[%c0_175, %c8_176] : memref<8x146xf32, #tpu.memory_space<vmem>>, vector<8x128xf32>
    %c0_i32_177 = arith.constant 0 : i32
    %339 = vector.broadcast %c0_i32_177 : i32 to vector<8x128xi32>
    %340 = arith.addi %266, %339 : vector<8x128xi32>
    %c0_i32_178 = arith.constant 0 : i32
    %341 = vector.broadcast %c0_i32_178 : i32 to vector<8x128xi32>
    %342 = arith.cmpi sge, %340, %341 : vector<8x128xi32>
    %c0_i32_179 = arith.constant 0 : i32
    %343 = vector.broadcast %c0_i32_179 : i32 to vector<8x128xi32>
    %344 = arith.addi %266, %343 : vector<8x128xi32>
    %c8_i32_180 = arith.constant 8 : i32
    %345 = vector.broadcast %c8_i32_180 : i32 to vector<8x128xi32>
    %346 = arith.cmpi slt, %344, %345 : vector<8x128xi32>
    %347 = arith.andi %342, %346 : vector<8x128xi1>
    %c-1_i32_181 = arith.constant -1 : i32
    %348 = vector.broadcast %c-1_i32_181 : i32 to vector<8x128xi32>
    %349 = arith.addi %268, %348 : vector<8x128xi32>
    %c0_i32_182 = arith.constant 0 : i32
    %350 = vector.broadcast %c0_i32_182 : i32 to vector<8x128xi32>
    %351 = arith.cmpi sge, %349, %350 : vector<8x128xi32>
    %352 = arith.andi %347, %351 : vector<8x128xi1>
    %c-1_i32_183 = arith.constant -1 : i32
    %353 = vector.broadcast %c-1_i32_183 : i32 to vector<8x128xi32>
    %354 = arith.addi %268, %353 : vector<8x128xi32>
    %c8_i32_184 = arith.constant 8 : i32
    %355 = vector.broadcast %c8_i32_184 : i32 to vector<8x128xi32>
    %356 = arith.cmpi slt, %354, %355 : vector<8x128xi32>
    %357 = arith.andi %352, %356 : vector<8x128xi1>
    %cst_185 = arith.constant 0.000000e+00 : f32
    %358 = vector.broadcast %cst_185 : f32 to vector<8x128xf32>
    %359 = arith.select %357, %338, %358 : vector<8x128xi1>, vector<8x128xf32>
    %c24_186 = arith.constant 24 : index
    %c0_187 = arith.constant 0 : index
    %360 = vector.load %arg13[%c24_186, %c0_187] : memref<72x128xf32, #tpu.memory_space<vmem>>, vector<8x128xf32>
    tpu.vector_store %arg13[%c24_186, %c0_187], %359 {strides = array<i32>} : memref<72x128xf32, #tpu.memory_space<vmem>>, vector<8x128xf32>,
    %c0_188 = arith.constant 0 : index
    %c9_189 = arith.constant 9 : index
    %361 = vector.load %arg12[%c0_188, %c9_189] : memref<8x146xf32, #tpu.memory_space<vmem>>, vector<8x128xf32>
    %c0_i32_190 = arith.constant 0 : i32
    %362 = vector.broadcast %c0_i32_190 : i32 to vector<8x128xi32>
    %363 = arith.addi %266, %362 : vector<8x128xi32>
    %c0_i32_191 = arith.constant 0 : i32
    %364 = vector.broadcast %c0_i32_191 : i32 to vector<8x128xi32>
    %365 = arith.cmpi sge, %363, %364 : vector<8x128xi32>
    %c0_i32_192 = arith.constant 0 : i32
    %366 = vector.broadcast %c0_i32_192 : i32 to vector<8x128xi32>
    %367 = arith.addi %266, %366 : vector<8x128xi32>
    %c8_i32_193 = arith.constant 8 : i32
    %368 = vector.broadcast %c8_i32_193 : i32 to vector<8x128xi32>
    %369 = arith.cmpi slt, %367, %368 : vector<8x128xi32>
    %370 = arith.andi %365, %369 : vector<8x128xi1>
    %c0_i32_194 = arith.constant 0 : i32
    %371 = vector.broadcast %c0_i32_194 : i32 to vector<8x128xi32>
    %372 = arith.addi %268, %371 : vector<8x128xi32>
    %c0_i32_195 = arith.constant 0 : i32
    %373 = vector.broadcast %c0_i32_195 : i32 to vector<8x128xi32>
    %374 = arith.cmpi sge, %372, %373 : vector<8x128xi32>
    %375 = arith.andi %370, %374 : vector<8x128xi1>
    %c0_i32_196 = arith.constant 0 : i32
    %376 = vector.broadcast %c0_i32_196 : i32 to vector<8x128xi32>
    %377 = arith.addi %268, %376 : vector<8x128xi32>
    %c8_i32_197 = arith.constant 8 : i32
    %378 = vector.broadcast %c8_i32_197 : i32 to vector<8x128xi32>
    %379 = arith.cmpi slt, %377, %378 : vector<8x128xi32>
    %380 = arith.andi %375, %379 : vector<8x128xi1>
    %cst_198 = arith.constant 0.000000e+00 : f32
    %381 = vector.broadcast %cst_198 : f32 to vector<8x128xf32>
    %382 = arith.select %380, %361, %381 : vector<8x128xi1>, vector<8x128xf32>
    %c32_199 = arith.constant 32 : index
    %c0_200 = arith.constant 0 : index
    %383 = vector.load %arg13[%c32_199, %c0_200] : memref<72x128xf32, #tpu.memory_space<vmem>>, vector<8x128xf32>
    tpu.vector_store %arg13[%c32_199, %c0_200], %382 {strides = array<i32>} : memref<72x128xf32, #tpu.memory_space<vmem>>, vector<8x128xf32>,
    %c0_201 = arith.constant 0 : index
    %c10 = arith.constant 10 : index
    %384 = vector.load %arg12[%c0_201, %c10] : memref<8x146xf32, #tpu.memory_space<vmem>>, vector<8x128xf32>
    %c0_i32_202 = arith.constant 0 : i32
    %385 = vector.broadcast %c0_i32_202 : i32 to vector<8x128xi32>
    %386 = arith.addi %266, %385 : vector<8x128xi32>
    %c0_i32_203 = arith.constant 0 : i32
    %387 = vector.broadcast %c0_i32_203 : i32 to vector<8x128xi32>
    %388 = arith.cmpi sge, %386, %387 : vector<8x128xi32>
    %c0_i32_204 = arith.constant 0 : i32
    %389 = vector.broadcast %c0_i32_204 : i32 to vector<8x128xi32>
    %390 = arith.addi %266, %389 : vector<8x128xi32>
    %c8_i32_205 = arith.constant 8 : i32
    %391 = vector.broadcast %c8_i32_205 : i32 to vector<8x128xi32>
    %392 = arith.cmpi slt, %390, %391 : vector<8x128xi32>
    %393 = arith.andi %388, %392 : vector<8x128xi1>
    %c1_i32_206 = arith.constant 1 : i32
    %394 = vector.broadcast %c1_i32_206 : i32 to vector<8x128xi32>
    %395 = arith.addi %268, %394 : vector<8x128xi32>
    %c0_i32_207 = arith.constant 0 : i32
    %396 = vector.broadcast %c0_i32_207 : i32 to vector<8x128xi32>
    %397 = arith.cmpi sge, %395, %396 : vector<8x128xi32>
    %398 = arith.andi %393, %397 : vector<8x128xi1>
    %c1_i32_208 = arith.constant 1 : i32
    %399 = vector.broadcast %c1_i32_208 : i32 to vector<8x128xi32>
    %400 = arith.addi %268, %399 : vector<8x128xi32>
    %c8_i32_209 = arith.constant 8 : i32
    %401 = vector.broadcast %c8_i32_209 : i32 to vector<8x128xi32>
    %402 = arith.cmpi slt, %400, %401 : vector<8x128xi32>
    %403 = arith.andi %398, %402 : vector<8x128xi1>
    %cst_210 = arith.constant 0.000000e+00 : f32
    %404 = vector.broadcast %cst_210 : f32 to vector<8x128xf32>
    %405 = arith.select %403, %384, %404 : vector<8x128xi1>, vector<8x128xf32>
    %c40 = arith.constant 40 : index
    %c0_211 = arith.constant 0 : index
    %406 = vector.load %arg13[%c40, %c0_211] : memref<72x128xf32, #tpu.memory_space<vmem>>, vector<8x128xf32>
    tpu.vector_store %arg13[%c40, %c0_211], %405 {strides = array<i32>} : memref<72x128xf32, #tpu.memory_space<vmem>>, vector<8x128xf32>,
    %c0_212 = arith.constant 0 : index
    %c16_213 = arith.constant 16 : index
    %407 = vector.load %arg12[%c0_212, %c16_213] : memref<8x146xf32, #tpu.memory_space<vmem>>, vector<8x128xf32>
    %c1_i32_214 = arith.constant 1 : i32
    %408 = vector.broadcast %c1_i32_214 : i32 to vector<8x128xi32>
    %409 = arith.addi %266, %408 : vector<8x128xi32>
    %c0_i32_215 = arith.constant 0 : i32
    %410 = vector.broadcast %c0_i32_215 : i32 to vector<8x128xi32>
    %411 = arith.cmpi sge, %409, %410 : vector<8x128xi32>
    %c1_i32_216 = arith.constant 1 : i32
    %412 = vector.broadcast %c1_i32_216 : i32 to vector<8x128xi32>
    %413 = arith.addi %266, %412 : vector<8x128xi32>
    %c8_i32_217 = arith.constant 8 : i32
    %414 = vector.broadcast %c8_i32_217 : i32 to vector<8x128xi32>
    %415 = arith.cmpi slt, %413, %414 : vector<8x128xi32>
    %416 = arith.andi %411, %415 : vector<8x128xi1>
    %c-1_i32_218 = arith.constant -1 : i32
    %417 = vector.broadcast %c-1_i32_218 : i32 to vector<8x128xi32>
    %418 = arith.addi %268, %417 : vector<8x128xi32>
    %c0_i32_219 = arith.constant 0 : i32
    %419 = vector.broadcast %c0_i32_219 : i32 to vector<8x128xi32>
    %420 = arith.cmpi sge, %418, %419 : vector<8x128xi32>
    %421 = arith.andi %416, %420 : vector<8x128xi1>
    %c-1_i32_220 = arith.constant -1 : i32
    %422 = vector.broadcast %c-1_i32_220 : i32 to vector<8x128xi32>
    %423 = arith.addi %268, %422 : vector<8x128xi32>
    %c8_i32_221 = arith.constant 8 : i32
    %424 = vector.broadcast %c8_i32_221 : i32 to vector<8x128xi32>
    %425 = arith.cmpi slt, %423, %424 : vector<8x128xi32>
    %426 = arith.andi %421, %425 : vector<8x128xi1>
    %cst_222 = arith.constant 0.000000e+00 : f32
    %427 = vector.broadcast %cst_222 : f32 to vector<8x128xf32>
    %428 = arith.select %426, %407, %427 : vector<8x128xi1>, vector<8x128xf32>
    %c48 = arith.constant 48 : index
    %c0_223 = arith.constant 0 : index
    %429 = vector.load %arg13[%c48, %c0_223] : memref<72x128xf32, #tpu.memory_space<vmem>>, vector<8x128xf32>
    tpu.vector_store %arg13[%c48, %c0_223], %428 {strides = array<i32>} : memref<72x128xf32, #tpu.memory_space<vmem>>, vector<8x128xf32>,
    %c0_224 = arith.constant 0 : index
    %c17_225 = arith.constant 17 : index
    %430 = vector.load %arg12[%c0_224, %c17_225] : memref<8x146xf32, #tpu.memory_space<vmem>>, vector<8x128xf32>
    %c1_i32_226 = arith.constant 1 : i32
    %431 = vector.broadcast %c1_i32_226 : i32 to vector<8x128xi32>
    %432 = arith.addi %266, %431 : vector<8x128xi32>
    %c0_i32_227 = arith.constant 0 : i32
    %433 = vector.broadcast %c0_i32_227 : i32 to vector<8x128xi32>
    %434 = arith.cmpi sge, %432, %433 : vector<8x128xi32>
    %c1_i32_228 = arith.constant 1 : i32
    %435 = vector.broadcast %c1_i32_228 : i32 to vector<8x128xi32>
    %436 = arith.addi %266, %435 : vector<8x128xi32>
    %c8_i32_229 = arith.constant 8 : i32
    %437 = vector.broadcast %c8_i32_229 : i32 to vector<8x128xi32>
    %438 = arith.cmpi slt, %436, %437 : vector<8x128xi32>
    %439 = arith.andi %434, %438 : vector<8x128xi1>
    %c0_i32_230 = arith.constant 0 : i32
    %440 = vector.broadcast %c0_i32_230 : i32 to vector<8x128xi32>
    %441 = arith.addi %268, %440 : vector<8x128xi32>
    %c0_i32_231 = arith.constant 0 : i32
    %442 = vector.broadcast %c0_i32_231 : i32 to vector<8x128xi32>
    %443 = arith.cmpi sge, %441, %442 : vector<8x128xi32>
    %444 = arith.andi %439, %443 : vector<8x128xi1>
    %c0_i32_232 = arith.constant 0 : i32
    %445 = vector.broadcast %c0_i32_232 : i32 to vector<8x128xi32>
    %446 = arith.addi %268, %445 : vector<8x128xi32>
    %c8_i32_233 = arith.constant 8 : i32
    %447 = vector.broadcast %c8_i32_233 : i32 to vector<8x128xi32>
    %448 = arith.cmpi slt, %446, %447 : vector<8x128xi32>
    %449 = arith.andi %444, %448 : vector<8x128xi1>
    %cst_234 = arith.constant 0.000000e+00 : f32
    %450 = vector.broadcast %cst_234 : f32 to vector<8x128xf32>
    %451 = arith.select %449, %430, %450 : vector<8x128xi1>, vector<8x128xf32>
    %c56 = arith.constant 56 : index
    %c0_235 = arith.constant 0 : index
    %452 = vector.load %arg13[%c56, %c0_235] : memref<72x128xf32, #tpu.memory_space<vmem>>, vector<8x128xf32>
    tpu.vector_store %arg13[%c56, %c0_235], %451 {strides = array<i32>} : memref<72x128xf32, #tpu.memory_space<vmem>>, vector<8x128xf32>,
    %c0_236 = arith.constant 0 : index
    %c18_237 = arith.constant 18 : index
    %453 = vector.load %arg12[%c0_236, %c18_237] : memref<8x146xf32, #tpu.memory_space<vmem>>, vector<8x128xf32>
    %c1_i32_238 = arith.constant 1 : i32
    %454 = vector.broadcast %c1_i32_238 : i32 to vector<8x128xi32>
    %455 = arith.addi %266, %454 : vector<8x128xi32>
    %c0_i32_239 = arith.constant 0 : i32
    %456 = vector.broadcast %c0_i32_239 : i32 to vector<8x128xi32>
    %457 = arith.cmpi sge, %455, %456 : vector<8x128xi32>
    %c1_i32_240 = arith.constant 1 : i32
    %458 = vector.broadcast %c1_i32_240 : i32 to vector<8x128xi32>
    %459 = arith.addi %266, %458 : vector<8x128xi32>
    %c8_i32_241 = arith.constant 8 : i32
    %460 = vector.broadcast %c8_i32_241 : i32 to vector<8x128xi32>
    %461 = arith.cmpi slt, %459, %460 : vector<8x128xi32>
    %462 = arith.andi %457, %461 : vector<8x128xi1>
    %c1_i32_242 = arith.constant 1 : i32
    %463 = vector.broadcast %c1_i32_242 : i32 to vector<8x128xi32>
    %464 = arith.addi %268, %463 : vector<8x128xi32>
    %c0_i32_243 = arith.constant 0 : i32
    %465 = vector.broadcast %c0_i32_243 : i32 to vector<8x128xi32>
    %466 = arith.cmpi sge, %464, %465 : vector<8x128xi32>
    %467 = arith.andi %462, %466 : vector<8x128xi1>
    %c1_i32_244 = arith.constant 1 : i32
    %468 = vector.broadcast %c1_i32_244 : i32 to vector<8x128xi32>
    %469 = arith.addi %268, %468 : vector<8x128xi32>
    %c8_i32_245 = arith.constant 8 : i32
    %470 = vector.broadcast %c8_i32_245 : i32 to vector<8x128xi32>
    %471 = arith.cmpi slt, %469, %470 : vector<8x128xi32>
    %472 = arith.andi %467, %471 : vector<8x128xi1>
    %cst_246 = arith.constant 0.000000e+00 : f32
    %473 = vector.broadcast %cst_246 : f32 to vector<8x128xf32>
    %474 = arith.select %472, %453, %473 : vector<8x128xi1>, vector<8x128xf32>
    %c64 = arith.constant 64 : index
    %c0_247 = arith.constant 0 : index
    %475 = vector.load %arg13[%c64, %c0_247] : memref<72x128xf32, #tpu.memory_space<vmem>>, vector<8x128xf32>
    tpu.vector_store %arg13[%c64, %c0_247], %474 {strides = array<i32>} : memref<72x128xf32, #tpu.memory_space<vmem>>, vector<8x128xf32>,
    %c0_248 = arith.constant 0 : index
    %c0_249 = arith.constant 0 : index
    %476 = vector.load %arg4[%c0_248, %c0_249] : memref<16x72xbf16, #tpu.memory_space<vmem>>, vector<16x72xbf16>
    %c0_250 = arith.constant 0 : index
    %c0_251 = arith.constant 0 : index
    %477 = vector.load %arg13[%c0_250, %c0_251] : memref<72x128xf32, #tpu.memory_space<vmem>>, vector<72x128xf32>
    %478 = arith.truncf %477 : vector<72x128xf32> to vector<72x128xbf16>
    %cst_252 = arith.constant dense<0.000000e+00> : vector<16x128xf32>
    %479 = tpu.matmul %476, %478, %cst_252 {dimension_numbers = #tpu.dot_dimension_numbers<[1], [0], [0], [1], [0, 0, 1, 1], [], []>} : vector<16x72xbf16>, vector<72x128xbf16>, vector<16x128xf32> -> vector<16x128xf32>
    %c0_253 = arith.constant 0 : index
    %c0_254 = arith.constant 0 : index
    %480 = vector.load %arg5[%c0_253, %c0_254] : memref<16x1xf32, #tpu.memory_space<vmem>>, vector<16x1xf32>
    %481 = vector.broadcast %480 : vector<16x1xf32> to vector<16x128xf32>
    %482 = arith.addf %479, %481 : vector<16x128xf32>
    %cst_255 = arith.constant 0.000000e+00 : f32
    %483 = vector.broadcast %cst_255 : f32 to vector<16x128xf32>
    %484 = arith.maximumf %482, %483 : vector<16x128xf32>
    %cst_256 = arith.constant 0.000000e+00 : f32
    %485 = vector.broadcast %cst_256 : f32 to vector<16x137xf32>
    %c0_257 = arith.constant 0 : index
    %c0_258 = arith.constant 0 : index
    %486 = vector.load %arg14[%c0_257, %c0_258] : memref<16x137xf32, #tpu.memory_space<vmem>>, vector<16x137xf32>
    tpu.vector_store %arg14[%c0_257, %c0_258], %485 {strides = array<i32>} : memref<16x137xf32, #tpu.memory_space<vmem>>, vector<16x137xf32>,
    %c0_259 = arith.constant 0 : index
    %c0_260 = arith.constant 0 : index
    %487 = vector.load %arg14[%c0_259, %c0_260] : memref<16x137xf32, #tpu.memory_space<vmem>>, vector<16x128xf32>
    tpu.vector_store %arg14[%c0_259, %c0_260], %484 {strides = array<i32>} : memref<16x137xf32, #tpu.memory_space<vmem>>, vector<16x128xf32>,
    %c0_261 = arith.constant 0 : index
    %c0_262 = arith.constant 0 : index
    %488 = vector.load %arg14[%c0_261, %c0_262] : memref<16x137xf32, #tpu.memory_space<vmem>>, vector<16x128xf32>
    %c0_263 = arith.constant 0 : index
    %c1_264 = arith.constant 1 : index
    %489 = vector.load %arg14[%c0_263, %c1_264] : memref<16x137xf32, #tpu.memory_space<vmem>>, vector<16x128xf32>
    %490 = arith.maximumf %488, %489 : vector<16x128xf32>
    %c0_265 = arith.constant 0 : index
    %c8_266 = arith.constant 8 : index
    %491 = vector.load %arg14[%c0_265, %c8_266] : memref<16x137xf32, #tpu.memory_space<vmem>>, vector<16x128xf32>
    %c0_267 = arith.constant 0 : index
    %c9_268 = arith.constant 9 : index
    %492 = vector.load %arg14[%c0_267, %c9_268] : memref<16x137xf32, #tpu.memory_space<vmem>>, vector<16x128xf32>
    %493 = arith.maximumf %491, %492 : vector<16x128xf32>
    %494 = arith.maximumf %490, %493 : vector<16x128xf32>
    %495 = tpu.iota {dimensions = array<i32: 0>} : vector<128x32xi32>
    %496 = tpu.iota {dimensions = array<i32: 1>} : vector<128x32xi32>
    %c4_i32_269 = arith.constant 4 : i32
    %497 = vector.broadcast %c4_i32_269 : i32 to vector<128x32xi32>
    %498 = arith.shrsi %496, %497 : vector<128x32xi32>
    %c6_i32_270 = arith.constant 6 : i32
    %499 = vector.broadcast %c6_i32_270 : i32 to vector<128x32xi32>
    %500 = arith.shli %498, %499 : vector<128x32xi32>
    %c2_i32 = arith.constant 2 : i32
    %501 = vector.broadcast %c2_i32 : i32 to vector<128x32xi32>
    %502 = arith.shrsi %496, %501 : vector<128x32xi32>
    %c3_i32_271 = arith.constant 3 : i32
    %503 = vector.broadcast %c3_i32_271 : i32 to vector<128x32xi32>
    %504 = arith.andi %502, %503 : vector<128x32xi32>
    %c4_i32_272 = arith.constant 4 : i32
    %505 = vector.broadcast %c4_i32_272 : i32 to vector<128x32xi32>
    %506 = arith.shli %504, %505 : vector<128x32xi32>
    %507 = arith.addi %500, %506 : vector<128x32xi32>
    %c3_i32_273 = arith.constant 3 : i32
    %508 = vector.broadcast %c3_i32_273 : i32 to vector<128x32xi32>
    %509 = arith.andi %496, %508 : vector<128x32xi32>
    %c1_i32_274 = arith.constant 1 : i32
    %510 = vector.broadcast %c1_i32_274 : i32 to vector<128x32xi32>
    %511 = arith.shli %509, %510 : vector<128x32xi32>
    %512 = arith.addi %507, %511 : vector<128x32xi32>
    %513 = arith.cmpi eq, %495, %512 : vector<128x32xi32>
    %514 = arith.extui %513 : vector<128x32xi1> to vector<128x32xi32>
    %515 = arith.sitofp %514 : vector<128x32xi32> to vector<128x32xf32>
    %cst_275 = arith.constant dense<0.000000e+00> : vector<16x32xf32>
    %516 = tpu.matmul %494, %515, %cst_275 {dimension_numbers = #tpu.dot_dimension_numbers<[1], [0], [0], [1], [0, 0, 1, 1], [], []>} : vector<16x128xf32>, vector<128x32xf32>, vector<16x32xf32> -> vector<16x32xf32>
    %c0_276 = arith.constant 0 : index
    %c0_277 = arith.constant 0 : index
    %c0_278 = arith.constant 0 : index
    %517 = vector.load %arg6[%c0_276, %c0_277, %c0_278] : memref<10x16x32xf32, #tpu.memory_space<vmem>>, vector<10x16x32xf32>
    %518 = vector.shape_cast %516 : vector<16x32xf32> to vector<1x16x32xf32>
    %519 = vector.broadcast %518 : vector<1x16x32xf32> to vector<10x16x32xf32>
    %520 = arith.mulf %517, %519 : vector<10x16x32xf32>
    %cst_279 = arith.constant dense<0.000000e+00> : vector<10x32xf32>
    %521 = vector.multi_reduction <add>, %520, %cst_279 [1] : vector<10x16x32xf32> to vector<10x32xf32>
    %522 = tpu.iota {dimensions = array<i32: 0>} : vector<32x2xi32>
    %523 = tpu.iota {dimensions = array<i32: 1>} : vector<32x2xi32>
    %c4_i32_280 = arith.constant 4 : i32
    %524 = vector.broadcast %c4_i32_280 : i32 to vector<32x2xi32>
    %525 = arith.shrsi %522, %524 : vector<32x2xi32>
    %526 = arith.cmpi eq, %525, %523 : vector<32x2xi32>
    %527 = arith.extui %526 : vector<32x2xi1> to vector<32x2xi32>
    %528 = arith.sitofp %527 : vector<32x2xi32> to vector<32x2xf32>
    %cst_281 = arith.constant dense<0.000000e+00> : vector<10x2xf32>
    %529 = tpu.matmul %521, %528, %cst_281 {dimension_numbers = #tpu.dot_dimension_numbers<[1], [0], [0], [1], [0, 0, 1, 1], [], []>} : vector<10x32xf32>, vector<32x2xf32>, vector<10x2xf32> -> vector<10x2xf32>
    %c0_282 = arith.constant 0 : index
    %c0_283 = arith.constant 0 : index
    %530 = vector.load %arg7[%c0_282, %c0_283] : memref<10x1xf32, #tpu.memory_space<vmem>>, vector<10x1xf32>
    %531 = vector.broadcast %530 : vector<10x1xf32> to vector<10x2xf32>
    %532 = arith.addf %529, %531 : vector<10x2xf32>
    %c0_284 = arith.constant 0 : index
    %c0_285 = arith.constant 0 : index
    %533 = vector.load %arg8[%c0_284, %c0_285] : memref<10x2xf32, #tpu.memory_space<vmem>>, vector<10x2xf32>
    tpu.vector_store %arg8[%c0_284, %c0_285], %532 {strides = array<i32>} : memref<10x2xf32, #tpu.memory_space<vmem>>, vector<10x2xf32>,
    return
  }
  func.func @transform_0(%arg0: i32) -> (i32, i32) {
    %c0_i32 = arith.constant 0 : i32
    %c0_i32_0 = arith.constant 0 : i32
    %c0_i32_1 = arith.constant 0 : i32
    return %c0_i32, %c0_i32_0 : i32, i32
  }
  func.func @transform_1(%arg0: i32) -> (i32, i32) {
    %c0_i32 = arith.constant 0 : i32
    %c0_i32_0 = arith.constant 0 : i32
    %c0_i32_1 = arith.constant 0 : i32
    return %c0_i32, %c0_i32_0 : i32, i32
  }
  func.func @transform_2(%arg0: i32) -> (i32, i32) {
    %c0_i32 = arith.constant 0 : i32
    %c0_i32_0 = arith.constant 0 : i32
    %c0_i32_1 = arith.constant 0 : i32
    return %c0_i32, %c0_i32_0 : i32, i32
  }
  func.func @transform_3(%arg0: i32) -> (i32, i32) {
    %c0_i32 = arith.constant 0 : i32
    %c0_i32_0 = arith.constant 0 : i32
    %c0_i32_1 = arith.constant 0 : i32
    return %c0_i32, %c0_i32_0 : i32, i32
  }
  func.func @transform_4(%arg0: i32) -> (i32, i32) {
    %c0_i32 = arith.constant 0 : i32
    %c0_i32_0 = arith.constant 0 : i32
    %c0_i32_1 = arith.constant 0 : i32
    return %c0_i32, %c0_i32_0 : i32, i32
  }
  func.func @transform_5(%arg0: i32) -> (i32, i32, i32) {
    %c0_i32 = arith.constant 0 : i32
    %c0_i32_0 = arith.constant 0 : i32
    %c0_i32_1 = arith.constant 0 : i32
    %c0_i32_2 = arith.constant 0 : i32
    return %c0_i32, %c0_i32_0, %c0_i32_1 : i32, i32, i32
  }
  func.func @transform_6(%arg0: i32) -> (i32, i32) {
    %c0_i32 = arith.constant 0 : i32
    %c0_i32_0 = arith.constant 0 : i32
    %c0_i32_1 = arith.constant 0 : i32
    return %c0_i32, %c0_i32_0 : i32, i32
  }
  func.func @transform_7(%arg0: i32) -> (i32, i32) {
    %c0_i32 = arith.constant 0 : i32
    %c0_i32_0 = arith.constant 0 : i32
    %c0_i32_1 = arith.constant 0 : i32
    return %c0_i32, %c0_i32_0 : i32, i32
  }
}

</mosaic_0001>

<bundles_post_ra>
// kernel: tile.7
= control target key start
LH: loop header
LB: loop body
LE: loop exit
PB: predicated region body
PF: predicated region fallthrough
CT: control target
= control target key end

     0   :  { %vm802_vm0 = vcmask 1047556   ;;  %s1552_s10 = smov 16   ;;  %vm804_vm1 = vcmask 130048   ;;  %vm985_vm2 = vcmask 261248   ;;  %s2263_s0 = inlined_call_operand.vmem [shape: f32[10,16,2,16], index: 0, kind: input, shape index: {}]   ;;  %s2264_s1 = inlined_call_operand.vmem [shape: f32[10,16,32], index: 1, kind: output, shape index: {}]  }
   0x1   :  { %v1506_v0 = vld [vmem:[%s2263_s0 + $0xe] sm:$0x3]  ;;  %v1507_v1 = vld [vmem:[%s2263_s0 + $0xc] sm:$0x3]  ;;  %v1508_v2 = vld [vmem:[%s2263_s0 + $0xa] sm:$0x3] }
   0x2   :  { %768 = vst [vmem:[#allocation0 + $0x38] sm:$0x3] %v1506_v0  ;;  %773 = vst [vmem:[#allocation0 + $0x30] sm:$0x3] %v1507_v1  ;;  %v1509_v3 = vld [vmem:[%s2263_s0 + $0x8] sm:$0x3] }
   0x3   :  { %778 = vst [vmem:[#allocation0 + $0x28] sm:$0x3] %v1508_v2  ;;  %v1510_v4 = vld [vmem:[%s2263_s0 + $0x6] sm:$0x3]  ;;  %v1511_v5 = vld [vmem:[%s2263_s0 + $0x4] sm:$0x3] }
   0x4   :  { %783 = vst [vmem:[#allocation0 + $0x20] sm:$0x3] %v1509_v3  ;;  %788 = vst [vmem:[#allocation0 + $0x18] sm:$0x3] %v1510_v4  ;;  %v1512_v6 = vld [vmem:[%s2263_s0 + $0x2] sm:$0x3] }
   0x5   :  { %793 = vst [vmem:[#allocation0 + $0x10] sm:$0x3] %v1511_v5  ;;  %v798_v7 = vld [vmem:[%s2263_s0] sm:$0x3]  ;;  %797 = vst [vmem:[#allocation0 + $0x8] sm:$0x3] %v1512_v6 }
   0x6   :  { %799 = vst [vmem:[#allocation0] sm:$0x3] %v798_v7  ;;  %v1442_v8 = vld [vmem:[%s2263_s0 + $0x8e] sm:$0x3]  ;;  %v1443_v9 = vld [vmem:[%s2263_s0 + $0x8c] sm:$0x3] }
   0x7   :  { %v1444_v10 = vld [vmem:[%s2263_s0 + $0x8a] sm:$0x3]  ;;  %448 = vst [vmem:[#allocation0 + $0x238] sm:$0x3] %v1442_v8  ;;  %453 = vst [vmem:[#allocation0 + $0x230] sm:$0x3] %v1443_v9 }
   0x8   :  { %458 = vst [vmem:[#allocation0 + $0x228] sm:$0x3] %v1444_v10  ;;  %v1445_v11 = vld [vmem:[%s2263_s0 + $0x88] sm:$0x3]  ;;  %v1446_v12 = vld [vmem:[%s2263_s0 + $0x86] sm:$0x3] }
   0x9   :  { %v1447_v13 = vld [vmem:[%s2263_s0 + $0x84] sm:$0x3]  ;;  %463 = vst [vmem:[#allocation0 + $0x220] sm:$0x3] %v1445_v11  ;;  %468 = vst [vmem:[#allocation0 + $0x218] sm:$0x3] %v1446_v12 }
   0xa   :  { %473 = vst [vmem:[#allocation0 + $0x210] sm:$0x3] %v1447_v13  ;;  %v1448_v14 = vld [vmem:[%s2263_s0 + $0x82] sm:$0x3]  ;;  %v1449_v15 = vld [vmem:[%s2263_s0 + $0x80] sm:$0x3] }
   0xb   :  { %v1474_v16 = vld [vmem:[%s2263_s0 + $0x4e] sm:$0x3]  ;;  %478 = vst [vmem:[#allocation0 + $0x208] sm:$0x3] %v1448_v14  ;;  %483 = vst [vmem:[#allocation0 + $0x200] sm:$0x3] %v1449_v15 }
   0xc   :  { %608 = vst [vmem:[#allocation0 + $0x138] sm:$0x3] %v1474_v16  ;;  %v1475_v17 = vld [vmem:[%s2263_s0 + $0x4c] sm:$0x3]  ;;  %v1476_v18 = vld [vmem:[%s2263_s0 + $0x4a] sm:$0x3] }
   0xd   :  { %v1477_v19 = vld [vmem:[%s2263_s0 + $0x48] sm:$0x3]  ;;  %613 = vst [vmem:[#allocation0 + $0x130] sm:$0x3] %v1475_v17  ;;  %618 = vst [vmem:[#allocation0 + $0x128] sm:$0x3] %v1476_v18 }
   0xe   :  { %623 = vst [vmem:[#allocation0 + $0x120] sm:$0x3] %v1477_v19  ;;  %v1478_v20 = vld [vmem:[%s2263_s0 + $0x46] sm:$0x3]  ;;  %v1479_v21 = vld [vmem:[%s2263_s0 + $0x44] sm:$0x3] }
   0xf   :  { %v1480_v22 = vld [vmem:[%s2263_s0 + $0x42] sm:$0x3]  ;;  %628 = vst [vmem:[#allocation0 + $0x118] sm:$0x3] %v1478_v20  ;;  %633 = vst [vmem:[#allocation0 + $0x110] sm:$0x3] %v1479_v21 }
  0x10   :  { %638 = vst [vmem:[#allocation0 + $0x108] sm:$0x3] %v1480_v22  ;;  %v1481_v23 = vld [vmem:[%s2263_s0 + $0x40] sm:$0x3]  ;;  %v1410_v24 = vld [vmem:[%s2263_s0 + $0xce] sm:$0x3] }
  0x11   :  { %v1411_v25 = vld [vmem:[%s2263_s0 + $0xcc] sm:$0x3]  ;;  %v980_v26 = vld [vmem:[#allocation0 + $0x1] ss:$8 sm:$0xf0]  }
  0x12   :  { %643 = vst [vmem:[#allocation0 + $0x100] sm:$0x3] %v1481_v23  ;;  %288 = vst [vmem:[#allocation0 + $0x338] sm:$0x3] %v1410_v24  ;;  %v1412_v27 = vld [vmem:[%s2263_s0 + $0xca] sm:$0x3] }
  0x13   :  { %293 = vst [vmem:[#allocation0 + $0x330] sm:$0x3] %v1411_v25  ;;  %v978_v28 = vld [vmem:[#allocation0 + $0x1] ss:$8 sm:$0xf]  }
  0x14   :  { %298 = vst [vmem:[#allocation0 + $0x328] sm:$0x3] %v1412_v27  ;;  %v1413_v29 = vld [vmem:[%s2263_s0 + $0xc8] sm:$0x3]  ;;  %v982_v30 = vsel %vm802_vm0, %v980_v26, %v978_v28  ;;  %v1414_v31 = vld [vmem:[%s2263_s0 + $0xc6] sm:$0x3] }
  0x15   :  { %303 = vst [vmem:[#allocation0 + $0x320] sm:$0x3] %v1413_v29  ;;  %v1415_v32 = vld [vmem:[%s2263_s0 + $0xc4] sm:$0x3]  ;;  %v1416_v33 = vld [vmem:[%s2263_s0 + $0xc2] sm:$0x3]  ;;  %983 = vrot.lane.b32.xlu0 %v982_v30, %s1552_s10 }
  0x16   :  { %v1001_v34 = vld [vmem:[#allocation0 + $0x201] ss:$8 sm:$0xf0]   ;;  %308 = vst [vmem:[#allocation0 + $0x318] sm:$0x3] %v1414_v31 }
  0x17   :  { %313 = vst [vmem:[#allocation0 + $0x310] sm:$0x3] %v1415_v32  ;;  %318 = vst [vmem:[#allocation0 + $0x308] sm:$0x3] %v1416_v33  ;;  %v1417_v35 = vld [vmem:[%s2263_s0 + $0xc0] sm:$0x3] }
  0x18   :  { %v999_v36 = vld [vmem:[#allocation0 + $0x201] ss:$8 sm:$0xf]   ;;  %323 = vst [vmem:[#allocation0 + $0x300] sm:$0x3] %v1417_v35 }
  0x19   :  { %v1498_v37 = vld [vmem:[%s2263_s0 + $0x1e] sm:$0x3]  ;;  %v1003_v38 = vsel %vm802_vm0, %v1001_v34, %v999_v36  ;;  %v990_v39 = vld [vmem:[#allocation0 + $0x101] ss:$8 sm:$0xf0]  }
  0x1a   :  { %728 = vst [vmem:[#allocation0 + $0x78] sm:$0x3] %v1498_v37  ;;  %v1499_v40 = vld [vmem:[%s2263_s0 + $0x1c] sm:$0x3]  ;;  %1004 = vrot.lane.b32.xlu1 %v1003_v38, %s1552_s10  ;;  %v1500_v41 = vld [vmem:[%s2263_s0 + $0x1a] sm:$0x3] }
  0x1b   :  { %733 = vst [vmem:[#allocation0 + $0x70] sm:$0x3] %v1499_v40  ;;  %v1501_v42 = vld [vmem:[%s2263_s0 + $0x18] sm:$0x3]  ;;  %v1502_v43 = vld [vmem:[%s2263_s0 + $0x16] sm:$0x3] }
  0x1c   :  { %v988_v44 = vld [vmem:[#allocation0 + $0x101] ss:$8 sm:$0xf]   ;;  %738 = vst [vmem:[#allocation0 + $0x68] sm:$0x3] %v1500_v41 }
  0x1d   :  { %743 = vst [vmem:[#allocation0 + $0x60] sm:$0x3] %v1501_v42  ;;  %748 = vst [vmem:[#allocation0 + $0x58] sm:$0x3] %v1502_v43  ;;  %v1503_v45 = vld [vmem:[%s2263_s0 + $0x14] sm:$0x3]  ;;  %v992_v46 = vsel %vm802_vm0, %v990_v39, %v988_v44 }
  0x1e   :  { %753 = vst [vmem:[#allocation0 + $0x50] sm:$0x3] %v1503_v45  ;;  %v1504_v47 = vld [vmem:[%s2263_s0 + $0x12] sm:$0x3]  ;;  %v1505_v48 = vld [vmem:[%s2263_s0 + $0x10] sm:$0x3]  ;;  %993 = vrot.lane.b32.xlu0 %v992_v46, %s1552_s10 }
  0x1f   :  { %v1378_v49 = vld [vmem:[%s2263_s0 + $0x10e] sm:$0x3]  ;;  %v1012_v50 = vld [vmem:[#allocation0 + $0x301] ss:$8 sm:$0xf0]  }
  0x20   :  { %758 = vst [vmem:[#allocation0 + $0x48] sm:$0x3] %v1504_v47  ;;  %763 = vst [vmem:[#allocation0 + $0x40] sm:$0x3] %v1505_v48  ;;  %v1379_v51 = vld [vmem:[%s2263_s0 + $0x10c] sm:$0x3] }
  0x21   :  { %128 = vst [vmem:[#allocation0 + $0x438] sm:$0x3] %v1378_v49  ;;  %133 = vst [vmem:[#allocation0 + $0x430] sm:$0x3] %v1379_v51  ;;  %v1380_v52 = vld [vmem:[%s2263_s0 + $0x10a] sm:$0x3] }
  0x22   :  { %v1381_v53 = vld [vmem:[%s2263_s0 + $0x108] sm:$0x3]  ;;  %v1382_v54 = vld [vmem:[%s2263_s0 + $0x106] sm:$0x3]  ;;  %138 = vst [vmem:[#allocation0 + $0x428] sm:$0x3] %v1380_v52 }
  0x23   :  { %v1010_v55 = vld [vmem:[#allocation0 + $0x301] ss:$8 sm:$0xf]   ;;  %143 = vst [vmem:[#allocation0 + $0x420] sm:$0x3] %v1381_v53 }
  0x24   :  { %148 = vst [vmem:[#allocation0 + $0x418] sm:$0x3] %v1382_v54  ;;  %v1383_v56 = vld [vmem:[%s2263_s0 + $0x104] sm:$0x3]  ;;  %v1014_v57 = vsel %vm802_vm0, %v1012_v50, %v1010_v55  ;;  %v1384_v58 = vld [vmem:[%s2263_s0 + $0x102] sm:$0x3] }
  0x25   :  { %153 = vst [vmem:[#allocation0 + $0x410] sm:$0x3] %v1383_v56  ;;  %v1385_v59 = vld [vmem:[%s2263_s0 + $0x100] sm:$0x3]  ;;  %v1434_v60 = vld [vmem:[%s2263_s0 + $0x9e] sm:$0x3]  ;;  %1015 = vrot.lane.b32.xlu1 %v1014_v57, %s1552_s10 }
  0x26   :  { %158 = vst [vmem:[#allocation0 + $0x408] sm:$0x3] %v1384_v58  ;;  %163 = vst [vmem:[#allocation0 + $0x400] sm:$0x3] %v1385_v59  ;;  %v1435_v61 = vld [vmem:[%s2263_s0 + $0x9c] sm:$0x3] }
  0x27   :  { %408 = vst [vmem:[#allocation0 + $0x278] sm:$0x3] %v1434_v60  ;;  %v1436_v62 = vld [vmem:[%s2263_s0 + $0x9a] sm:$0x3]  ;;  %v1437_v63 = vld [vmem:[%s2263_s0 + $0x98] sm:$0x3] }
  0x28   :  { %v1034_v0 = vld [vmem:[#allocation0 + $0x41] ss:$8 sm:$0xf0]   ;;  %413 = vst [vmem:[#allocation0 + $0x270] sm:$0x3] %v1435_v61 }
  0x29   :  { %418 = vst [vmem:[#allocation0 + $0x268] sm:$0x3] %v1436_v62  ;;  %423 = vst [vmem:[#allocation0 + $0x260] sm:$0x3] %v1437_v63  ;;  %v1438_v1 = vld [vmem:[%s2263_s0 + $0x96] sm:$0x3] }
  0x2a   :  { %428 = vst [vmem:[#allocation0 + $0x258] sm:$0x3] %v1438_v1  ;;  %v1439_v2 = vld [vmem:[%s2263_s0 + $0x94] sm:$0x3]  ;;  %v1440_v3 = vld [vmem:[%s2263_s0 + $0x92] sm:$0x3] }
  0x2b   :  { %v1441_v4 = vld [vmem:[%s2263_s0 + $0x90] sm:$0x3]  ;;  %433 = vst [vmem:[#allocation0 + $0x250] sm:$0x3] %v1439_v2  ;;  %438 = vst [vmem:[#allocation0 + $0x248] sm:$0x3] %v1440_v3 }
  0x2c   :  { %v1032_v5 = vld [vmem:[#allocation0 + $0x41] ss:$8 sm:$0xf]   ;;  %443 = vst [vmem:[#allocation0 + $0x240] sm:$0x3] %v1441_v4 }
  0x2d   :  { %v1466_v6 = vld [vmem:[%s2263_s0 + $0x5e] sm:$0x3]  ;;  %v1036_v7 = vsel %vm802_vm0, %v1034_v0, %v1032_v5  ;;  %v1467_v8 = vld [vmem:[%s2263_s0 + $0x5c] sm:$0x3]  ;;  %v1468_v9 = vld [vmem:[%s2263_s0 + $0x5a] sm:$0x3] }
  0x2e   :  { %568 = vst [vmem:[#allocation0 + $0x178] sm:$0x3] %v1466_v6  ;;  %v1469_v10 = vld [vmem:[%s2263_s0 + $0x58] sm:$0x3]  ;;  %1037 = vrot.lane.b32.xlu1 %v1036_v7, %s1552_s10  ;;  %573 = vst [vmem:[#allocation0 + $0x170] sm:$0x3] %v1467_v8 }
  0x2f   :  { %v1023_v11 = vld [vmem:[#allocation0 + $0x401] ss:$8 sm:$0xf0]   ;;  %578 = vst [vmem:[#allocation0 + $0x168] sm:$0x3] %v1468_v9 }
  0x30   :  { %583 = vst [vmem:[#allocation0 + $0x160] sm:$0x3] %v1469_v10  ;;  %v1470_v12 = vld [vmem:[%s2263_s0 + $0x56] sm:$0x3]  ;;  %v1471_v13 = vld [vmem:[%s2263_s0 + $0x54] sm:$0x3] }
  0x31   :  { %588 = vst [vmem:[#allocation0 + $0x158] sm:$0x3] %v1470_v12  ;;  %v1472_v14 = vld [vmem:[%s2263_s0 + $0x52] sm:$0x3]  ;;  %v1473_v15 = vld [vmem:[%s2263_s0 + $0x50] sm:$0x3] }
  0x32   :  { %v1021_v16 = vld [vmem:[#allocation0 + $0x401] ss:$8 sm:$0xf]   ;;  %593 = vst [vmem:[#allocation0 + $0x150] sm:$0x3] %v1471_v13 }
  0x33   :  { %598 = vst [vmem:[#allocation0 + $0x148] sm:$0x3] %v1472_v14  ;;  %603 = vst [vmem:[#allocation0 + $0x140] sm:$0x3] %v1473_v15  ;;  %v1402_v17 = vld [vmem:[%s2263_s0 + $0xde] sm:$0x3]  ;;  %v1025_v18 = vsel %vm802_vm0, %v1023_v11, %v1021_v16 }
  0x34   :  { %v1056_v19 = vld [vmem:[#allocation0 + $0x241] ss:$8 sm:$0xf0]   ;;  %248 = vst [vmem:[#allocation0 + $0x378] sm:$0x3] %v1402_v17  ;;  %1026 = vrot.lane.b32.xlu0 %v1025_v18, %s1552_s10 }
  0x35   :  { %v1403_v20 = vld [vmem:[%s2263_s0 + $0xdc] sm:$0x3]  ;;  %v1404_v21 = vld [vmem:[%s2263_s0 + $0xda] sm:$0x3]  ;;  %v1405_v22 = vld [vmem:[%s2263_s0 + $0xd8] sm:$0x3] }
  0x36   :  { %253 = vst [vmem:[#allocation0 + $0x370] sm:$0x3] %v1403_v20  ;;  %v1406_v23 = vld [vmem:[%s2263_s0 + $0xd6] sm:$0x3]  ;;  %258 = vst [vmem:[#allocation0 + $0x368] sm:$0x3] %v1404_v21 }
  0x37   :  { %v1054_v24 = vld [vmem:[#allocation0 + $0x241] ss:$8 sm:$0xf]   ;;  %263 = vst [vmem:[#allocation0 + $0x360] sm:$0x3] %v1405_v22 }
  0x38   :  { %268 = vst [vmem:[#allocation0 + $0x358] sm:$0x3] %v1406_v23  ;;  %v1407_v25 = vld [vmem:[%s2263_s0 + $0xd4] sm:$0x3]  ;;  %v1058_v26 = vsel %vm802_vm0, %v1056_v19, %v1054_v24  ;;  %v1408_v27 = vld [vmem:[%s2263_s0 + $0xd2] sm:$0x3] }
  0x39   :  { %273 = vst [vmem:[#allocation0 + $0x350] sm:$0x3] %v1407_v25  ;;  %v1409_v28 = vld [vmem:[%s2263_s0 + $0xd0] sm:$0x3]  ;;  %v1370_v29 = vld [vmem:[%s2263_s0 + $0x11e] sm:$0x3]  ;;  %1059 = vrot.lane.b32.xlu1 %v1058_v26, %s1552_s10 }
  0x3a   :  { %v1045_v30 = vld [vmem:[#allocation0 + $0x141] ss:$8 sm:$0xf0]   ;;  %278 = vst [vmem:[#allocation0 + $0x348] sm:$0x3] %v1408_v27 }
  0x3b   :  { %283 = vst [vmem:[#allocation0 + $0x340] sm:$0x3] %v1409_v28  ;;  %88 = vst [vmem:[#allocation0 + $0x478] sm:$0x3] %v1370_v29  ;;  %v1371_v31 = vld [vmem:[%s2263_s0 + $0x11c] sm:$0x3] }
  0x3c   :  { %93 = vst [vmem:[#allocation0 + $0x470] sm:$0x3] %v1371_v31  ;;  %v1372_v32 = vld [vmem:[%s2263_s0 + $0x11a] sm:$0x3]  ;;  %v1373_v33 = vld [vmem:[%s2263_s0 + $0x118] sm:$0x3] }
  0x3d   :  { %v1374_v34 = vld [vmem:[%s2263_s0 + $0x116] sm:$0x3]  ;;  %v1043_v35 = vld [vmem:[#allocation0 + $0x141] ss:$8 sm:$0xf]  }
  0x3e   :  { %98 = vst [vmem:[#allocation0 + $0x468] sm:$0x3] %v1372_v32  ;;  %103 = vst [vmem:[#allocation0 + $0x460] sm:$0x3] %v1373_v33  ;;  %v1375_v36 = vld [vmem:[%s2263_s0 + $0x114] sm:$0x3]  ;;  %v1047_v37 = vsel %vm802_vm0, %v1045_v30, %v1043_v35 }
  0x3f   :  { %108 = vst [vmem:[#allocation0 + $0x458] sm:$0x3] %v1374_v34  ;;  %113 = vst [vmem:[#allocation0 + $0x450] sm:$0x3] %v1375_v36  ;;  %v1376_v38 = vld [vmem:[%s2263_s0 + $0x112] sm:$0x3]  ;;  %1048 = vrot.lane.b32.xlu0 %v1047_v37, %s1552_s10 }
  0x40   :  { %v1377_v39 = vld [vmem:[%s2263_s0 + $0x110] sm:$0x3]  ;;  %v1490_v40 = vld [vmem:[%s2263_s0 + $0x2e] sm:$0x3]  ;;  %118 = vst [vmem:[#allocation0 + $0x448] sm:$0x3] %v1376_v38 }
  0x41   :  { %123 = vst [vmem:[#allocation0 + $0x440] sm:$0x3] %v1377_v39  ;;  %688 = vst [vmem:[#allocation0 + $0xb8] sm:$0x3] %v1490_v40  ;;  %v1491_v41 = vld [vmem:[%s2263_s0 + $0x2c] sm:$0x3] }
  0x42   :  { %v1492_v42 = vld [vmem:[%s2263_s0 + $0x2a] sm:$0x3]  ;;  %v1493_v43 = vld [vmem:[%s2263_s0 + $0x28] sm:$0x3]  ;;  %693 = vst [vmem:[#allocation0 + $0xb0] sm:$0x3] %v1491_v41 }
  0x43   :  { %v1067_v44 = vld [vmem:[#allocation0 + $0x341] ss:$8 sm:$0xf0]   ;;  %698 = vst [vmem:[#allocation0 + $0xa8] sm:$0x3] %v1492_v42 }
  0x44   :  { %703 = vst [vmem:[#allocation0 + $0xa0] sm:$0x3] %v1493_v43  ;;  %v1494_v45 = vld [vmem:[%s2263_s0 + $0x26] sm:$0x3]  ;;  %v1495_v46 = vld [vmem:[%s2263_s0 + $0x24] sm:$0x3] }
  0x45   :  { %708 = vst [vmem:[#allocation0 + $0x98] sm:$0x3] %v1494_v45  ;;  %v1496_v47 = vld [vmem:[%s2263_s0 + $0x22] sm:$0x3]  ;;  %v1497_v48 = vld [vmem:[%s2263_s0 + $0x20] sm:$0x3] }
  0x46   :  { %v1065_v49 = vld [vmem:[#allocation0 + $0x341] ss:$8 sm:$0xf]   ;;  %713 = vst [vmem:[#allocation0 + $0x90] sm:$0x3] %v1495_v46 }
  0x47   :  { %718 = vst [vmem:[#allocation0 + $0x88] sm:$0x3] %v1496_v47  ;;  %723 = vst [vmem:[#allocation0 + $0x80] sm:$0x3] %v1497_v48  ;;  %v1458_v50 = vld [vmem:[%s2263_s0 + $0x6e] sm:$0x3]  ;;  %v1069_v51 = vsel %vm802_vm0, %v1067_v44, %v1065_v49 }
  0x48   :  { %528 = vst [vmem:[#allocation0 + $0x1b8] sm:$0x3] %v1458_v50  ;;  %v1459_v52 = vld [vmem:[%s2263_s0 + $0x6c] sm:$0x3]  ;;  %v1460_v53 = vld [vmem:[%s2263_s0 + $0x6a] sm:$0x3]  ;;  %1070 = vrot.lane.b32.xlu0 %v1069_v51, %s1552_s10 }
  0x49   :  { %v1461_v54 = vld [vmem:[%s2263_s0 + $0x68] sm:$0x3]  ;;  %533 = vst [vmem:[#allocation0 + $0x1b0] sm:$0x3] %v1459_v52  ;;  %538 = vst [vmem:[#allocation0 + $0x1a8] sm:$0x3] %v1460_v53 }
  0x4a   :  { %v1078_v55 = vld [vmem:[#allocation0 + $0x441] ss:$8 sm:$0xf0]   ;;  %543 = vst [vmem:[#allocation0 + $0x1a0] sm:$0x3] %v1461_v54 }
  0x4b   :  { %v1462_v56 = vld [vmem:[%s2263_s0 + $0x66] sm:$0x3]  ;;  %v1463_v57 = vld [vmem:[%s2263_s0 + $0x64] sm:$0x3]  ;;  %v1464_v58 = vld [vmem:[%s2263_s0 + $0x62] sm:$0x3] }
  0x4c   :  { %548 = vst [vmem:[#allocation0 + $0x198] sm:$0x3] %v1462_v56  ;;  %v1465_v59 = vld [vmem:[%s2263_s0 + $0x60] sm:$0x3]  ;;  %553 = vst [vmem:[#allocation0 + $0x190] sm:$0x3] %v1463_v57 }
  0x4d   :  { %v1076_v60 = vld [vmem:[#allocation0 + $0x441] ss:$8 sm:$0xf]   ;;  %558 = vst [vmem:[#allocation0 + $0x188] sm:$0x3] %v1464_v58 }
  0x4e   :  { %563 = vst [vmem:[#allocation0 + $0x180] sm:$0x3] %v1465_v59  ;;  %v1426_v61 = vld [vmem:[%s2263_s0 + $0xae] sm:$0x3]  ;;  %v1080_v62 = vsel %vm802_vm0, %v1078_v55, %v1076_v60  ;;  %v1427_v0 = vld [vmem:[%s2263_s0 + $0xac] sm:$0x3] }
  0x4f   :  { %v1089_v63 = vld [vmem:[#allocation0 + $0x81] ss:$8 sm:$0xf0]   ;;  %368 = vst [vmem:[#allocation0 + $0x2b8] sm:$0x3] %v1426_v61  ;;  %1081 = vrot.lane.b32.xlu1 %v1080_v62, %s1552_s10 }
  0x50   :  { %373 = vst [vmem:[#allocation0 + $0x2b0] sm:$0x3] %v1427_v0  ;;  %v1428_v1 = vld [vmem:[%s2263_s0 + $0xaa] sm:$0x3]  ;;  %v1429_v2 = vld [vmem:[%s2263_s0 + $0xa8] sm:$0x3] }
  0x51   :  { %v1430_v3 = vld [vmem:[%s2263_s0 + $0xa6] sm:$0x3]  ;;  %v1087_v4 = vld [vmem:[#allocation0 + $0x81] ss:$8 sm:$0xf]  }
  0x52   :  { %378 = vst [vmem:[#allocation0 + $0x2a8] sm:$0x3] %v1428_v1  ;;  %383 = vst [vmem:[#allocation0 + $0x2a0] sm:$0x3] %v1429_v2  ;;  %v1431_v5 = vld [vmem:[%s2263_s0 + $0xa4] sm:$0x3]  ;;  %v1091_v6 = vsel %vm802_vm0, %v1089_v63, %v1087_v4 }
  0x53   :  { %388 = vst [vmem:[#allocation0 + $0x298] sm:$0x3] %v1430_v3  ;;  %393 = vst [vmem:[#allocation0 + $0x290] sm:$0x3] %v1431_v5  ;;  %v1432_v7 = vld [vmem:[%s2263_s0 + $0xa2] sm:$0x3]  ;;  %1092 = vrot.lane.b32.xlu0 %v1091_v6, %s1552_s10 }
  0x54   :  { %v1433_v8 = vld [vmem:[%s2263_s0 + $0xa0] sm:$0x3]  ;;  %v1394_v9 = vld [vmem:[%s2263_s0 + $0xee] sm:$0x3]  ;;  %398 = vst [vmem:[#allocation0 + $0x288] sm:$0x3] %v1432_v7 }
  0x55   :  { %v1100_v10 = vld [vmem:[#allocation0 + $0x181] ss:$8 sm:$0xf0]   ;;  %403 = vst [vmem:[#allocation0 + $0x280] sm:$0x3] %v1433_v8 }
  0x56   :  { %208 = vst [vmem:[#allocation0 + $0x3b8] sm:$0x3] %v1394_v9  ;;  %v1395_v11 = vld [vmem:[%s2263_s0 + $0xec] sm:$0x3]  ;;  %v1396_v12 = vld [vmem:[%s2263_s0 + $0xea] sm:$0x3] }
  0x57   :  { %213 = vst [vmem:[#allocation0 + $0x3b0] sm:$0x3] %v1395_v11  ;;  %v1397_v13 = vld [vmem:[%s2263_s0 + $0xe8] sm:$0x3]  ;;  %v1398_v14 = vld [vmem:[%s2263_s0 + $0xe6] sm:$0x3] }
  0x58   :  { %v1098_v15 = vld [vmem:[#allocation0 + $0x181] ss:$8 sm:$0xf]   ;;  %218 = vst [vmem:[#allocation0 + $0x3a8] sm:$0x3] %v1396_v12 }
  0x59   :  { %223 = vst [vmem:[#allocation0 + $0x3a0] sm:$0x3] %v1397_v13  ;;  %228 = vst [vmem:[#allocation0 + $0x398] sm:$0x3] %v1398_v14  ;;  %v1399_v16 = vld [vmem:[%s2263_s0 + $0xe4] sm:$0x3]  ;;  %v1102_v17 = vsel %vm802_vm0, %v1100_v10, %v1098_v15 }
  0x5a   :  { %233 = vst [vmem:[#allocation0 + $0x390] sm:$0x3] %v1399_v16  ;;  %v1400_v18 = vld [vmem:[%s2263_s0 + $0xe2] sm:$0x3]  ;;  %v1401_v19 = vld [vmem:[%s2263_s0 + $0xe0] sm:$0x3]  ;;  %1103 = vrot.lane.b32.xlu1 %v1102_v17, %s1552_s10 }
  0x5b   :  { %v1482_v20 = vld [vmem:[%s2263_s0 + $0x3e] sm:$0x3]  ;;  %238 = vst [vmem:[#allocation0 + $0x388] sm:$0x3] %v1400_v18  ;;  %243 = vst [vmem:[#allocation0 + $0x380] sm:$0x3] %v1401_v19 }
  0x5c   :  { %648 = vst [vmem:[#allocation0 + $0xf8] sm:$0x3] %v1482_v20  ;;  %v1483_v21 = vld [vmem:[%s2263_s0 + $0x3c] sm:$0x3]  ;;  %v1484_v22 = vld [vmem:[%s2263_s0 + $0x3a] sm:$0x3] }
  0x5d   :  { %v1485_v23 = vld [vmem:[%s2263_s0 + $0x38] sm:$0x3]  ;;  %653 = vst [vmem:[#allocation0 + $0xf0] sm:$0x3] %v1483_v21  ;;  %658 = vst [vmem:[#allocation0 + $0xe8] sm:$0x3] %v1484_v22 }
  0x5e   :  { %v1111_v24 = vld [vmem:[#allocation0 + $0x281] ss:$8 sm:$0xf0]   ;;  %663 = vst [vmem:[#allocation0 + $0xe0] sm:$0x3] %v1485_v23 }
  0x5f   :  { %v1486_v25 = vld [vmem:[%s2263_s0 + $0x36] sm:$0x3]  ;;  %v1487_v26 = vld [vmem:[%s2263_s0 + $0x34] sm:$0x3]  ;;  %v1488_v27 = vld [vmem:[%s2263_s0 + $0x32] sm:$0x3] }
  0x60   :  { %668 = vst [vmem:[#allocation0 + $0xd8] sm:$0x3] %v1486_v25  ;;  %v1489_v28 = vld [vmem:[%s2263_s0 + $0x30] sm:$0x3]  ;;  %673 = vst [vmem:[#allocation0 + $0xd0] sm:$0x3] %v1487_v26 }
  0x61   :  { %v1109_v29 = vld [vmem:[#allocation0 + $0x281] ss:$8 sm:$0xf]   ;;  %678 = vst [vmem:[#allocation0 + $0xc8] sm:$0x3] %v1488_v27 }
  0x62   :  { %683 = vst [vmem:[#allocation0 + $0xc0] sm:$0x3] %v1489_v28  ;;  %v1362_v30 = vld [vmem:[%s2263_s0 + $0x12e] sm:$0x3]  ;;  %v1113_v31 = vsel %vm802_vm0, %v1111_v24, %v1109_v29  ;;  %v1363_v32 = vld [vmem:[%s2263_s0 + $0x12c] sm:$0x3] }
  0x63   :  { %48 = vst [vmem:[#allocation0 + $0x4b8] sm:$0x3] %v1362_v30  ;;  %v1364_v33 = vld [vmem:[%s2263_s0 + $0x12a] sm:$0x3]  ;;  %v1365_v34 = vld [vmem:[%s2263_s0 + $0x128] sm:$0x3]  ;;  %1114 = vrot.lane.b32.xlu0 %v1113_v31, %s1552_s10 }
  0x64   :  { %v1122_v35 = vld [vmem:[#allocation0 + $0x381] ss:$8 sm:$0xf0]   ;;  %53 = vst [vmem:[#allocation0 + $0x4b0] sm:$0x3] %v1363_v32 }
  0x65   :  { %58 = vst [vmem:[#allocation0 + $0x4a8] sm:$0x3] %v1364_v33  ;;  %63 = vst [vmem:[#allocation0 + $0x4a0] sm:$0x3] %v1365_v34  ;;  %v1366_v36 = vld [vmem:[%s2263_s0 + $0x126] sm:$0x3] }
  0x66   :  { %68 = vst [vmem:[#allocation0 + $0x498] sm:$0x3] %v1366_v36  ;;  %v1367_v37 = vld [vmem:[%s2263_s0 + $0x124] sm:$0x3]  ;;  %v1368_v38 = vld [vmem:[%s2263_s0 + $0x122] sm:$0x3] }
  0x67   :  { %v1369_v39 = vld [vmem:[%s2263_s0 + $0x120] sm:$0x3]  ;;  %73 = vst [vmem:[#allocation0 + $0x490] sm:$0x3] %v1367_v37  ;;  %78 = vst [vmem:[#allocation0 + $0x488] sm:$0x3] %v1368_v38 }
  0x68   :  { %v1120_v40 = vld [vmem:[#allocation0 + $0x381] ss:$8 sm:$0xf]   ;;  %83 = vst [vmem:[#allocation0 + $0x480] sm:$0x3] %v1369_v39 }
  0x69   :  { %v1418_v41 = vld [vmem:[%s2263_s0 + $0xbe] sm:$0x3]  ;;  %v1124_v42 = vsel %vm802_vm0, %v1122_v35, %v1120_v40  ;;  %v1144_v43 = vld [vmem:[#allocation0 + $0xc1] ss:$8 sm:$0xf0]  }
  0x6a   :  { %328 = vst [vmem:[#allocation0 + $0x2f8] sm:$0x3] %v1418_v41  ;;  %v1419_v44 = vld [vmem:[%s2263_s0 + $0xbc] sm:$0x3]  ;;  %1125 = vrot.lane.b32.xlu1 %v1124_v42, %s1552_s10  ;;  %v1420_v45 = vld [vmem:[%s2263_s0 + $0xba] sm:$0x3] }
  0x6b   :  { %333 = vst [vmem:[#allocation0 + $0x2f0] sm:$0x3] %v1419_v44  ;;  %v1421_v46 = vld [vmem:[%s2263_s0 + $0xb8] sm:$0x3]  ;;  %v1422_v47 = vld [vmem:[%s2263_s0 + $0xb6] sm:$0x3] }
  0x6c   :  { %v1142_v48 = vld [vmem:[#allocation0 + $0xc1] ss:$8 sm:$0xf]   ;;  %338 = vst [vmem:[#allocation0 + $0x2e8] sm:$0x3] %v1420_v45 }
  0x6d   :  { %343 = vst [vmem:[#allocation0 + $0x2e0] sm:$0x3] %v1421_v46  ;;  %348 = vst [vmem:[#allocation0 + $0x2d8] sm:$0x3] %v1422_v47  ;;  %v1423_v49 = vld [vmem:[%s2263_s0 + $0xb4] sm:$0x3]  ;;  %v1146_v50 = vsel %vm802_vm0, %v1144_v43, %v1142_v48 }
  0x6e   :  { %353 = vst [vmem:[#allocation0 + $0x2d0] sm:$0x3] %v1423_v49  ;;  %v1424_v51 = vld [vmem:[%s2263_s0 + $0xb2] sm:$0x3]  ;;  %v1425_v52 = vld [vmem:[%s2263_s0 + $0xb0] sm:$0x3]  ;;  %1147 = vrot.lane.b32.xlu1 %v1146_v50, %s1552_s10 }
  0x6f   :  { %v1450_v53 = vld [vmem:[%s2263_s0 + $0x7e] sm:$0x3]  ;;  %v1133_v54 = vld [vmem:[#allocation0 + $0x481] ss:$8 sm:$0xf0]  }
  0x70   :  { %358 = vst [vmem:[#allocation0 + $0x2c8] sm:$0x3] %v1424_v51  ;;  %363 = vst [vmem:[#allocation0 + $0x2c0] sm:$0x3] %v1425_v52  ;;  %v1451_v55 = vld [vmem:[%s2263_s0 + $0x7c] sm:$0x3] }
  0x71   :  { %488 = vst [vmem:[#allocation0 + $0x1f8] sm:$0x3] %v1450_v53  ;;  %493 = vst [vmem:[#allocation0 + $0x1f0] sm:$0x3] %v1451_v55  ;;  %v1452_v56 = vld [vmem:[%s2263_s0 + $0x7a] sm:$0x3] }
  0x72   :  { %v1453_v57 = vld [vmem:[%s2263_s0 + $0x78] sm:$0x3]  ;;  %v1454_v58 = vld [vmem:[%s2263_s0 + $0x76] sm:$0x3]  ;;  %498 = vst [vmem:[#allocation0 + $0x1e8] sm:$0x3] %v1452_v56 }
  0x73   :  { %v1131_v59 = vld [vmem:[#allocation0 + $0x481] ss:$8 sm:$0xf]   ;;  %503 = vst [vmem:[#allocation0 + $0x1e0] sm:$0x3] %v1453_v57 }
  0x74   :  { %508 = vst [vmem:[#allocation0 + $0x1d8] sm:$0x3] %v1454_v58  ;;  %v1455_v60 = vld [vmem:[%s2263_s0 + $0x74] sm:$0x3]  ;;  %v1135_v61 = vsel %vm802_vm0, %v1133_v54, %v1131_v59  ;;  %v1456_v62 = vld [vmem:[%s2263_s0 + $0x72] sm:$0x3] }
  0x75   :  { %513 = vst [vmem:[#allocation0 + $0x1d0] sm:$0x3] %v1455_v60  ;;  %v1457_v63 = vld [vmem:[%s2263_s0 + $0x70] sm:$0x3]  ;;  %v1386_v0 = vld [vmem:[%s2263_s0 + $0xfe] sm:$0x3]  ;;  %1136 = vrot.lane.b32.xlu0 %v1135_v61, %s1552_s10 }
  0x76   :  { %518 = vst [vmem:[#allocation0 + $0x1c8] sm:$0x3] %v1456_v62  ;;  %523 = vst [vmem:[#allocation0 + $0x1c0] sm:$0x3] %v1457_v63  ;;  %v1387_v1 = vld [vmem:[%s2263_s0 + $0xfc] sm:$0x3] }
  0x77   :  { %168 = vst [vmem:[#allocation0 + $0x3f8] sm:$0x3] %v1386_v0  ;;  %v1388_v2 = vld [vmem:[%s2263_s0 + $0xfa] sm:$0x3]  ;;  %v1389_v3 = vld [vmem:[%s2263_s0 + $0xf8] sm:$0x3] }
  0x78   :  { %v1166_v4 = vld [vmem:[#allocation0 + $0x2c1] ss:$8 sm:$0xf0]   ;;  %173 = vst [vmem:[#allocation0 + $0x3f0] sm:$0x3] %v1387_v1 }
  0x79   :  { %178 = vst [vmem:[#allocation0 + $0x3e8] sm:$0x3] %v1388_v2  ;;  %183 = vst [vmem:[#allocation0 + $0x3e0] sm:$0x3] %v1389_v3  ;;  %v1390_v5 = vld [vmem:[%s2263_s0 + $0xf6] sm:$0x3] }
  0x7a   :  { %188 = vst [vmem:[#allocation0 + $0x3d8] sm:$0x3] %v1390_v5  ;;  %v1391_v6 = vld [vmem:[%s2263_s0 + $0xf4] sm:$0x3]  ;;  %v1392_v7 = vld [vmem:[%s2263_s0 + $0xf2] sm:$0x3] }
  0x7b   :  { %v1393_v8 = vld [vmem:[%s2263_s0 + $0xf0] sm:$0x3]  ;;  %193 = vst [vmem:[#allocation0 + $0x3d0] sm:$0x3] %v1391_v6  ;;  %198 = vst [vmem:[#allocation0 + $0x3c8] sm:$0x3] %v1392_v7 }
  0x7c   :  { %v1164_v9 = vld [vmem:[#allocation0 + $0x2c1] ss:$8 sm:$0xf]   ;;  %203 = vst [vmem:[#allocation0 + $0x3c0] sm:$0x3] %v1393_v8 }
  0x7d   :  { %v1354_v10 = vld [vmem:[%s2263_s0 + $0x13e] sm:$0x3]  ;;  %v1168_v11 = vsel %vm802_vm0, %v1166_v4, %v1164_v9  ;;  %v1355_v12 = vld [vmem:[%s2263_s0 + $0x13c] sm:$0x3]  ;;  %v1356_v13 = vld [vmem:[%s2263_s0 + $0x13a] sm:$0x3] }
  0x7e   :  { %8 = vst [vmem:[#allocation0 + $0x4f8] sm:$0x3] %v1354_v10  ;;  %v1357_v14 = vld [vmem:[%s2263_s0 + $0x138] sm:$0x3]  ;;  %1169 = vrot.lane.b32.xlu1 %v1168_v11, %s1552_s10  ;;  %13 = vst [vmem:[#allocation0 + $0x4f0] sm:$0x3] %v1355_v12 }
  0x7f   :  { %v1155_v15 = vld [vmem:[#allocation0 + $0x1c1] ss:$8 sm:$0xf0]   ;;  %18 = vst [vmem:[#allocation0 + $0x4e8] sm:$0x3] %v1356_v13 }
  0x80   :  { %23 = vst [vmem:[#allocation0 + $0x4e0] sm:$0x3] %v1357_v14  ;;  %v1358_v16 = vld [vmem:[%s2263_s0 + $0x136] sm:$0x3]  ;;  %v1359_v17 = vld [vmem:[%s2263_s0 + $0x134] sm:$0x3] }
  0x81   :  { %28 = vst [vmem:[#allocation0 + $0x4d8] sm:$0x3] %v1358_v16  ;;  %v1360_v18 = vld [vmem:[%s2263_s0 + $0x132] sm:$0x3]  ;;  %v1361_v19 = vld [vmem:[%s2263_s0 + $0x130] sm:$0x3] }
  0x82   :  { %v1153_v20 = vld [vmem:[#allocation0 + $0x1c1] ss:$8 sm:$0xf]   ;;  %33 = vst [vmem:[#allocation0 + $0x4d0] sm:$0x3] %v1359_v17 }
  0x83   :  { %38 = vst [vmem:[#allocation0 + $0x4c8] sm:$0x3] %v1360_v18  ;;  %43 = vst [vmem:[#allocation0 + $0x4c0] sm:$0x3] %v1361_v19  ;;  %v1157_v22 = vsel %vm802_vm0, %v1155_v15, %v1153_v20 }
  0x84   :  { %v800_v21 = vld [vmem:[#allocation0] ss:$8 sm:$0xf]   ;;  %v1177_v23 = vld [vmem:[#allocation0 + $0x3c1] ss:$8 sm:$0xf0]   ;;  %1158 = vrot.lane.b32.xlu0 %v1157_v22, %s1552_s10 }
  0x85   :  { %v801_v24 = vld [vmem:[#allocation0] ss:$8 sm:$0xf0]   ;;  %v1175_v28 = vld [vmem:[#allocation0 + $0x3c1] ss:$8 sm:$0xf]  }
  0x86   :  { %v803_v25 = vsel %vm802_vm0, %v801_v24, %v800_v21  ;;  %v870_v26 = vld [vmem:[#allocation0 + $0x200] ss:$8 sm:$0xf]   ;;  %v1179_v31 = vsel %vm802_vm0, %v1177_v23, %v1175_v28 }
  0x87   :  { %v872_v27 = vld [vmem:[#allocation0 + $0x200] ss:$8 sm:$0xf0]   ;;  %805 = vst.msk [vmem:[%s2264_s1] sm:$0xff] %vm804_vm1, %v803_v25   ;;  %v984_v24 = vpop.permute.xlu0 %983  }
  0x88   :  { %v874_v29 = vsel %vm802_vm0, %v872_v27, %v870_v26  ;;  %v834_v30 = vld [vmem:[#allocation0 + $0x100] ss:$8 sm:$0xf]   ;;  %v1188_v34 = vld [vmem:[#allocation0 + $0x4c1] ss:$8 sm:$0xf0]   ;;  %1180 = vrot.lane.b32.xlu0 %v1179_v31, %s1552_s10 }
  0x89   :  { %1520 = vst.msk [vmem:[%s2264_s1 + $0x40] sm:$0xff] %vm804_vm1, %v874_v29   ;;  %v836_v32 = vld [vmem:[#allocation0 + $0x100] ss:$8 sm:$0xf0]  }
  0x8a   :  { %v906_v33 = vld [vmem:[#allocation0 + $0x300] ss:$8 sm:$0xf]   ;;  %v838_v35 = vsel %vm802_vm0, %v836_v32, %v834_v30  ;;  %v1186_v40 = vld [vmem:[#allocation0 + $0x4c1] ss:$8 sm:$0xf]  }
  0x8b   :  { %v908_v36 = vld [vmem:[#allocation0 + $0x300] ss:$8 sm:$0xf0]   ;;  %1516 = vst.msk [vmem:[%s2264_s1 + $0x20] sm:$0xff] %vm804_vm1, %v838_v35   ;;  %v1190_v43 = vsel %vm802_vm0, %v1188_v34, %v1186_v40 }
  0x8c   :  { %v910_v37 = vsel %vm802_vm0, %v908_v36, %v906_v33  ;;  %v807_v38 = vld [vmem:[#allocation0 + $0x40] ss:$8 sm:$0xf]   ;;  %1191 = vrot.lane.b32.xlu1 %v1190_v43, %s1552_s10  ;;  %986 = vst.msk [vmem:[%s2264_s1] sm:$0xff] %vm985_vm2, %v984_v24   ;;  %v1005_v25 = vpop.permute.xlu1 %1004  }
  0x8d   :  { %v809_v39 = vld [vmem:[#allocation0 + $0x40] ss:$8 sm:$0xf0]   ;;  %1524 = vst.msk [vmem:[%s2264_s1 + $0x60] sm:$0xff] %vm804_vm1, %v910_v37  }
  0x8e   :  { %v811_v41 = vsel %vm802_vm0, %v809_v39, %v807_v38  ;;  %v942_v42 = vld [vmem:[#allocation0 + $0x400] ss:$8 sm:$0xf]   ;;  %1533 = vst.msk [vmem:[%s2264_s1 + $0x40] sm:$0xff] %vm985_vm2, %v1005_v25  }
  0x8f   :  { %1513 = vst.msk [vmem:[%s2264_s1 + $0x8] sm:$0xff] %vm804_vm1, %v811_v41   ;;  %v944_v44 = vld [vmem:[#allocation0 + $0x400] ss:$8 sm:$0xf0]  }
  0x90   :  { %v879_v45 = vld [vmem:[#allocation0 + $0x240] ss:$8 sm:$0xf]   ;;  %v946_v46 = vsel %vm802_vm0, %v944_v44, %v942_v42  ;;  %v994_v26 = vpop.permute.xlu0 %993  }
  0x91   :  { %v881_v47 = vld [vmem:[#allocation0 + $0x240] ss:$8 sm:$0xf0]   ;;  %1528 = vst.msk [vmem:[%s2264_s1 + $0x80] sm:$0xff] %vm804_vm1, %v946_v46  }
  0x92   :  { %v843_v48 = vld [vmem:[#allocation0 + $0x140] ss:$8 sm:$0xf]   ;;  %v883_v49 = vsel %vm802_vm0, %v881_v47, %v879_v45  ;;  %1532 = vst.msk [vmem:[%s2264_s1 + $0x20] sm:$0xff] %vm985_vm2, %v994_v26  }
  0x93   :  { %v845_v50 = vld [vmem:[#allocation0 + $0x140] ss:$8 sm:$0xf0]   ;;  %1521 = vst.msk [vmem:[%s2264_s1 + $0x48] sm:$0xff] %vm804_vm1, %v883_v49  }
  0x94   :  { %v915_v51 = vld [vmem:[#allocation0 + $0x340] ss:$8 sm:$0xf]   ;;  %v847_v52 = vsel %vm802_vm0, %v845_v50, %v843_v48 }
  0x95   :  { %v917_v53 = vld [vmem:[#allocation0 + $0x340] ss:$8 sm:$0xf0]   ;;  %1517 = vst.msk [vmem:[%s2264_s1 + $0x28] sm:$0xff] %vm804_vm1, %v847_v52  }
  0x96   :  { %v951_v54 = vld [vmem:[#allocation0 + $0x440] ss:$8 sm:$0xf]   ;;  %v919_v55 = vsel %vm802_vm0, %v917_v53, %v915_v51 }
  0x97   :  { %v953_v56 = vld [vmem:[#allocation0 + $0x440] ss:$8 sm:$0xf0]   ;;  %1525 = vst.msk [vmem:[%s2264_s1 + $0x68] sm:$0xff] %vm804_vm1, %v919_v55   ;;  %v1016_v27 = vpop.permute.xlu1 %1015  }
  0x98   :  { %v816_v57 = vld [vmem:[#allocation0 + $0x80] ss:$8 sm:$0xf]   ;;  %v955_v58 = vsel %vm802_vm0, %v953_v56, %v951_v54  ;;  %1534 = vst.msk [vmem:[%s2264_s1 + $0x60] sm:$0xff] %vm985_vm2, %v1016_v27  }
  0x99   :  { %v818_v59 = vld [vmem:[#allocation0 + $0x80] ss:$8 sm:$0xf0]   ;;  %1529 = vst.msk [vmem:[%s2264_s1 + $0x88] sm:$0xff] %vm804_vm1, %v955_v58  }
  0x9a   :  { %v852_v60 = vld [vmem:[#allocation0 + $0x180] ss:$8 sm:$0xf]   ;;  %v820_v61 = vsel %vm802_vm0, %v818_v59, %v816_v57 }
  0x9b   :  { %v854_v62 = vld [vmem:[#allocation0 + $0x180] ss:$8 sm:$0xf0]   ;;  %1514 = vst.msk [vmem:[%s2264_s1 + $0x10] sm:$0xff] %vm804_vm1, %v820_v61  }
  0x9c   :  { %v888_v63 = vld [vmem:[#allocation0 + $0x280] ss:$8 sm:$0xf]   ;;  %v856_v0 = vsel %vm802_vm0, %v854_v62, %v852_v60 }
  0x9d   :  { %v890_v1 = vld [vmem:[#allocation0 + $0x280] ss:$8 sm:$0xf0]   ;;  %1518 = vst.msk [vmem:[%s2264_s1 + $0x30] sm:$0xff] %vm804_vm1, %v856_v0  }
  0x9e   :  { %v924_v2 = vld [vmem:[#allocation0 + $0x380] ss:$8 sm:$0xf]   ;;  %v892_v3 = vsel %vm802_vm0, %v890_v1, %v888_v63 }
  0x9f   :  { %v926_v4 = vld [vmem:[#allocation0 + $0x380] ss:$8 sm:$0xf0]   ;;  %1522 = vst.msk [vmem:[%s2264_s1 + $0x50] sm:$0xff] %vm804_vm1, %v892_v3  }
  0xa0   :  { %v825_v5 = vld [vmem:[#allocation0 + $0xc0] ss:$8 sm:$0xf]   ;;  %v928_v6 = vsel %vm802_vm0, %v926_v4, %v924_v2  ;;  %v1038_v28 = vpop.permute.xlu1 %1037  }
  0xa1   :  { %v827_v7 = vld [vmem:[#allocation0 + $0xc0] ss:$8 sm:$0xf0]   ;;  %1526 = vst.msk [vmem:[%s2264_s1 + $0x70] sm:$0xff] %vm804_vm1, %v928_v6  }
  0xa2   :  { %v960_v8 = vld [vmem:[#allocation0 + $0x480] ss:$8 sm:$0xf]   ;;  %v829_v9 = vsel %vm802_vm0, %v827_v7, %v825_v5  ;;  %1536 = vst.msk [vmem:[%s2264_s1 + $0x8] sm:$0xff] %vm985_vm2, %v1038_v28  }
  0xa3   :  { %v962_v10 = vld [vmem:[#allocation0 + $0x480] ss:$8 sm:$0xf0]   ;;  %1515 = vst.msk [vmem:[%s2264_s1 + $0x18] sm:$0xff] %vm804_vm1, %v829_v9  }
  0xa4   :  { %v897_v11 = vld [vmem:[#allocation0 + $0x2c0] ss:$8 sm:$0xf]   ;;  %v964_v12 = vsel %vm802_vm0, %v962_v10, %v960_v8 }
  0xa5   :  { %v899_v13 = vld [vmem:[#allocation0 + $0x2c0] ss:$8 sm:$0xf0]   ;;  %1530 = vst.msk [vmem:[%s2264_s1 + $0x90] sm:$0xff] %vm804_vm1, %v964_v12  }
  0xa6   :  { %v861_v14 = vld [vmem:[#allocation0 + $0x1c0] ss:$8 sm:$0xf]   ;;  %v901_v15 = vsel %vm802_vm0, %v899_v13, %v897_v11  ;;  %v1027_v29 = vpop.permute.xlu0 %1026  }
  0xa7   :  { %v863_v16 = vld [vmem:[#allocation0 + $0x1c0] ss:$8 sm:$0xf0]   ;;  %1523 = vst.msk [vmem:[%s2264_s1 + $0x58] sm:$0xff] %vm804_vm1, %v901_v15  }
  0xa8   :  { %v933_v17 = vld [vmem:[#allocation0 + $0x3c0] ss:$8 sm:$0xf]   ;;  %v865_v18 = vsel %vm802_vm0, %v863_v16, %v861_v14  ;;  %1535 = vst.msk [vmem:[%s2264_s1 + $0x80] sm:$0xff] %vm985_vm2, %v1027_v29  }
  0xa9   :  { %v935_v19 = vld [vmem:[#allocation0 + $0x3c0] ss:$8 sm:$0xf0]   ;;  %1519 = vst.msk [vmem:[%s2264_s1 + $0x38] sm:$0xff] %vm804_vm1, %v865_v18  }
  0xaa   :  { %v969_v20 = vld [vmem:[#allocation0 + $0x4c0] ss:$8 sm:$0xf]   ;;  %v937_v21 = vsel %vm802_vm0, %v935_v19, %v933_v17 }
  0xab   :  { %v971_v22 = vld [vmem:[#allocation0 + $0x4c0] ss:$8 sm:$0xf0]   ;;  %1527 = vst.msk [vmem:[%s2264_s1 + $0x78] sm:$0xff] %vm804_vm1, %v937_v21   ;;  %v1060_v30 = vpop.permute.xlu1 %1059  }
  0xac   :  { %v973_v23 = vsel %vm802_vm0, %v971_v22, %v969_v20  ;;  %1538 = vst.msk [vmem:[%s2264_s1 + $0x48] sm:$0xff] %vm985_vm2, %v1060_v30  }
  0xad   :  { %1531 = vst.msk [vmem:[%s2264_s1 + $0x98] sm:$0xff] %vm804_vm1, %v973_v23  }
  0xb1   :  { %v1049_v31 = vpop.permute.xlu0 %1048  }
  0xb2   :  { %1537 = vst.msk [vmem:[%s2264_s1 + $0x28] sm:$0xff] %vm985_vm2, %v1049_v31  }
  0xba   :  { %v1071_v32 = vpop.permute.xlu0 %1070  }
  0xbb   :  { %1539 = vst.msk [vmem:[%s2264_s1 + $0x68] sm:$0xff] %vm985_vm2, %v1071_v32  }
  0xc1   :  { %v1082_v33 = vpop.permute.xlu1 %1081  }
  0xc2   :  { %1540 = vst.msk [vmem:[%s2264_s1 + $0x88] sm:$0xff] %vm985_vm2, %v1082_v33  }
  0xc5   :  { %v1093_v34 = vpop.permute.xlu0 %1092  }
  0xc6   :  { %1541 = vst.msk [vmem:[%s2264_s1 + $0x10] sm:$0xff] %vm985_vm2, %v1093_v34  }
  0xcc   :  { %v1104_v35 = vpop.permute.xlu1 %1103  }
  0xcd   :  { %1542 = vst.msk [vmem:[%s2264_s1 + $0x30] sm:$0xff] %vm985_vm2, %v1104_v35  }
  0xd5   :  { %v1115_v36 = vpop.permute.xlu0 %1114  }
  0xd6   :  { %1543 = vst.msk [vmem:[%s2264_s1 + $0x50] sm:$0xff] %vm985_vm2, %v1115_v36  }
  0xdc   :  { %v1126_v37 = vpop.permute.xlu1 %1125  }
  0xdd   :  { %1544 = vst.msk [vmem:[%s2264_s1 + $0x70] sm:$0xff] %vm985_vm2, %v1126_v37  }
  0xe0   :  { %v1148_v38 = vpop.permute.xlu1 %1147  }
  0xe1   :  { %1546 = vst.msk [vmem:[%s2264_s1 + $0x18] sm:$0xff] %vm985_vm2, %v1148_v38  }
  0xe7   :  { %v1137_v39 = vpop.permute.xlu0 %1136  }
  0xe8   :  { %1545 = vst.msk [vmem:[%s2264_s1 + $0x90] sm:$0xff] %vm985_vm2, %v1137_v39  }
  0xf0   :  { %v1170_v40 = vpop.permute.xlu1 %1169  }
  0xf1   :  { %1548 = vst.msk [vmem:[%s2264_s1 + $0x58] sm:$0xff] %vm985_vm2, %v1170_v40  }
  0xf6   :  { %v1159_v41 = vpop.permute.xlu0 %1158  }
  0xf7   :  { %1547 = vst.msk [vmem:[%s2264_s1 + $0x38] sm:$0xff] %vm985_vm2, %v1159_v41  }
  0xfa   :  { %v1181_v42 = vpop.permute.xlu0 %1180  }
  0xfb   :  { %1549 = vst.msk [vmem:[%s2264_s1 + $0x78] sm:$0xff] %vm985_vm2, %v1181_v42  }
  0xfe   :  { %v1192_v43 = vpop.permute.xlu1 %1191  }
  0xff   :  { %1550 = vst.msk [vmem:[%s2264_s1 + $0x98] sm:$0xff] %vm985_vm2, %v1192_v43  }

// kernel: deep_classifier_forward.1
= control target key start
LH: loop header
LB: loop body
LE: loop exit
PB: predicated region body
PF: predicated region fallthrough
CT: control target
= control target key end

     0   :  { %vm41_vm0 = vcmask 138240   ;;  %v2422_v1 = vmov 0.0   ;;  %vm29_vm1 = vcmask 273408   ;;  %s2423_s26 = smov 17   ;;  %v56_v3 = vlaneseq  ;;  %s2425_s29 = smov 127   ;;  %s3673_s0 = inlined_call_operand.vmem [shape: f32[4,512], index: 0, kind: input, shape index: {}]   ;;  %s3674_s2 = inlined_call_operand.vmem [shape: f32[8,1], index: 2, kind: input, shape index: {}]   ;;  %s3675_s1 = inlined_call_operand.vmem [shape: bf16[8,36], index: 1, kind: input, shape index: {}]   ;;  %s3676_s3 = inlined_call_operand.vmem [shape: bf16[16,72], index: 3, kind: input, shape index: {}]   ;;  %s3677_s4 = inlined_call_operand.vmem [shape: f32[16,1], index: 4, kind: input, shape index: {}]   ;;  %s3678_s6 = inlined_call_operand.vmem [shape: f32[10,1], index: 6, kind: input, shape index: {}]   ;;  %s3679_s5 = inlined_call_operand.vmem [shape: f32[10,16,32], index: 5, kind: input, shape index: {}]   ;;  %s3680_s7 = inlined_call_operand.vmem [shape: f32[10,2], index: 7, kind: output, shape index: {}]  }
   0x1   :  { %v31_v0 = vld [vmem:[%s3673_s0] sm:$0xff]  ;;  %27 = vst [vmem:[#allocation2] sm:$0xff] %v2422_v1  ;;  %711 = vst.msk [vmem:[#allocation4 + $0x20] sm:$0xff] %vm41_vm0, %v2422_v1  ;;  %v32_v2 = vld [vmem:[%s3673_s0 + $0x8] sm:$0xff]  ;;  %vm49_vm2 = vcmask 1043592   ;;  %vm50_vm3 = vcmask 1047556  }
   0x2   :  { %1183 = vst [vmem:[#allocation5] sm:$0xff] %v2422_v1  ;;  %35 = vrot.lane.b32.xlu0 %v31_v0, %s2423_s26  ;;  %30 = vst.msk [vmem:[#allocation2 + $0x10] sm:$0xf] %vm29_vm1, %v2422_v1  ;;  %v2487_v4 = vand.u32 127, %v56_v3  ;;  %v3703_v30 = vmov 0  ;;  %vm3681_vm13 = vcmask 1043456  }
   0x3   :  { %vm51_vm6 = vmor %vm50_vm3, %vm49_vm2  ;;  %vm54_vm14 = vcmask 134144   ;;  %v3707_v34 = vmov 0  ;;  %s2424_s0 = smov 110   ;;  %s2426_s30 = smov 95   ;;  %v2432_v53 = vmov 0   ;;  %v598_v55 = vld [vmem:[%s3674_s2] sm:$0xff] }
   0x4   :  { %v2490_v5 = vadd.s32 256, %v2487_v4  ;;  %v2493_v6 = vadd.s32 384, %v2487_v4  ;;  %v61_v8 = vshra.s32 %v2487_v4, 4  ;;  %v2499_v10 = vadd.s32 128, %v2487_v4  ;;  %s2427_s8 = smov 112   ;;  %s2428_s9 = smov 111   ;;  %653 = vmatprep.mubr.bf16.mxu0 %v2432_v53  ;;  %694 = vmatprep.mubr.bf16.mxu1 %v2432_v53 }
   0x5   :  { %v69_v19 = vand.u32 15, %v2487_v4  ;;  %s2429_s10 = smov 126   ;;  %s2430_s11 = smov 96   ;;  %2337 = vset.pattern.permute.xlu0 %v2432_v53  ;;  %2398 = vset.pattern.permute.xlu1 %v2432_v53 }
   0x6   :  { %37 = vrot.lane.b32.xlu0 %v32_v2, %s2423_s26  ;;  %v63_v7 = vshra.s32 %v2490_v5, 4  ;;  %v64_v9 = vshra.s32 %v2493_v6, 4  ;;  %v2505_v12 = vand.u32 15, %v61_v8  ;;  %v62_v14 = vshra.s32 %v2499_v10, 4  ;;  %s2431_s12 = smov 94   ;;  %s2435_s16 = smov 119  }
   0x7   :  { %v71_v15 = vand.u32 15, %v2490_v5  ;;  %v72_v18 = vand.u32 15, %v2493_v6  ;;  %v70_v26 = vand.u32 15, %v2499_v10  ;;  %v2529_v27 = vadd.s32 4294967295, %v69_v19  ;;  %s2436_s17 = smov 120   ;;  %s2437_s18 = smov 118  }
   0x8   :  { %v2501_v11 = vand.u32 15, %v63_v7  ;;  %v2507_v13 = vand.u32 15, %v64_v9  ;;  %v75_v17 = vadd.s32 4294967295, %v2505_v12  ;;  %v2516_v21 = vand.u32 15, %v62_v14 }
   0x9   :  { %v2520_v22 = vadd.s32 4294967295, %v71_v15  ;;  %v2524_v25 = vadd.s32 4294967295, %v72_v18  ;;  %v2550_v35 = vadd.s32 4294967295, %v70_v26  ;;  %vm3688_vm3 = vcmp.ge.s32.totalorder %v2529_v27, 0 }
   0xa   :  { %v77_v16 = vadd.s32 4294967295, %v2501_v11  ;;  %v78_v20 = vadd.s32 4294967295, %v2507_v13  ;;  %vm79_vm7 = vcmp.ge.s32.totalorder %v75_v17, 0  ;;  %vm83_vm8 = vcmp.lt.s32.totalorder %v75_v17, 16 }
   0xb   :  { %v76_v29 = vadd.s32 4294967295, %v2516_v21  ;;  %vm3683_vm12 = vcmp.ge.s32.totalorder %v2520_v22, 0  ;;  %vm2539_vm15 = vmand %vm79_vm7, %vm83_vm8  ;;  %vm3682_vm2 = vcmp.ge.s32.totalorder %v2524_v25, 0  ;;  %v2795_v40 = vadd.s32 1, %v71_v15 }
   0xc   :  { %vm81_vm4 = vcmp.ge.s32.totalorder %v77_v16, 0  ;;  %vm85_vm5 = vcmp.lt.s32.totalorder %v77_v16, 16  ;;  %vm82_vm9 = vcmp.ge.s32.totalorder %v78_v20, 0  ;;  %vm86_vm10 = vcmp.lt.s32.totalorder %v78_v20, 16  ;;  %vm99_vm8 = vmand %vm2539_vm15, %vm3688_vm3 }
   0xd   :  { %vm2533_vm11 = vmand %vm81_vm4, %vm85_vm5  ;;  %vm80_vm5 = vcmp.ge.s32.totalorder %v76_v29, 0 }
   0xe   :  { %v3704_v30 = vsel %vm2533_vm11, 4294967295, %v3703_v30  ;;  %vm2543_vm1 = vmand %vm82_vm9, %vm86_vm10  ;;  %vm3686_vm10 = vcmp.ge.s32.totalorder %v2550_v35, 0 }
   0xf   :  { %v3708_v34 = vsel %vm2543_vm1, 4294967295, %v3707_v34  ;;  %vm101_vm4 = vmand %vm2533_vm11, %vm3683_vm12 }
  0x10   :  { %vm102_vm7 = vmand %vm2543_vm1, %vm3682_vm2 }
  0x74   :  { %v36_v23 = vpop.permute.xlu0 %35 }
  0x75   :  { %v39_v24 = vrot.slane %v36_v23, 4 }
  0x77   :  { %v42_v28 = vsel %vm41_vm0, %v39_v24, %v36_v23 }
  0x78   :  { %52 = vst.msk [vmem:[#allocation2] sm:$0xff] %vm51_vm6, %v42_v28  ;;  %v38_v31 = vpop.permute.xlu0 %37  ;;  %vm84_vm6 = vcmp.lt.s32.totalorder %v76_v29, 16 }
  0x79   :  { %v40_v33 = vrot.slane %v38_v31, 4  ;;  %vm2569_vm9 = vmand %vm80_vm5, %vm84_vm6  ;;  %vm247_vm5 = vcmp.ge.s32.totalorder %v2516_v21, 0  ;;  %vm251_vm6 = vcmp.lt.s32.totalorder %v2516_v21, 16 }
  0x7a   :  { %vm2687_vm2 = vmand %vm247_vm5, %vm251_vm6 }
  0x7b   :  { %v44_v36 = vsel %vm3681_vm13, %v39_v24, %v40_v33  ;;  %55 = vst.msk [vmem:[#allocation2 + $0x10] sm:$0xf] %vm54_vm14, %v40_v33  ;;  %v2664_v24 = vadd.s32 1, %v69_v19  ;;  %vm246_vm14 = vcmp.ge.s32.totalorder %v2505_v12, 0  ;;  %v3711_v19 = vmov 0 }
  0x7c   :  { %v45_v37 = vsel %vm41_vm0, %v44_v36, %v38_v31  ;;  %vm100_vm0 = vmand %vm2569_vm9, %vm3686_vm10  ;;  %v2672_v31 = vadd.s32 1, %v70_v26  ;;  %v411_v33 = vadd.s32 1, %v2505_v12  ;;  %v3713_v36 = vmov 0 }
  0x7d   :  { %v2563_v38 = vcombine.high %v45_v37, %v45_v37  ;;  %v119_v39 = vsel %vm101_vm4, %v45_v37, 0.0  ;;  %vm250_vm4 = vcmp.lt.s32.totalorder %v2505_v12, 16  ;;  %v3714_v36 = vsel %vm2687_vm2, 4294967295, %v3713_v36 }
  0x7e   :  { %123 = vst [vmem:[#allocation3 + $0x10] sm:$0xf] %v119_v39  ;;  %vm3687_vm13 = vcmp.lt.s32.totalorder %v2672_v31, 16  ;;  %vm419_vm12 = vcmp.lt.s32.totalorder %v411_v33, 16  ;;  %vm3724_vm1 = vcmp.ge.s32.totalorder %v411_v33, 0 }
  0x7f   :  { %v243_v41 = vld [vmem:[#allocation2] sm:$0xff]  ;;  %v120_v42 = vsel %vm102_vm7, %v2563_v38, 0.0  ;;  %vm3684_vm7 = vcmask 1039360   ;;  %vm2711_vm5 = vmand %vm2687_vm2, %vm3687_vm13  ;;  %vm3721_vm13 = vcmp.ge.s32.totalorder %v2550_v35, 0 }
  0x80   :  { %v269_v43 = vcombine.high %v243_v41, %v243_v41  ;;  %v117_v44 = vsel %vm99_vm8, %v243_v41, 0.0  ;;  %124 = vst [vmem:[#allocation3 + $0x18] sm:$0xf] %v120_v42  ;;  %vm3685_vm8 = vcmp.lt.s32.totalorder %v2664_v24, 16  ;;  %vm2732_vm6 = vmand %vm2687_vm2, %vm3721_vm13  ;;  %vm3699_vm13 = vcmask 1031168  }
  0x81   :  { %121 = vst [vmem:[#allocation3] sm:$0xf] %v117_v44  ;;  %vm2741_vm11 = vmand %vm3724_vm1, %vm419_vm12  ;;  %vm3697_vm2 = vcmask 785408   ;;  %vm3729_vm12 = vcmask 916480  }
  0x82   :  { %v355_v45 = vld [vmem:[#allocation2 + $0x10] sm:$0xf]  ;;  %v118_v47 = vsel %vm100_vm0, %v269_v43, 0.0  ;;  %vm2679_vm0 = vmand %vm246_vm14, %vm250_vm4  ;;  %vm3693_vm4 = vcmask 900096  }
  0x83   :  { %v127_v46 = vld [vmem:[#allocation2 + $0x10] sm:$0xf]  ;;  %377 = vrot.lane.b32.xlu0 %v355_v45, %s2424_s0  ;;  %122 = vst [vmem:[#allocation3 + $0x8] sm:$0xf] %v118_v47  ;;  %v3712_v19 = vsel %vm2679_vm0, 4294967295, %v3711_v19  ;;  %vm2703_vm14 = vmand %vm2679_vm0, %vm3685_vm8 }
  0x84   :  { %157 = vrot.lane.b32.xlu1 %v127_v46, %s2425_s29  ;;  %v469_v48 = vld [vmem:[#allocation2 + $0x10] sm:$0xf]  ;;  %vm3730_vm1 = vmmov %vm3729_vm12 }
  0x85   :  { %v245_v49 = vld [vmem:[#allocation2 + $0x10] sm:$0xf] }
  0x86   :  { %v312_v50 = vld [vmem:[#allocation2 + $0x10] sm:$0xf] }
  0x87   :  { %491 = vrot.lane.b32.xlu0 %v469_v48, %s2426_s30  ;;  %v190_v51 = vld [vmem:[#allocation2 + $0x10] sm:$0xf] }
  0x88   :  { %279 = vrot.lane.b32.xlu1 %v245_v49, %s2427_s8  ;;  %v410_v52 = vld [vmem:[#allocation2 + $0x10] sm:$0xf] }
  0x89   :  { %v524_v54 = vld [vmem:[#allocation2 + $0x10] sm:$0xf] }
  0x8b   :  { %334 = vrot.lane.b32.xlu0 %v312_v50, %s2428_s9  ;;  %v2799_v50 = vadd.s32 1, %v72_v18 }
  0x8c   :  { %224 = vrot.lane.b32.xlu1 %v190_v51, %s2429_s10 }
  0x8f   :  { %448 = vrot.lane.b32.xlu0 %v410_v52, %s2430_s11 }
  0x90   :  { %271 = vrot.lane.b32.xlu1 %v243_v41, %s2427_s8 }
  0x93   :  { %149 = vrot.lane.b32.xlu0 %v243_v41, %s2425_s29 }
  0x94   :  { %369 = vrot.lane.b32.xlu1 %v243_v41, %s2424_s0 }
  0x97   :  { %216 = vrot.lane.b32.xlu0 %v243_v41, %s2429_s10 }
  0x98   :  { %326 = vrot.lane.b32.xlu1 %v243_v41, %s2428_s9 }
  0x9b   :  { %483 = vrot.lane.b32.xlu0 %v243_v41, %s2426_s30 }
  0x9c   :  { %538 = vrot.lane.b32.xlu1 %v243_v41, %s2431_s12 }
  0x9f   :  { %440 = vrot.lane.b32.xlu0 %v243_v41, %s2430_s11 }
  0xa0   :  { %153 = vrot.lane.b32.xlu1 %v45_v37, %s2425_s29 }
  0xa3   :  { %373 = vrot.lane.b32.xlu0 %v45_v37, %s2424_s0 }
  0xa4   :  { %275 = vrot.lane.b32.xlu1 %v45_v37, %s2427_s8 }
  0xa7   :  { %487 = vrot.lane.b32.xlu0 %v45_v37, %s2426_s30 }
  0xa8   :  { %220 = vrot.lane.b32.xlu1 %v45_v37, %s2429_s10 }
  0xab   :  { %330 = vrot.lane.b32.xlu0 %v45_v37, %s2428_s9 }
  0xac   :  { %151 = vrot.lane.b32.xlu1 %v269_v43, %s2425_s29 }
  0xaf   :  { %444 = vrot.lane.b32.xlu0 %v45_v37, %s2430_s11 }
  0xb0   :  { %371 = vrot.lane.b32.xlu1 %v269_v43, %s2424_s0 }
  0xb3   :  { %273 = vrot.lane.b32.xlu0 %v269_v43, %s2427_s8 }
  0xb4   :  { %485 = vrot.lane.b32.xlu1 %v269_v43, %s2426_s30 }
  0xb7   :  { %218 = vrot.lane.b32.xlu0 %v269_v43, %s2429_s10 }
  0xb8   :  { %328 = vrot.lane.b32.xlu1 %v269_v43, %s2428_s9 }
  0xbb   :  { %155 = vrot.lane.b32.xlu0 %v2563_v38, %s2425_s29 }
  0xbc   :  { %442 = vrot.lane.b32.xlu1 %v269_v43, %s2430_s11 }
  0xbf   :  { %277 = vrot.lane.b32.xlu0 %v2563_v38, %s2427_s8 }
  0xc0   :  { %542 = vrot.lane.b32.xlu1 %v45_v37, %s2431_s12  ;;  %v412_v37 = vadd.s32 1, %v2516_v21 }
  0xc2   :  { %vm416_vm8 = vcmp.ge.s32.totalorder %v412_v37, 0  ;;  %vm420_vm10 = vcmp.lt.s32.totalorder %v412_v37, 16 }
  0xc3   :  { %222 = vrot.lane.b32.xlu0 %v2563_v38, %s2429_s10 }
  0xc4   :  { %375 = vrot.lane.b32.xlu1 %v2563_v38, %s2424_s0 }
  0xc7   :  { %540 = vrot.lane.b32.xlu0 %v269_v43, %s2431_s12 }
  0xc8   :  { %489 = vrot.lane.b32.xlu1 %v2563_v38, %s2426_s30 }
  0xcb   :  { %544 = vrot.lane.b32.xlu0 %v2563_v38, %s2431_s12 }
  0xcc   :  { %332 = vrot.lane.b32.xlu1 %v2563_v38, %s2428_s9 }
  0xcf   :  { %601 = vperm.xlu0 %2337, %v598_v55  }
  0xd0   :  { %446 = vrot.lane.b32.xlu1 %v2563_v38, %s2430_s11 }
  0xd4   :  { %546 = vrot.lane.b32.xlu1 %v524_v54, %s2431_s12 }
  0xf5   :  { %v2630_v56 = vpop.permute.xlu0 %377 }
  0xf6   :  { %v2632_v57 = vpop.permute.xlu1 %157 }
  0xf9   :  { %v2634_v58 = vpop.permute.xlu0 %491 }
  0xfa   :  { %v2636_v59 = vpop.permute.xlu1 %279 }
  0xfd   :  { %v2638_v60 = vpop.permute.xlu0 %334 }
  0xfe   :  { %v2640_v61 = vpop.permute.xlu1 %224 }
 0x101   :  { %v2642_v62 = vpop.permute.xlu0 %448 }
 0x102   :  { %v2644_v63 = vpop.permute.xlu1 %271 }
 0x105   :  { %v150_v0 = vpop.permute.xlu0 %149 }
 0x106   :  { %v370_v1 = vpop.permute.xlu1 %369 }
 0x109   :  { %v2646_v2 = vpop.permute.xlu0 %216 }
 0x10a   :  { %v2648_v7 = vpop.permute.xlu1 %326 }
 0x10d   :  { %v2650_v9 = vpop.permute.xlu0 %483 }
 0x10e   :  { %v2652_v14 = vpop.permute.xlu1 %538 }
 0x111   :  { %v2654_v16 = vpop.permute.xlu0 %440 }
 0x112   :  { %v2656_v17 = vpop.permute.xlu1 %153 }
 0x115   :  { %v2658_v20 = vpop.permute.xlu0 %373 }
 0x116   :  { %v2660_v23 = vpop.permute.xlu1 %275 }
 0x119   :  { %v2666_v28 = vpop.permute.xlu0 %487 }
 0x11a   :  { %v2668_v29 = vpop.permute.xlu1 %220 }
 0x11d   :  { %v2684_v10 = vpop.permute.xlu0 %330 }
 0x11e   :  { %v152_v26 = vpop.permute.xlu1 %151 }
 0x11f   :  { %v160_v38 = vsel %vm3684_vm7, %v150_v0, %v152_v26  ;;  %v161_v39 = vsel %vm3684_vm7, %v152_v26, %v2656_v17  ;;  %vm2721_vm7 = vmand %vm2679_vm0, %vm3688_vm3  ;;  %vm252_vm3 = vcmp.lt.s32.totalorder %v2501_v11, 16 }
 0x120   :  { %v168_v41 = vsel %vm2539_vm15, %v160_v38, 0.0  ;;  %v169_v12 = vsel %vm2569_vm9, %v161_v39, 0.0  ;;  %vm2745_vm0 = vmand %vm416_vm8, %vm420_vm10  ;;  %vm3731_vm10 = vcmp.lt.s32.totalorder %v2664_v24, 16 }
 0x121   :  { %v176_v21 = vrot.slane %v168_v41, 4  ;;  %v177_v43 = vrot.slane %v169_v12, 4  ;;  %v2715_v45 = vpop.permute.xlu0 %444  ;;  %vm2771_vm8 = vmand %vm2539_vm15, %vm3731_vm10  ;;  %vm253_vm10 = vcmp.lt.s32.totalorder %v2507_v13, 16 }
 0x122   :  { %v372_v46 = vpop.permute.xlu1 %371 }
 0x123   :  { %184 = vst [vmem:[#allocation3] sm:$0xf0] %v176_v21  ;;  %185 = vst [vmem:[#allocation3 + $0x8] sm:$0xf0] %v177_v43  ;;  %v380_v48 = vsel %vm3693_vm4, %v370_v1, %v372_v46  ;;  %v381_v49 = vsel %vm3693_vm4, %v372_v46, %v2658_v20  ;;  %vm3696_vm4 = vcmask 777216  }
 0x124   :  { %v388_v51 = vsel %vm2703_vm14, %v380_v48, 0.0  ;;  %v389_v52 = vsel %vm2711_vm5, %v381_v49, 0.0  ;;  %vm3698_vm14 = vcmask 908288   ;;  %vm248_vm5 = vcmp.ge.s32.totalorder %v2501_v11, 0 }
 0x125   :  { %v396_v54 = vrot.slane %v388_v51, 4  ;;  %v397_v55 = vrot.slane %v389_v52, 4  ;;  %v274_v1 = vpop.permute.xlu0 %273 }
 0x126   :  { %v486_v26 = vpop.permute.xlu1 %485  ;;  %v282_v33 = vsel %vm3729_vm12, %v2644_v63, %v274_v1  ;;  %v283_v37 = vsel %vm3730_vm1, %v274_v1, %v2660_v23  ;;  %vm3737_vm12 = vcmp.ge.s32.totalorder %v2529_v27, 0  ;;  %vm249_vm1 = vcmp.ge.s32.totalorder %v2507_v13, 0 }
 0x127   :  { %404 = vst [vmem:[#allocation3 + $0x40] sm:$0xf0] %v396_v54  ;;  %405 = vst [vmem:[#allocation3 + $0x48] sm:$0xf0] %v397_v55  ;;  %v494_v38 = vsel %vm3696_vm4, %v2650_v9, %v486_v26  ;;  %v495_v39 = vsel %vm3696_vm4, %v486_v26, %v2666_v28  ;;  %v290_v41 = vsel %vm2721_vm7, %v282_v33, 0.0  ;;  %v291_v12 = vsel %vm2732_vm6, %v283_v37, 0.0 }
 0x128   :  { %v502_v42 = vsel %vm2741_vm11, %v494_v38, 0.0  ;;  %v503_v63 = vsel %vm2745_vm0, %v495_v39, 0.0  ;;  %v298_v21 = vrot.slane %v290_v41, 4  ;;  %v299_v43 = vrot.slane %v291_v12, 4  ;;  %vm2787_vm15 = vmand %vm2741_vm11, %vm3737_vm12 }
 0x129   :  { %v510_v44 = vrot.slane %v502_v42, 4  ;;  %v511_v46 = vrot.slane %v503_v63, 4  ;;  %vm3734_vm7 = vcmp.lt.s32.totalorder %v2672_v31, 16  ;;  %v219_v48 = vpop.permute.xlu0 %218  ;;  %vm3743_vm12 = vnez %v3712_v19 }
 0x12a   :  { %vm2779_vm6 = vmand %vm2569_vm9, %vm3734_vm7  ;;  %v329_v49 = vpop.permute.xlu1 %328  ;;  %306 = vst [vmem:[#allocation3 + $0x20] sm:$0xf0] %v298_v21  ;;  %v227_v27 = vsel %vm3699_vm13, %v2646_v2, %v219_v48  ;;  %v228_v51 = vsel %vm3699_vm13, %v219_v48, %v2668_v29  ;;  %vm3740_vm9 = vcmp.ge.s32.totalorder %v2550_v35, 0  ;;  %vm3744_vm4 = vnez %v3714_v36  ;;  %v567_v47 = vld [vmem:[#allocation3 + $0x8] sm:$0xff]  ;;  %v566_v32 = vld [vmem:[#allocation3] sm:$0xff] }
 0x12b   :  { %307 = vst [vmem:[#allocation3 + $0x28] sm:$0xf0] %v299_v43  ;;  %518 = vst [vmem:[#allocation3 + $0x60] sm:$0xf0] %v510_v44  ;;  %v337_v52 = vsel %vm3698_vm14, %v2648_v7, %v329_v49  ;;  %v338_v5 = vsel %vm3698_vm14, %v329_v49, %v2684_v10  ;;  %v235_v15 = vsel %vm2771_vm8, %v227_v27, 0.0  ;;  %v236_v18 = vsel %vm2779_vm6, %v228_v51, 0.0 }
 0x12c   :  { %519 = vst [vmem:[#allocation3 + $0x68] sm:$0xf0] %v511_v46  ;;  %vm2813_vm7 = vmand %vm2745_vm0, %vm3740_vm9  ;;  %v345_v2 = vsel %vm3743_vm12, %v337_v52, 0.0  ;;  %v346_v7 = vsel %vm3744_vm4, %v338_v5, 0.0  ;;  %v3747_v19 = vmov 0  ;;  %vm3702_vm4 = vcmp.lt.s32.totalorder %v2795_v40, 16 }
 0x12d   :  { %vm2829_vm9 = vmand %vm248_vm5, %vm252_vm3  ;;  %239 = vst [vmem:[#allocation3 + $0x20] sm:$0xf] %v235_v15  ;;  %v156_v54 = vpop.permute.xlu0 %155  ;;  %vm3700_vm3 = vcmp.lt.s32.totalorder %v2799_v50, 16  ;;  %v413_v55 = vadd.s32 1, %v2501_v11  ;;  %v414_v1 = vadd.s32 1, %v2507_v13  ;;  %vm3749_vm5 = vcmask 1039360  }
 0x12e   :  { %240 = vst [vmem:[#allocation3 + $0x28] sm:$0xf] %v236_v18  ;;  %349 = vst [vmem:[#allocation3 + $0x40] sm:$0xf] %v345_v2  ;;  %v443_v36 = vpop.permute.xlu1 %442  ;;  %v162_v37 = vsel %vm3749_vm5, %v2656_v17, %v156_v54  ;;  %vm3754_vm12 = vnez %v3704_v30 }
 0x12f   :  { %350 = vst [vmem:[#allocation3 + $0x48] sm:$0xf] %v346_v7  ;;  %vm2837_vm8 = vmand %vm249_vm1, %vm253_vm10  ;;  %v451_v26 = vsel %vm3697_vm2, %v2654_v16, %v443_v36  ;;  %v452_v33 = vsel %vm3697_vm2, %v443_v36, %v2715_v45  ;;  %vm3751_vm1 = vcmp.ge.s32.totalorder %v2520_v22, 0  ;;  %v170_v17 = vsel %vm3754_vm12, %v162_v37, 0.0 }
 0x130   :  { %v3748_v19 = vsel %vm2837_vm8, 4294967295, %v3747_v19  ;;  %vm3750_vm6 = vmmov %vm3749_vm5  ;;  %v459_v13 = vsel %vm2787_vm15, %v451_v26, 0.0  ;;  %v460_v16 = vsel %vm2813_vm7, %v452_v33, 0.0  ;;  %vm3755_vm5 = vnez %v3708_v34 }
 0x131   :  { %v163_v38 = vsel %vm3750_vm6, %v156_v54, %v2632_v57  ;;  %vm2857_vm10 = vmand %vm2829_vm9, %vm3751_vm1  ;;  %vm3756_vm6 = vcmp.ge.s32.totalorder %v2524_v25, 0  ;;  %463 = vst [vmem:[#allocation3 + $0x60] sm:$0xf] %v459_v13  ;;  %v178_v41 = vrot.slane %v170_v17, 4  ;;  %v278_v9 = vpop.permute.xlu0 %277  ;;  %vm3763_vm2 = vcmask 916480  }
 0x132   :  { %v171_v57 = vsel %vm3755_vm5, %v163_v38, 0.0  ;;  %vm2873_vm1 = vmand %vm2837_vm8, %vm3756_vm6  ;;  %464 = vst [vmem:[#allocation3 + $0x68] sm:$0xf] %v460_v16  ;;  %v2885_v63 = vpop.permute.xlu1 %542  ;;  %vm417_vm6 = vcmp.ge.s32.totalorder %v413_v55, 0  ;;  %v284_v43 = vsel %vm3763_vm2, %v2660_v23, %v278_v9 }
 0x133   :  { %v179_v12 = vrot.slane %v171_v57, 4  ;;  %vm2881_vm15 = vmand %vm2829_vm9, %vm3702_vm4  ;;  %186 = vst [vmem:[#allocation3 + $0x10] sm:$0xf0] %v178_v41  ;;  %v292_v48 = vsel %vm2857_vm10, %v284_v43, 0.0 }
 0x134   :  { %vm2891_vm7 = vmand %vm2837_vm8, %vm3700_vm3  ;;  %vm421_vm8 = vcmp.lt.s32.totalorder %v413_v55, 16  ;;  %v300_v27 = vrot.slane %v292_v48, 4 }
 0x135   :  { %187 = vst [vmem:[#allocation3 + $0x18] sm:$0xf0] %v179_v12  ;;  %vm3764_vm14 = vmmov %vm3763_vm2  ;;  %v571_v49 = vld [vmem:[#allocation3 + $0x28] sm:$0xff]  ;;  %vm422_vm2 = vcmp.lt.s32.totalorder %v414_v1, 16  ;;  %v223_v15 = vpop.permute.xlu0 %222  ;;  %v574_v26 = vld [vmem:[#allocation3 + $0x40] sm:$0xff] }
 0x136   :  { %v285_v44 = vsel %vm3764_vm14, %v278_v9, %v2636_v59  ;;  %vm2903_vm13 = vmand %vm3754_vm12, %vm3702_vm4  ;;  %v570_v59 = vld [vmem:[#allocation3 + $0x20] sm:$0xff]  ;;  %vm3767_vm14 = vcmp.lt.s32.totalorder %v2799_v50, 16  ;;  %v587_v52 = vpack.c.bf16 %v571_v49, %v567_v47  ;;  %v376_v6 = vpop.permute.xlu1 %375  ;;  %308 = vst [vmem:[#allocation3 + $0x30] sm:$0xf0] %v300_v27  ;;  %vm3772_vm4 = vcmask 900096   ;;  %v575_v55 = vld [vmem:[#allocation3 + $0x48] sm:$0xff] }
 0x137   :  { %v293_v23 = vsel %vm2873_vm1, %v285_v44, 0.0  ;;  %vm2915_vm12 = vmand %vm3755_vm5, %vm3767_vm14  ;;  %v586_v5 = vpack.c.bf16 %v570_v59, %v566_v32  ;;  %vm548_vm1 = vcmask 769024   ;;  %v382_v2 = vsel %vm3772_vm4, %v2658_v20, %v376_v6 }
 0x138   :  { %v301_v51 = vrot.slane %v293_v23, 4  ;;  %vm2920_vm10 = vmand %vm417_vm6, %vm421_vm8  ;;  %vm3774_vm14 = vcmask 1031168   ;;  %621 = vmatprep.subr.bf16.mxu0 %v587_v52  ;;  %vm3776_vm8 = vcmp.ge.s32.totalorder %v414_v1, 0  ;;  %v390_v20 = vsel %vm2881_vm15, %v382_v2, 0.0  ;;  %v578_v37 = vld [vmem:[#allocation3 + $0x60] sm:$0xff] }
 0x139   :  { %vm3773_vm5 = vmmov %vm3772_vm4  ;;  %v229_v7 = vsel %vm3774_vm14, %v2668_v29, %v223_v15  ;;  %622 = vmatpush1.bf16.msra.mxu0 %v586_v5  ;;  %vm3779_vm4 = vcmp.lt.s32.totalorder %v2664_v24, 16  ;;  %v579_v33 = vld [vmem:[#allocation3 + $0x68] sm:$0xff]  ;;  %v398_v38 = vrot.slane %v390_v20, 4  ;;  %v590_v53 = vpack.c.bf16 %v578_v37, %v574_v26  ;;  %v541_v17 = vpop.permute.xlu0 %540 }
 0x13a   :  { %309 = vst [vmem:[#allocation3 + $0x38] sm:$0xf0] %v301_v51  ;;  %v383_v34 = vsel %vm3773_vm5, %v376_v6, %v2630_v56  ;;  %vm3775_vm3 = vmmov %vm3774_vm14  ;;  %v237_v29 = vsel %vm2903_vm13, %v229_v7, 0.0  ;;  %vm3782_vm13 = vcmp.lt.s32.totalorder %v2672_v31, 16  ;;  %v591_v24 = vpack.c.bf16 %v579_v33, %v575_v55  ;;  %v490_v16 = vpop.permute.xlu1 %489  ;;  %v565_v2 = vld [vmem:[%s3675_s1] sm:$0xf] }
 0x13b   :  { %v230_v36 = vsel %vm3775_vm3, %v223_v15, %v2640_v61  ;;  %vm2934_vm6 = vmand %vm3776_vm8, %vm422_vm2  ;;  %v391_v56 = vsel %vm2891_vm7, %v383_v34, 0.0  ;;  %241 = vst [vmem:[#allocation3 + $0x30] sm:$0xf] %v237_v29  ;;  %v549_v31 = vsel %vm548_vm1, %v2652_v14, %v541_v17  ;;  %v550_v0 = vsel %vm548_vm1, %v541_v17, %v2885_v63  ;;  %s2434_s1 = smov 9  }
 0x13c   :  { %v238_v61 = vsel %vm2915_vm12, %v230_v36, 0.0  ;;  %vm2950_vm3 = vmand %vm2741_vm11, %vm3779_vm4  ;;  %v399_v11 = vrot.slane %v391_v56, 4  ;;  %406 = vst [vmem:[#allocation3 + $0x50] sm:$0xf0] %v398_v38  ;;  %vm3785_vm11 = vcmask 777216   ;;  %623 = vmatprep.subr.bf16.mxu0 %v591_v24  ;;  %vm3790_vm12 = vcmask 908288  }
 0x13d   :  { %242 = vst [vmem:[#allocation3 + $0x38] sm:$0xf] %v238_v61  ;;  %vm2958_vm15 = vmand %vm2745_vm0, %vm3782_vm13  ;;  %v496_v57 = vsel %vm3785_vm11, %v2666_v28, %v490_v16  ;;  %v557_v42 = vsel %vm2950_vm3, %v549_v31, 0.0  ;;  %624 = vmatpush1.bf16.msra.mxu0 %v590_v53  ;;  %vm3787_vm0 = vcmp.lt.s32.totalorder %v2795_v40, 16  ;;  %v545_v43 = vpop.permute.xlu0 %544  ;;  %vm3792_vm14 = vcmp.ge.s32.totalorder %v2520_v22, 0  ;;  %v569_v48 = vld [vmem:[#allocation3 + $0x18] sm:$0xff] }
 0x13e   :  { %407 = vst [vmem:[#allocation3 + $0x58] sm:$0xf0] %v399_v11  ;;  %vm3786_vm7 = vmmov %vm3785_vm11  ;;  %v504_v41 = vsel %vm2920_vm10, %v496_v57, 0.0  ;;  %v558_v28 = vsel %vm2958_vm15, %v550_v0, 0.0  ;;  %v333_v21 = vpop.permute.xlu1 %332  ;;  %v551_v47 = vsel %vm548_vm1, %v2885_v63, %v545_v43  ;;  %vm3795_vm4 = vnez %v3748_v19  ;;  %v568_v63 = vld [vmem:[#allocation3 + $0x10] sm:$0xff] }
 0x13f   :  { %v497_v39 = vsel %vm3786_vm7, %v490_v16, %v2634_v58  ;;  %v512_v58 = vrot.slane %v504_v41, 4  ;;  %561 = vst [vmem:[#allocation3 + $0x80] sm:$0xf] %v557_v42  ;;  %562 = vst [vmem:[#allocation3 + $0x88] sm:$0xf] %v558_v28  ;;  %v339_v44 = vsel %vm3790_vm12, %v2684_v10, %v333_v21  ;;  %vm608_vm15 = vcmask 1041408  }
 0x140   :  { %v505_v12 = vsel %vm2934_vm6, %v497_v39, 0.0  ;;  %vm2982_vm2 = vmand %vm2920_vm10, %vm3787_vm0  ;;  %v347_v23 = vsel %vm2829_vm9, %v339_v44, 0.0  ;;  %vm3797_vm9 = vcmask 785408   ;;  %vm3799_vm11 = vcmp.lt.s32.totalorder %v2799_v50, 16 }
 0x141   :  { %v513_v9 = vrot.slane %v505_v12, 4  ;;  %520 = vst [vmem:[#allocation3 + $0x70] sm:$0xf0] %v512_v58  ;;  %vm3791_vm5 = vmmov %vm3790_vm12  ;;  %vm604_vm0 = vcmask 293888   ;;  %v3049_v58 = vld [vmem:[#allocation4 + $0x20] sm:$0xff]  ;;  %v842_v14 = vshra.s32 %v2487_v4, 6 }
 0x142   :  { %v340_v46 = vsel %vm3791_vm5, %v333_v21, %v2638_v60  ;;  %vm2996_vm8 = vmand %vm2920_vm10, %vm3792_vm14  ;;  %v559_v60 = vsel %vm2982_vm2, %v551_v47, 0.0  ;;  %v572_v32 = vld [vmem:[#allocation3 + $0x30] sm:$0xff]  ;;  %351 = vst [vmem:[#allocation3 + $0x50] sm:$0xf] %v347_v23  ;;  %vm3796_vm10 = vcmp.ge.s32.totalorder %v2524_v25, 0  ;;  %v447_v59 = vpop.permute.xlu1 %446  ;;  %v844_v21 = vshra.s32 %v2487_v4, 3 }
 0x143   :  { %521 = vst [vmem:[#allocation3 + $0x78] sm:$0xf0] %v513_v9  ;;  %v348_v10 = vsel %vm3795_vm4, %v340_v46, 0.0  ;;  %563 = vst [vmem:[#allocation3 + $0x90] sm:$0xf] %v559_v60  ;;  %v588_v35 = vpack.c.bf16 %v572_v32, %v568_v63  ;;  %v453_v19 = vsel %vm3797_vm9, %v2715_v45, %v447_v59  ;;  %v3061_v44 = vand.u32 7, %v2487_v4 }
 0x144   :  { %v573_v49 = vld [vmem:[#allocation3 + $0x38] sm:$0xff]  ;;  %352 = vst [vmem:[#allocation3 + $0x58] sm:$0xf] %v348_v10  ;;  %vm430_vm3 = vmand %vm2934_vm6, %vm3796_vm10  ;;  %v461_v51 = vsel %vm2996_vm8, %v453_v19, 0.0  ;;  %v843_v46 = vshll.u32 %v842_v14, 8  ;;  %v3064_v47 = vand.u32 7, %v844_v21 }
 0x145   :  { %v589_v22 = vpack.c.bf16 %v573_v49, %v569_v48  ;;  %vm3798_vm13 = vmmov %vm3797_vm9  ;;  %465 = vst [vmem:[#allocation3 + $0x70] sm:$0xf] %v461_v51  ;;  %v849_v48 = vshll.u32 %v3061_v44, 1 }
 0x146   :  { %v454_v27 = vsel %vm3798_vm13, %v447_v59, %v2642_v62  ;;  %v583_v25 = vld [vmem:[#allocation3 + $0x88] sm:$0xf]  ;;  %v582_v52 = vld [vmem:[#allocation3 + $0x80] sm:$0xf]  ;;  %vm532_vm7 = vmand %vm2934_vm6, %vm3799_vm11  ;;  %v547_v6 = vpop.permute.xlu1 %546  ;;  %v846_v40 = vshll.u32 %v3064_v47, 5 }
 0x147   :  { %662 = vmatprep.subr.bf16.mxu1 %v589_v22  ;;  %v462_v30 = vsel %vm430_vm3, %v454_v27, 0.0  ;;  %v595_v45 = vpack.c.bf16 %v583_v25, %v583_v25  ;;  %v594_v5 = vpack.c.bf16 %v582_v52, %v582_v52  ;;  %v552_v62 = vsel %vm548_vm1, %v545_v43, %v547_v6 }
 0x148   :  { %663 = vmatpush1.bf16.msra.mxu1 %v588_v35  ;;  %466 = vst [vmem:[#allocation3 + $0x78] sm:$0xf] %v462_v30  ;;  %v560_v18 = vsel %vm532_vm7, %v552_v62, 0.0  ;;  %v3058_v43 = vshrl.u32 %v56_v3, 7  ;;  %v847_v60 = vadd.s32 %v846_v40, %v843_v46 }
 0x149   :  { %1868 = vmatprep.subr.msk.bf16.mxu0 %vm608_vm15, %v595_v45  ;;  %v610_v15 = vsel %vm608_vm15, %v594_v5, 0  ;;  %564 = vst [vmem:[#allocation3 + $0x98] sm:$0xf] %v560_v18  ;;  %v576_v34 = vld [vmem:[#allocation3 + $0x50] sm:$0xff]  ;;  %v2433_v5 = vmov 1.0|1.0  }
 0x14a   :  { %626 = vmatpush1.bf16.msra.mxu0 %v610_v15  ;;  %v584_v54 = vld [vmem:[#allocation3 + $0x90] sm:$0xf]  ;;  %v826_v23 = vadd.s32 384, %v3058_v43  ;;  %v827_v10 = vadd.s32 392, %v3058_v43  ;;  %v794_v3 = vadd.s32 128, %v3058_v43  ;;  %v795_v49 = vadd.s32 136, %v3058_v43 }
 0x14b   :  { %v577_v50 = vld [vmem:[#allocation3 + $0x58] sm:$0xff]  ;;  %v596_v20 = vpack.c.bf16 %v584_v54, %v584_v54  ;;  %v810_v63 = vadd.s32 256, %v3058_v43  ;;  %v811_v32 = vadd.s32 264, %v3058_v43  ;;  %v3075_v22 = vadd.s32 8, %v3058_v43 }
 0x14c   :  { %v580_v36 = vld [vmem:[#allocation3 + $0x70] sm:$0xff]  ;;  %v828_v35 = vadd.s32 400, %v3058_v43  ;;  %v3078_v59 = vadd.s32 %v849_v48, %v847_v60  ;;  %v829_v19 = vadd.s32 408, %v3058_v43  ;;  %v796_v27 = vadd.s32 144, %v3058_v43 }
 0x14d   :  { %1869 = vmatmul.mubr.msk.bf16.vlgmr.msra.gmra.mrb[0].mxu0 %vm604_vm0, %v565_v2  ;;  %v592_v26 = vpack.c.bf16 %v580_v36, %v576_v34  ;;  %v616_v61 = vsel %vm608_vm15, %v596_v20, 0  ;;  %v797_v51 = vadd.s32 152, %v3058_v43  ;;  %v812_v30 = vadd.s32 272, %v3058_v43 }
 0x14e   :  { %v602_v1 = vpop.permute.xlu0 %601  ;;  %v813_v25 = vadd.s32 280, %v3058_v43  ;;  %v3086_v52 = vadd.s32 16, %v3058_v43  ;;  %v3089_v45 = vadd.s32 24, %v3058_v43  ;;  %vm899_vm1 = vcmp.eq.s32.totalorder %v826_v23, %v3078_v59 }
 0x14f   :  { %v581_v7 = vld [vmem:[#allocation3 + $0x78] sm:$0xff]  ;;  %vm900_vm6 = vcmp.eq.s32.totalorder %v827_v10, %v3078_v59  ;;  %vm867_vm2 = vcmp.eq.s32.totalorder %v794_v3, %v3078_v59  ;;  %vm868_vm12 = vcmp.eq.s32.totalorder %v795_v49, %v3078_v59  ;;  %vm883_vm14 = vcmp.eq.s32.totalorder %v810_v63, %v3078_v59 }
 0x150   :  { %v593_v55 = vpack.c.bf16 %v581_v7, %v577_v50  ;;  %v585_v56 = vld [vmem:[#allocation3 + $0x98] sm:$0xf]  ;;  %vm2248_vm5 = vmpackc.low %vm900_vm6, %vm899_vm1  ;;  %vm884_vm8 = vcmp.eq.s32.totalorder %v811_v32, %v3078_v59  ;;  %vm851_vm4 = vcmp.eq.s32.totalorder %v3058_v43, %v3078_v59  ;;  %vm852_vm10 = vcmp.eq.s32.totalorder %v3075_v22, %v3078_v59 }
 0x151   :  { %v597_v29 = vpack.c.bf16 %v585_v56, %v585_v56  ;;  %vm2216_vm3 = vmpackc.low %vm868_vm12, %vm867_vm2  ;;  %vm901_vm9 = vcmp.eq.s32.totalorder %v828_v35, %v3078_v59  ;;  %vm902_vm13 = vcmp.eq.s32.totalorder %v829_v19, %v3078_v59  ;;  %v830_v6 = vadd.s32 416, %v3058_v43 }
 0x152   :  { %664 = vmatprep.subr.bf16.mxu1 %v593_v55  ;;  %v831_v62 = vadd.s32 424, %v3058_v43  ;;  %2217 = vmatprep.subr.msk.bf16.mxu0 %vm2216_vm3, %v2433_v5  ;;  %vm869_vm11 = vcmp.eq.s32.totalorder %v796_v27, %v3078_v59  ;;  %vm870_vm7 = vcmp.eq.s32.totalorder %v797_v51, %v3078_v59  ;;  %v798_v15 = vadd.s32 160, %v3058_v43  ;;  %vm2252_vm2 = vmpackc.low %vm902_vm13, %vm901_vm9 }
 0x153   :  { %665 = vmatpush1.bf16.msra.mxu1 %v592_v26  ;;  %v799_v18 = vadd.s32 168, %v3058_v43  ;;  %vm885_vm1 = vcmp.eq.s32.totalorder %v812_v30, %v3078_v59  ;;  %vm886_vm6 = vcmp.eq.s32.totalorder %v813_v25, %v3078_v59  ;;  %v815_v50 = vadd.s32 296, %v3058_v43 }
 0x154   :  { %1870 = vmatprep.subr.msk.bf16.mxu1 %vm608_vm15, %v597_v29  ;;  %vm2250_vm15 = vmpackc.low %vm884_vm8, %vm883_vm14  ;;  %vm853_vm12 = vcmp.eq.s32.totalorder %v3086_v52, %v3078_v59  ;;  %v3132_v34 = vadd.s32 32, %v3058_v43  ;;  %v3135_v7 = vadd.s32 40, %v3058_v43  ;;  %vm903_vm8 = vcmp.eq.s32.totalorder %v830_v6, %v3078_v59 }
 0x155   :  { %vm2220_vm14 = vmpackc.low %vm870_vm7, %vm869_vm11  ;;  %v832_v36 = vadd.s32 432, %v3058_v43  ;;  %v833_v54 = vadd.s32 440, %v3058_v43  ;;  %vm871_vm3 = vcmp.eq.s32.totalorder %v798_v15, %v3078_v59  ;;  %vm872_vm9 = vcmp.eq.s32.totalorder %v799_v18, %v3078_v59 }
 0x156   :  { %v800_v55 = vadd.s32 176, %v3058_v43  ;;  %v801_v26 = vadd.s32 184, %v3058_v43  ;;  %vm888_vm11 = vcmp.eq.s32.totalorder %v815_v50, %v3078_v59  ;;  %v816_v20 = vadd.s32 304, %v3058_v43 }
 0x157   :  { %667 = vmatpush1.bf16.msra.mxu1 %v616_v61  ;;  %v817_v56 = vadd.s32 312, %v3058_v43  ;;  %v3176_v29 = vadd.s32 48, %v3058_v43  ;;  %v3179_v61 = vadd.s32 56, %v3058_v43  ;;  %v805_v14 = vadd.s32 216, %v3058_v43 }
 0x158   :  { %2249 = vmatprep.subr.msk.bf16.mxu1 %vm2248_vm5, %v2433_v5  ;;  %vm854_vm5 = vcmp.eq.s32.totalorder %v3089_v45, %v3078_v59  ;;  %v820_v21 = vadd.s32 336, %v3058_v43  ;;  %v821_v46 = vadd.s32 344, %v3058_v43  ;;  %v3264_v40 = vadd.s32 80, %v3058_v43 }
 0x159   :  { %vm2222_vm13 = vmpackc.low %vm854_vm5, %vm853_vm12  ;;  %vm906_vm12 = vcmp.eq.s32.totalorder %v833_v54, %v3078_v59  ;;  %v3267_v48 = vadd.s32 88, %v3058_v43  ;;  %v838_v23 = vadd.s32 480, %v3058_v43  ;;  %v839_v10 = vadd.s32 488, %v3058_v43 }
 0x15a   :  { %1871 = vmatmul.mubr.msk.bf16.vlgmr.msra.gmra.mrb[0].mxu1 %vm604_vm0, %v565_v2  ;;  %vm2218_vm0 = vmpackc.low %vm852_vm10, %vm851_vm4  ;;  %v814_v2 = vadd.s32 288, %v3058_v43  ;;  %vm904_vm4 = vcmp.eq.s32.totalorder %v831_v62, %v3078_v59  ;;  %v806_v60 = vadd.s32 224, %v3058_v43  ;;  %v807_v3 = vadd.s32 232, %v3058_v43 }
 0x15b   :  { %2251 = vmatpush3.bf16.msk.msra.mxu1 %vm2250_vm15, %v2433_v5  ;;  %2219 = vmatpush3.bf16.msk.msra.mxu0 %vm2218_vm0, %v2433_v5  ;;  %vm2254_vm10 = vmpackc.low %vm886_vm6, %vm885_vm1  ;;  %vm855_vm0 = vcmp.eq.s32.totalorder %v3132_v34, %v3078_v59  ;;  %vm856_vm1 = vcmp.eq.s32.totalorder %v3135_v7, %v3078_v59  ;;  %v822_v49 = vadd.s32 352, %v3058_v43  ;;  %v823_v63 = vadd.s32 360, %v3058_v43 }
 0x15c   :  { %2253 = vmatprep.subr.msk.bf16.mxu1 %vm2252_vm2, %v2433_v5  ;;  %2221 = vmatprep.subr.msk.bf16.mxu0 %vm2220_vm14, %v2433_v5  ;;  %vm887_vm15 = vcmp.eq.s32.totalorder %v814_v2, %v3078_v59  ;;  %vm2256_vm7 = vmpackc.low %vm904_vm4, %vm903_vm8  ;;  %vm905_vm2 = vcmp.eq.s32.totalorder %v832_v36, %v3078_v59  ;;  %vm873_vm14 = vcmp.eq.s32.totalorder %v800_v55, %v3078_v59  ;;  %v3323_v32 = vadd.s32 96, %v3058_v43 }
 0x15d   :  { %vm2224_vm6 = vmpackc.low %vm872_vm9, %vm871_vm3  ;;  %vm874_vm8 = vcmp.eq.s32.totalorder %v801_v26, %v3078_v59  ;;  %vm890_vm3 = vcmp.eq.s32.totalorder %v817_v56, %v3078_v59  ;;  %v3326_v35 = vadd.s32 104, %v3058_v43  ;;  %v840_v19 = vadd.s32 496, %v3058_v43 }
 0x15e   :  { %vm2258_vm5 = vmpackc.low %vm888_vm11, %vm887_vm15  ;;  %vm858_vm15 = vcmp.eq.s32.totalorder %v3179_v61, %v3078_v59  ;;  %v841_v27 = vadd.s32 504, %v3058_v43  ;;  %v808_v30 = vadd.s32 240, %v3058_v43  ;;  %v809_v25 = vadd.s32 248, %v3058_v43 }
 0x15f   :  { %2255 = vmatpush3.bf16.msk.msra.mxu1 %vm2254_vm10, %v2433_v5  ;;  %2223 = vmatpush3.bf16.msk.msra.mxu0 %vm2222_vm13, %v2433_v5  ;;  %vm2226_vm4 = vmpackc.low %vm856_vm1, %vm855_vm0  ;;  %vm889_vm10 = vcmp.eq.s32.totalorder %v816_v20, %v3078_v59  ;;  %vm857_vm13 = vcmp.eq.s32.totalorder %v3176_v29, %v3078_v59  ;;  %v824_v6 = vadd.s32 368, %v3058_v43  ;;  %v825_v62 = vadd.s32 376, %v3058_v43 }
 0x160   :  { %2257 = vmatprep.subr.msk.bf16.mxu1 %vm2256_vm7, %v2433_v5  ;;  %2225 = vmatprep.subr.msk.bf16.mxu0 %vm2224_vm6, %v2433_v5  ;;  %vm2260_vm9 = vmpackc.low %vm906_vm12, %vm905_vm2  ;;  %v3347_v2 = vadd.s32 112, %v3058_v43  ;;  %v3350_v50 = vadd.s32 120, %v3058_v43 }
 0x161   :  { %vm2228_vm11 = vmpackc.low %vm874_vm8, %vm873_vm14 }
 0x162   :  { %vm2262_vm1 = vmpackc.low %vm890_vm3, %vm889_vm10 }
 0x163   :  { %2259 = vmatpush3.bf16.msk.msra.mxu1 %vm2258_vm5, %v2433_v5  ;;  %2227 = vmatpush3.bf16.msk.msra.mxu0 %vm2226_vm4, %v2433_v5  ;;  %vm2230_vm12 = vmpackc.low %vm858_vm15, %vm857_vm13 }
 0x164   :  { %2261 = vmatprep.subr.msk.bf16.mxu1 %vm2260_vm9, %v2433_v5  ;;  %2229 = vmatprep.subr.msk.bf16.mxu0 %vm2228_vm11, %v2433_v5 }
 0x167   :  { %2263 = vmatpush3.bf16.msk.msra.mxu1 %vm2262_vm1, %v2433_v5  ;;  %2231 = vmatpush3.bf16.msk.msra.mxu0 %vm2230_vm12, %v2433_v5  ;;  %vm893_vm1 = vcmp.eq.s32.totalorder %v820_v21, %v3078_v59  ;;  %vm861_vm12 = vcmp.eq.s32.totalorder %v3264_v40, %v3078_v59 }
 0x220   :  { %v655_v33 = vpop.f32.mrb[0].mxu0 }
 0x221   :  { %v657_v37 = vpop.f32.mrb[1].mxu0  ;;  %v3030_v38 = vadd.f32 %v655_v33, %v602_v1  ;;  %v835_v33 = vadd.s32 456, %v3058_v43 }
 0x222   :  { %v659_v11 = vpop.f32.mrb[2].mxu0  ;;  %v3032_v13 = vadd.f32 %v657_v37, %v602_v1  ;;  %v802_v37 = vadd.s32 192, %v3058_v43 }
 0x223   :  { %v660_v24 = vpop.f32.mrb[3].mxu0  ;;  %v703_v53 = vmax.f32 %v3030_v38, 0.0  ;;  %v803_v11 = vadd.s32 200, %v3058_v43  ;;  %vm908_vm0 = vcmp.eq.s32.totalorder %v835_v33, %v3078_v59 }
 0x224   :  { %v704_v16 = vmax.f32 %v3032_v13, 0.0  ;;  %v818_v24 = vadd.s32 320, %v3058_v43  ;;  %vm875_vm6 = vcmp.eq.s32.totalorder %v802_v37, %v3078_v59 }
 0x225   :  { %726 = vrot.lane.b32.xlu0 %v703_v53, %s2425_s29  ;;  %vm876_vm2 = vcmp.eq.s32.totalorder %v803_v11, %v3078_v59 }
 0x226   :  { %vm891_vm5 = vcmp.eq.s32.totalorder %v818_v24, %v3078_v59  ;;  %vm2232_vm3 = vmpackc.low %vm876_vm2, %vm875_vm6  ;;  %vm894_vm6 = vcmp.eq.s32.totalorder %v821_v46, %v3078_v59  ;;  %v3369_v24 = vld [vmem:[#allocation5] sm:$0xff] }
 0x227   :  { %2233 = vmatprep.subr.msk.bf16.mxu0 %vm2232_vm3, %v2433_v5  ;;  %vm879_vm3 = vcmp.eq.s32.totalorder %v806_v60, %v3078_v59 }
 0x22d   :  { %v696_v17 = vpop.f32.mrb[0].mxu1 }
 0x22e   :  { %v3039_v57 = vadd.f32 %v696_v17, %v602_v1  ;;  %v698_v39 = vpop.f32.mrb[1].mxu1  ;;  %v819_v17 = vadd.s32 328, %v3058_v43 }
 0x22f   :  { %v3041_v31 = vadd.f32 %v698_v39, %v602_v1  ;;  %v700_v0 = vpop.f32.mrb[2].mxu1  ;;  %v834_v1 = vadd.s32 448, %v3058_v43  ;;  %v3220_v39 = vadd.s32 64, %v3058_v43 }
 0x230   :  { %v705_v41 = vmax.f32 %v3039_v57, 0.0  ;;  %v701_v12 = vpop.f32.mrb[3].mxu1  ;;  %v3223_v0 = vadd.s32 72, %v3058_v43  ;;  %vm892_vm14 = vcmp.eq.s32.totalorder %v819_v17, %v3078_v59 }
 0x231   :  { %v706_v42 = vmax.f32 %v3041_v31, 0.0  ;;  %vm907_vm7 = vcmp.eq.s32.totalorder %v834_v1, %v3078_v59  ;;  %v836_v12 = vadd.s32 464, %v3058_v43  ;;  %vm859_vm4 = vcmp.eq.s32.totalorder %v3220_v39, %v3078_v59  ;;  %vm2266_vm15 = vmpackc.low %vm892_vm14, %vm891_vm5 }
 0x232   :  { %v2338_v28 = vpack.i.bf16 %v705_v41, %v704_v16  ;;  %vm2264_vm8 = vmpackc.low %vm908_vm0, %vm907_vm7  ;;  %vm860_vm10 = vcmp.eq.s32.totalorder %v3223_v0, %v3078_v59  ;;  %vm878_vm7 = vcmp.eq.s32.totalorder %v805_v14, %v3078_v59  ;;  %vm862_vm5 = vcmp.eq.s32.totalorder %v3267_v48, %v3078_v59 }
 0x233   :  { %v2343_v9 = vpack.i.bf16 %v3049_v58, %v706_v42  ;;  %2265 = vmatprep.subr.msk.bf16.mxu1 %vm2264_vm8, %v2433_v5  ;;  %vm909_vm9 = vcmp.eq.s32.totalorder %v836_v12, %v3078_v59  ;;  %vm2234_vm0 = vmpackc.low %vm860_vm10, %vm859_vm4  ;;  %vm911_vm8 = vcmp.eq.s32.totalorder %v838_v23, %v3078_v59  ;;  %vm912_vm4 = vcmp.eq.s32.totalorder %v839_v10, %v3078_v59 }
 0x234   :  { %2339 = vrot.lane.b32.xlu1 %v2338_v28, %s2425_s29  ;;  %v837_v28 = vadd.s32 472, %v3058_v43  ;;  %2267 = vmatpush3.bf16.msk.msra.mxu1 %vm2266_vm15, %v2433_v5  ;;  %vm2270_vm10 = vmpackc.low %vm894_vm6, %vm893_vm1  ;;  %vm895_vm15 = vcmp.eq.s32.totalorder %v822_v49, %v3078_v59  ;;  %vm863_vm6 = vcmp.eq.s32.totalorder %v3323_v32, %v3078_v59 }
 0x235   :  { %2235 = vmatpush3.bf16.msk.msra.mxu0 %vm2234_vm0, %v2433_v5  ;;  %vm896_vm0 = vcmp.eq.s32.totalorder %v823_v63, %v3078_v59 }
 0x236   :  { %vm910_vm13 = vcmp.eq.s32.totalorder %v837_v28, %v3078_v59  ;;  %vm2274_vm1 = vmpackc.low %vm896_vm0, %vm895_vm15  ;;  %vm3800_vm15 = vcmask 1039360  }
 0x237   :  { %vm2268_vm2 = vmpackc.low %vm910_vm13, %vm909_vm9  ;;  %vm880_vm9 = vcmp.eq.s32.totalorder %v807_v3, %v3078_v59 }
 0x238   :  { %2344 = vrot.lane.b32.xlu1 %v2343_v9, %s2425_s29  ;;  %v804_v9 = vadd.s32 208, %v3058_v43  ;;  %2269 = vmatprep.subr.msk.bf16.mxu1 %vm2268_vm2, %v2433_v5  ;;  %vm2238_vm13 = vmpackc.low %vm862_vm5, %vm861_vm12  ;;  %vm864_vm2 = vcmp.eq.s32.totalorder %v3326_v35, %v3078_v59  ;;  %vm913_vm5 = vcmp.eq.s32.totalorder %v840_v19, %v3078_v59 }
 0x239   :  { %2271 = vmatpush3.bf16.msk.msra.mxu1 %vm2270_vm10, %v2433_v5  ;;  %vm2242_vm12 = vmpackc.low %vm864_vm2, %vm863_vm6  ;;  %vm882_vm10 = vcmp.eq.s32.totalorder %v809_v25, %v3078_v59 }
 0x23a   :  { %vm877_vm11 = vcmp.eq.s32.totalorder %v804_v9, %v3078_v59  ;;  %vm3801_vm6 = vmmov %vm3800_vm15 }
 0x23b   :  { %vm2236_vm14 = vmpackc.low %vm878_vm7, %vm877_vm11 }
 0x23c   :  { %2237 = vmatprep.subr.msk.bf16.mxu0 %vm2236_vm14, %v2433_v5  ;;  %vm2272_vm11 = vmpackc.low %vm912_vm4, %vm911_vm8  ;;  %vm914_vm14 = vcmp.eq.s32.totalorder %v841_v27, %v3078_v59  ;;  %vm881_vm4 = vcmp.eq.s32.totalorder %v808_v30, %v3078_v59 }
 0x23d   :  { %2239 = vmatpush3.bf16.msk.msra.mxu0 %vm2238_vm13, %v2433_v5  ;;  %2273 = vmatprep.subr.msk.bf16.mxu1 %vm2272_vm11, %v2433_v5  ;;  %vm2240_vm7 = vmpackc.low %vm880_vm9, %vm879_vm3  ;;  %vm897_vm3 = vcmp.eq.s32.totalorder %v824_v6, %v3078_v59  ;;  %vm898_vm9 = vcmp.eq.s32.totalorder %v825_v62, %v3078_v59  ;;  %vm865_vm11 = vcmp.eq.s32.totalorder %v3347_v2, %v3078_v59 }
 0x23e   :  { %2241 = vmatprep.subr.msk.bf16.mxu0 %vm2240_vm7, %v2433_v5  ;;  %2275 = vmatpush3.bf16.msk.msra.mxu1 %vm2274_vm1, %v2433_v5  ;;  %vm2276_vm8 = vmpackc.low %vm914_vm14, %vm913_vm5  ;;  %vm866_vm7 = vcmp.eq.s32.totalorder %v3350_v50, %v3078_v59  ;;  %vm3804_vm5 = vcmask 916480  }
 0x23f   :  { %2277 = vmatprep.subr.msk.bf16.mxu1 %vm2276_vm8, %v2433_v5  ;;  %vm2244_vm13 = vmpackc.low %vm882_vm10, %vm881_vm4  ;;  %vm1184_vm10 = vcmask 146432  }
 0x240   :  { %vm2278_vm0 = vmpackc.low %vm898_vm9, %vm897_vm3  ;;  %vm1192_vm3 = vcmask 72704   ;;  %1185 = vst.msk [vmem:[#allocation5 + $0x8] sm:$0xff] %vm1184_vm10, %v3369_v24  ;;  %vm1190_vm9 = vcmask 1047624   ;;  %vm1252_vm10 = vcmask 982016  }
 0x241   :  { %2243 = vmatpush3.bf16.msk.msra.mxu0 %vm2242_vm12, %v2433_v5  ;;  %vm2246_vm1 = vmpackc.low %vm866_vm7, %vm865_vm11  ;;  %1417 = vst.msk [vmem:[#allocation7 + $0x8] sm:$0xff] %vm1192_vm3, %v3369_v24 }
 0x242   :  { %2245 = vmatprep.subr.msk.bf16.mxu0 %vm2244_vm13, %v2433_v5  ;;  %2279 = vmatpush3.bf16.msk.msra.mxu1 %vm2278_vm0, %v2433_v5  ;;  %vm3802_vm2 = vmmov %vm3801_vm6  ;;  %1419 = vst.msk [vmem:[#allocation7 + $0x18] sm:$0xff] %vm1192_vm3, %v3369_v24  ;;  %vm2438_vm13 = vmmov 0  }
 0x243   :  { %vm3803_vm12 = vmmov %vm3802_vm2 }
 0x244   :  { %vm3805_vm14 = vmmov %vm3804_vm5 }
 0x245   :  { %2247 = vmatpush3.bf16.msk.msra.mxu0 %vm2246_vm1, %v2433_v5  ;;  %vm3806_vm8 = vmmov %vm3804_vm5  ;;  %vm1241_vm1 = vcmp.ge.s32.totalorder %v3064_v47, 0 }
 0x246   :  { %2156 = vmatprep.subr.bf16.mxu0 %v3369_v24  ;;  %vm3807_vm4 = vmmov %vm3804_vm5 }
 0x2a6   :  { %v2340_v51 = vpop.permute.xlu1 %2339 }
 0x2a7   :  { %v2342_v15 = vunpack.i.h.bf16 %v2340_v51  ;;  %v2341_v18 = vunpack.i.l.bf16 %v2340_v51 }
 0x2a9   :  { %v737_v36 = vsel %vm3800_vm15, %v2341_v18, %v2342_v15 }
 0x2aa   :  { %v2345_v54 = vpop.permute.xlu1 %2344  ;;  %v745_v37 = vmax.f32 %v704_v16, %v737_v36  ;;  %v1349_v36 = vld [vmem:[%s3677_s4] sm:$0xff] }
 0x2ab   :  { %v2347_v55 = vunpack.i.h.bf16 %v2345_v54  ;;  %v2346_v26 = vunpack.i.l.bf16 %v2345_v54  ;;  %v1195_v54 = vadd.s32 4294967295, %v3064_v47 }
 0x2ad   :  { %v749_v20 = vmax.f32 %v3049_v58, %v2347_v55  ;;  %v738_v56 = vsel %vm3801_vm6, %v2342_v15, %v2346_v26  ;;  %v739_v1 = vsel %vm3802_vm2, %v2346_v26, %v2347_v55  ;;  %v727_v58 = vpop.permute.xlu0 %726  ;;  %v1199_v55 = vadd.s32 4294967295, %v3061_v44 }
 0x2ae   :  { %v747_v33 = vmax.f32 %v706_v42, %v739_v1  ;;  %v746_v11 = vmax.f32 %v705_v41, %v738_v56  ;;  %v736_v12 = vsel %vm3803_vm12, %v727_v58, %v2341_v18  ;;  %v1350_v18 = vld [vmem:[%s3677_s4 + $0x8] sm:$0xff]  ;;  %vm1196_vm15 = vcmp.ge.s32.totalorder %v1195_v54, 0 }
 0x2af   :  { %v744_v13 = vmax.f32 %v703_v53, %v736_v12  ;;  %vm1197_vm0 = vcmp.lt.s32.totalorder %v1195_v54, 8  ;;  %vm1200_vm7 = vcmp.ge.s32.totalorder %v1199_v55, 0  ;;  %vm1242_vm6 = vcmp.lt.s32.totalorder %v3064_v47, 8 }
 0x2b0   :  { %v2353_v59 = vpack.i.bf16 %v749_v20, %v747_v33  ;;  %v2348_v17 = vpack.i.bf16 %v746_v11, %v745_v37  ;;  %vm3403_vm11 = vmand %vm1196_vm15, %vm1197_vm0  ;;  %v1224_v20 = vadd.s32 1, %v3061_v44  ;;  %v1289_v44 = vadd.s32 1, %v3064_v47 }
 0x2b1   :  { %vm3413_vm2 = vmand %vm3403_vm11, %vm1200_vm7  ;;  %vm3819_vm15 = vcmask 1031168  }
 0x2b2   :  { %2354 = vrot.lane.b32.xlu0 %v2353_v59, %s2427_s8  ;;  %2349 = vrot.lane.b32.xlu1 %v2348_v17, %s2427_s8  ;;  %vm1227_vm12 = vcmp.lt.s32.totalorder %v1224_v20, 8 }
 0x2b6   :  { %755 = vrot.lane.b32.xlu1 %v744_v13, %s2427_s8 }
 0x324   :  { %v2355_v16 = vpop.permute.xlu0 %2354  ;;  %v2350_v57 = vpop.permute.xlu1 %2349 }
 0x325   :  { %v2357_v31 = vunpack.i.h.bf16 %v2355_v16  ;;  %v2356_v41 = vunpack.i.l.bf16 %v2355_v16  ;;  %v2352_v42 = vunpack.i.h.bf16 %v2350_v57  ;;  %v2351_v28 = vunpack.i.l.bf16 %v2350_v57 }
 0x327   :  { %v767_v9 = vsel %vm3804_vm5, %v2352_v42, %v2356_v41  ;;  %v766_v14 = vsel %vm3805_vm14, %v2351_v28, %v2352_v42  ;;  %v768_v21 = vsel %vm3806_vm8, %v2356_v41, %v2357_v31  ;;  %vm3417_vm5 = vmand %vm1241_vm1, %vm1242_vm6  ;;  %vm3814_vm8 = vcmask 1039360  }
 0x328   :  { %v775_v46 = vmax.f32 %v746_v11, %v767_v9  ;;  %v756_v23 = vpop.permute.xlu1 %755  ;;  %v774_v10 = vmax.f32 %v745_v37, %v766_v14  ;;  %v776_v60 = vmax.f32 %v747_v33, %v768_v21  ;;  %vm2044_vm14 = vmpackc.low %vm3403_vm11, %vm3413_vm2  ;;  %vm1282_vm1 = vcmask 965632  }
 0x329   :  { %v765_v38 = vsel %vm3807_vm4, %v756_v23, %v2351_v28  ;;  %vm3430_vm4 = vmand %vm3403_vm11, %vm1227_vm12  ;;  %vm1267_vm11 = vcmask 973824  }
 0x32a   :  { %v773_v53 = vmax.f32 %v744_v13, %v765_v38  ;;  %1107 = vmatprep.mubr.f32.mxu0 %v774_v10  ;;  %1177 = vmatprep.mubr.f32.mxu1 %v776_v60  ;;  %vm3451_vm6 = vmand %vm3417_vm5, %vm1227_vm12 }
 0x32b   :  { %1178 = vmatmul.mubr.f32.vlgmr.msra.gmra.mrb[4].mxu1 %v775_v46 }
 0x32c   :  { %1108 = vmatmul.mubr.f32.vlgmr.msra.gmra.mrb[4].mxu0 %v773_v53 }
 0x32d   :  { %2166 = vmatprep.mubr.msk.bf16.mxu0 %vm2438_vm13, %v3369_v24  ;;  %vm1291_vm13 = vcmp.lt.s32.totalorder %v1289_v44, 8 }
 0x3fe   :  { %v2123_v3 = vpop.f32.mrb[4].mxu1 }
 0x3ff   :  { %v2088_v49 = vpop.f32.mrb[4].mxu0  ;;  %v2124_v63 = vpop.f32.mrb[5].mxu1 }
 0x400   :  { %v2125_v19 = vadd.f32 %v2124_v63, %v2123_v3  ;;  %v2089_v27 = vpop.f32.mrb[5].mxu0  ;;  %v1745_v3 = vld [vmem:[%s3678_s6 + $0x8] sm:$0x3] }
 0x401   :  { %v2090_v51 = vadd.f32 %v2089_v27, %v2088_v49 }
 0x403   :  { %v1180_v30 = vadd.f32 %v2125_v19, %v2090_v51 }
 0x405   :  { %1187 = vrot.lane.b32.xlu0 %v1180_v30, %s2434_s1 }
 0x477   :  { %v1188_v25 = vpop.permute.xlu0 %1187 }
 0x478   :  { %1191 = vst.msk [vmem:[#allocation5] sm:$0xff] %vm1190_vm9, %v1188_v25  ;;  %vm1290_vm9 = vcmp.ge.s32.totalorder %v1289_v44, 0  ;;  %v1466_v44 = vshll.u32 %v61_v8, 6 }
 0x479   :  { %1193 = vst.msk [vmem:[#allocation5 + $0x8] sm:$0xff] %vm1192_vm3, %v1188_v25  ;;  %vm3437_vm3 = vmand %vm3417_vm5, %vm1200_vm7 }
 0x47a   :  { %vm2047_vm0 = vmpackc.low %vm3437_vm3, %vm3430_vm4  ;;  %vm3827_vm3 = vcmask 900096  }
 0x47b   :  { %vm3457_vm2 = vmand %vm1290_vm9, %vm1291_vm13  ;;  %vm3828_vm9 = vcmask 908288   ;;  %vm1366_vm13 = vcmask 588800  }
 0x47c   :  { %vm1322_vm4 = vmand %vm3457_vm2, %vm1227_vm12  ;;  %vm3829_vm12 = vcmask 1043456  }
 0x47f   :  { %v1222_v6 = vld [vmem:[#allocation5] sm:$0xff] }
 0x480   :  { %v1223_v62 = vld [vmem:[#allocation5 + $0x8] sm:$0xff] }
 0x481   :  { %v2363_v15 = vpack.i.bf16 %v1223_v62, %v1222_v6 }
 0x483   :  { %2364 = vrot.lane.b32.xlu0 %v2363_v15, %s2429_s10  ;;  %2359 = vrot.lane.b32.xlu1 %v2363_v15, %s2425_s29 }
 0x487   :  { %2374 = vrot.lane.b32.xlu0 %v2363_v15, %s2435_s16  ;;  %2369 = vrot.lane.b32.xlu1 %v2363_v15, %s2436_s17 }
 0x48b   :  { %2384 = vrot.lane.b32.xlu0 %v2363_v15, %s2427_s8  ;;  %2379 = vrot.lane.b32.xlu1 %v2363_v15, %s2437_s18 }
 0x48f   :  { %2394 = vrot.lane.b32.xlu0 %v2363_v15, %s2424_s0  ;;  %2389 = vrot.lane.b32.xlu1 %v2363_v15, %s2428_s9 }
 0x493   :  { %1358 = vperm.xlu0 %2337, %v1350_v18   ;;  %1353 = vperm.xlu1 %2398, %v1349_v36  }
 0x4f5   :  { %v2365_v1 = vpop.permute.xlu0 %2364  ;;  %v2360_v33 = vpop.permute.xlu1 %2359 }
 0x4f6   :  { %v2362_v37 = vunpack.i.h.bf16 %v2360_v33  ;;  %v2361_v11 = vunpack.i.l.bf16 %v2360_v33  ;;  %v2367_v59 = vunpack.i.h.bf16 %v2365_v1  ;;  %v2366_v17 = vunpack.i.l.bf16 %v2365_v1 }
 0x4f8   :  { %v1218_v12 = vsel %vm3814_vm8, %v2361_v11, %v2362_v37  ;;  %v1235_v28 = vsel %vm3819_vm15, %v2366_v17, %v2367_v59  ;;  %vm3469_vm8 = vmand %vm3457_vm2, %vm1200_vm7  ;;  %v2420_v37 = vld [vmem:[%s3676_s3] sm:$0xff]   ;;  %v1467_v11 = vshra.s32 %v2487_v4, 2  ;;  %v1471_v17 = vand.u32 3, %v2487_v4 }
 0x4f9   :  { %v2045_v16 = vpack.c.bf16 %v1218_v12, %v1222_v6  ;;  %v2375_v57 = vpop.permute.xlu0 %2374  ;;  %v2370_v31 = vpop.permute.xlu1 %2369  ;;  %vm2053_vm7 = vmpackc.low %vm3457_vm2, %vm3469_vm8 }
 0x4fa   :  { %v2372_v41 = vunpack.i.h.bf16 %v2370_v31  ;;  %v2371_v42 = vunpack.i.l.bf16 %v2370_v31  ;;  %v2377_v9 = vunpack.i.h.bf16 %v2375_v57  ;;  %v2376_v14 = vunpack.i.l.bf16 %v2375_v57 }
 0x4fb   :  { %2157 = vmatpush3.bf16.msk.msra.mxu0 %vm2044_vm14, %v2045_v16  ;;  %vm2050_vm14 = vmpackc.low %vm3451_vm6, %vm3417_vm5  ;;  %vm3826_vm5 = vcmask 916480   ;;  %v1468_v58 = vand.u32 3, %v1467_v11  ;;  %v1472_v13 = vshll.u32 %v1471_v17, 1  ;;  %v1608_v11 = vld [vmem:[%s3679_s5 + $0x58] sm:$0xff]  ;;  %v1609_v17 = vld [vmem:[%s3679_s5 + $0x60] sm:$0xff] }
 0x4fc   :  { %v1253_v21 = vsel %vm1252_vm10, %v2371_v42, %v2372_v41  ;;  %2158 = vmatprep.subr.bf16.mxu0 %v3369_v24  ;;  %v1268_v49 = vsel %vm1267_vm11, %v2376_v14, %v2377_v9  ;;  %v1424_v42 = vld [vmem:[#allocation7 + $0x8] sm:$0xff] }
 0x4fd   :  { %v2048_v46 = vpack.c.bf16 %v1253_v21, %v1235_v28  ;;  %v2385_v23 = vpop.permute.xlu0 %2384  ;;  %v2380_v10 = vpop.permute.xlu1 %2379  ;;  %v1469_v59 = vshll.u32 %v1468_v58, 4 }
 0x4fe   :  { %v2382_v38 = vunpack.i.h.bf16 %v2380_v10  ;;  %v2381_v53 = vunpack.i.l.bf16 %v2380_v10  ;;  %v2387_v63 = vunpack.i.h.bf16 %v2385_v23  ;;  %v2386_v19 = vunpack.i.l.bf16 %v2385_v23 }
 0x4ff   :  { %2159 = vmatpush3.bf16.msk.msra.mxu0 %vm2047_vm0, %v2048_v46  ;;  %v1425_v46 = vld [vmem:[#allocation7 + $0x18] sm:$0xff] }
 0x500   :  { %v1283_v27 = vsel %vm1282_vm1, %v2381_v53, %v2382_v38  ;;  %2160 = vmatprep.subr.bf16.mxu0 %v3369_v24  ;;  %v1301_v54 = vsel %vm3826_vm5, %v2386_v19, %v2387_v63  ;;  %v1744_v53 = vld [vmem:[%s3678_s6] sm:$0xff] }
 0x501   :  { %v2051_v51 = vpack.c.bf16 %v1283_v27, %v1268_v49  ;;  %v2395_v30 = vpop.permute.xlu0 %2394  ;;  %v2390_v25 = vpop.permute.xlu1 %2389 }
 0x502   :  { %v2397_v62 = vunpack.i.h.bf16 %v2395_v30  ;;  %v2396_v15 = vunpack.i.l.bf16 %v2395_v30  ;;  %v2392_v18 = vunpack.i.h.bf16 %v2390_v25  ;;  %v2391_v36 = vunpack.i.l.bf16 %v2390_v25 }
 0x503   :  { %2161 = vmatpush3.bf16.msk.msra.mxu0 %vm2050_vm14, %v2051_v51 }
 0x504   :  { %v1329_v26 = vsel %vm3827_vm3, %v2396_v15, %v2397_v62  ;;  %v1315_v55 = vsel %vm3828_vm9, %v2391_v36, %v2392_v18  ;;  %2162 = vmatprep.subr.bf16.mxu0 %v3369_v24  ;;  %v1728_v18 = vshra.s32 %v3058_v43, 4  ;;  %v1729_v36 = vshra.s32 %v3075_v22, 4 }
 0x505   :  { %v2054_v56 = vpack.c.bf16 %v1315_v55, %v1301_v54  ;;  %v1331_v1 = vsel %vm1322_vm4, %v1329_v26, 0.0  ;;  %v1730_v54 = vshra.s32 %v3086_v52, 4  ;;  %v1731_v26 = vshra.s32 %v3089_v45, 4  ;;  %v1601_v55 = vld [vmem:[%s3679_s5 + $0x20] sm:$0xff] }
 0x506   :  { %v1348_v20 = vpack.c.bf16 %v1331_v1, %v1331_v1  ;;  %v1605_v1 = vld [vmem:[%s3679_s5 + $0x40] sm:$0xff] }
 0x507   :  { %2163 = vmatpush3.bf16.msk.msra.mxu0 %vm2053_vm7, %v2054_v56  ;;  %v1603_v56 = vld [vmem:[%s3679_s5 + $0x30] sm:$0xff] }
 0x508   :  { %2164 = vmatprep.subr.bf16.mxu0 %v3369_v24  ;;  %v1371_v33 = vsel %vm3829_vm12, %v1348_v20, 0  ;;  %v1470_v24 = vadd.s32 %v1469_v59, %v1466_v44 }
 0x50a   :  { %v1473_v28 = vadd.s32 %v1472_v13, %v1470_v24 }
 0x50b   :  { %2165 = vmatpush3.bf16.msra.mxu0 %v1371_v33  ;;  %v1606_v33 = vld [vmem:[%s3679_s5 + $0x48] sm:$0xff] }
 0x50c   :  { %vm1474_vm15 = vcmp.eq.s32.totalorder %v3058_v43, %v1473_v28  ;;  %vm1475_vm0 = vcmp.eq.s32.totalorder %v3075_v22, %v1473_v28  ;;  %vm1476_vm11 = vcmp.eq.s32.totalorder %v3086_v52, %v1473_v28  ;;  %vm1477_vm6 = vcmp.eq.s32.totalorder %v3089_v45, %v1473_v28  ;;  %v1598_v43 = vld [vmem:[%s3679_s5 + $0x8] sm:$0xff]  ;;  %v1600_v22 = vld [vmem:[%s3679_s5 + $0x18] sm:$0xff]  ;;  %v1599_v52 = vld [vmem:[%s3679_s5 + $0x10] sm:$0xff] }
 0x50d   :  { %vm2280_vm1 = vmpackc.low %vm1475_vm0, %vm1474_vm15  ;;  %vm1478_vm14 = vcmp.eq.s32.totalorder %v3132_v34, %v1473_v28  ;;  %vm1479_vm8 = vcmp.eq.s32.totalorder %v3135_v7, %v1473_v28  ;;  %vm1480_vm5 = vcmp.eq.s32.totalorder %v3176_v29, %v1473_v28  ;;  %vm1481_vm3 = vcmp.eq.s32.totalorder %v3179_v61, %v1473_v28  ;;  %v1602_v45 = vld [vmem:[%s3679_s5 + $0x28] sm:$0xff] }
 0x50e   :  { %2167 = vmatmul.mubr.msk.bf16.vlgmr.msra.gmra.mrb[8].mxu0 %vm1366_vm13, %v2420_v37  ;;  %2281 = vmatprep.subr.msk.bf16.mxu1 %vm2280_vm1, %v2433_v5  ;;  %vm2284_vm2 = vmpackc.low %vm1477_vm6, %vm1476_vm11  ;;  %vm1482_vm7 = vcmp.eq.s32.totalorder %v3220_v39, %v1473_v28  ;;  %vm1483_vm12 = vcmp.eq.s32.totalorder %v3223_v0, %v1473_v28  ;;  %vm1484_vm15 = vcmp.eq.s32.totalorder %v3264_v40, %v1473_v28  ;;  %v1607_v37 = vld [vmem:[%s3679_s5 + $0x50] sm:$0xff] }
 0x50f   :  { %2283 = vmatpush3.bf16.msk.msra.mxu1 %vm2280_vm1, %v2433_v5  ;;  %vm2288_vm4 = vmpackc.low %vm1479_vm8, %vm1478_vm14  ;;  %vm1485_vm0 = vcmp.eq.s32.totalorder %v3267_v48, %v1473_v28  ;;  %vm1486_vm1 = vcmp.eq.s32.totalorder %v3323_v32, %v1473_v28  ;;  %vm1487_vm6 = vcmp.eq.s32.totalorder %v3326_v35, %v1473_v28  ;;  %vm1488_vm14 = vcmp.eq.s32.totalorder %v3347_v2, %v1473_v28 }
 0x510   :  { %2285 = vmatprep.subr.msk.bf16.mxu1 %vm2284_vm2, %v2433_v5  ;;  %vm2292_vm9 = vmpackc.low %vm1481_vm3, %vm1480_vm5  ;;  %vm1489_vm8 = vcmp.eq.s32.totalorder %v3350_v50, %v1473_v28  ;;  %vm3830_vm5 = vcmask 1039360  }
 0x511   :  { %vm2296_vm13 = vmpackc.low %vm1483_vm12, %vm1482_vm7  ;;  %vm1733_vm7 = vcmp.eq.s32.totalorder %v1729_v36, %v2487_v4  ;;  %vm1734_vm12 = vcmp.eq.s32.totalorder %v1730_v54, %v2487_v4 }
 0x512   :  { %v1354_v12 = vpop.permute.xlu1 %1353  ;;  %v1359_v47 = vpop.permute.xlu0 %1358  ;;  %vm2300_vm11 = vmpackc.low %vm1485_vm0, %vm1484_vm15  ;;  %vm1637_vm0 = vcmask 261120  }
 0x513   :  { %2287 = vmatpush3.bf16.msk.msra.mxu1 %vm2284_vm2, %v2433_v5  ;;  %vm2304_vm2 = vmpackc.low %vm1487_vm6, %vm1486_vm1  ;;  %vm1768_vm1 = vcmask 1042434   ;;  %vm1770_vm6 = vcmask 1043459  }
 0x514   :  { %2289 = vmatprep.subr.msk.bf16.mxu1 %vm2288_vm4, %v2433_v5  ;;  %vm3831_vm3 = vmmov %vm3830_vm5 }
 0x517   :  { %2291 = vmatpush3.bf16.msk.msra.mxu1 %vm2288_vm4, %v2433_v5  ;;  %vm2308_vm4 = vmpackc.low %vm1489_vm8, %vm1488_vm14  ;;  %vm1774_vm14 = vcmask 1045509   ;;  %vm1776_vm8 = vcmask 1046534  }
 0x518   :  { %2293 = vmatprep.subr.msk.bf16.mxu1 %vm2292_vm9, %v2433_v5 }
 0x51b   :  { %2295 = vmatpush3.bf16.msk.msra.mxu1 %vm2292_vm9, %v2433_v5  ;;  %vm1732_vm9 = vcmp.eq.s32.totalorder %v1728_v18, %v2487_v4 }
 0x51c   :  { %2297 = vmatprep.subr.msk.bf16.mxu1 %vm2296_vm13, %v2433_v5 }
 0x51f   :  { %2299 = vmatpush3.bf16.msk.msra.mxu1 %vm2296_vm13, %v2433_v5  ;;  %vm1735_vm13 = vcmp.eq.s32.totalorder %v1731_v26, %v2487_v4  ;;  %v1597_v4 = vld [vmem:[%s3679_s5] sm:$0xff] }
 0x520   :  { %2301 = vmatprep.subr.msk.bf16.mxu1 %vm2300_vm11, %v2433_v5  ;;  %vm2316_vm15 = vmpackc.low %vm1735_vm13, %vm1734_vm12 }
 0x523   :  { %2303 = vmatpush3.bf16.msk.msra.mxu1 %vm2300_vm11, %v2433_v5  ;;  %vm1766_vm11 = vcmask 1041409  }
 0x524   :  { %2305 = vmatprep.subr.msk.bf16.mxu1 %vm2304_vm2, %v2433_v5 }
 0x527   :  { %2307 = vmatpush3.bf16.msk.msra.mxu1 %vm2304_vm2, %v2433_v5  ;;  %vm1772_vm2 = vcmask 1044484  }
 0x528   :  { %2309 = vmatprep.subr.msk.bf16.mxu1 %vm2308_vm4, %v2433_v5 }
 0x52b   :  { %2311 = vmatpush3.bf16.msk.msra.mxu1 %vm2308_vm4, %v2433_v5  ;;  %vm1778_vm4 = vcmask 1047559  }
 0x5e1   :  { %v1407_v16 = vpop.f32.mrb[8].mxu0 }
 0x5e2   :  { %v3493_v57 = vadd.f32 %v1407_v16, %v1354_v12  ;;  %v2168_v31 = vpop.f32.mrb[9].mxu0  ;;  %v1610_v12 = vld [vmem:[%s3679_s5 + $0x68] sm:$0xff] }
 0x5e3   :  { %v1410_v41 = vpop.f32.mrb[10].mxu0 }
 0x5e4   :  { %v1414_v9 = vmax.f32 %v3493_v57, 0.0  ;;  %v1411_v14 = vadd.f32 %v1410_v41, %v1359_v47  ;;  %v2169_v21 = vpop.f32.mrb[11].mxu0  ;;  %v1611_v41 = vld [vmem:[%s3679_s5 + $0x70] sm:$0xff] }
 0x5e6   :  { %v1415_v8 = vmax.f32 %v1411_v14, 0.0  ;;  %v2399_v23 = vpack.i.bf16 %v1424_v42, %v1414_v9 }
 0x5e8   :  { %2400 = vrot.lane.b32.xlu1 %v2399_v23, %s2425_s29  ;;  %v2404_v10 = vpack.i.bf16 %v1425_v46, %v1415_v8 }
 0x5ea   :  { %2405 = vrot.lane.b32.xlu0 %v2404_v10, %s2425_s29 }
 0x65a   :  { %v2401_v34 = vpop.permute.xlu1 %2400 }
 0x65b   :  { %v2403_v7 = vunpack.i.h.bf16 %v2401_v34  ;;  %v2402_v29 = vunpack.i.l.bf16 %v2401_v34 }
 0x65c   :  { %v2406_v61 = vpop.permute.xlu0 %2405 }
 0x65d   :  { %v1446_v39 = vmax.f32 %v1424_v42, %v2403_v7  ;;  %v1438_v0 = vsel %vm3830_vm5, %v2402_v29, %v2403_v7  ;;  %v2408_v40 = vunpack.i.h.bf16 %v2406_v61  ;;  %v2407_v48 = vunpack.i.l.bf16 %v2406_v61  ;;  %v1612_v42 = vld [vmem:[%s3679_s5 + $0x78] sm:$0xff] }
 0x65e   :  { %v1442_v32 = vmax.f32 %v1414_v9, %v1438_v0  ;;  %vm1862_vm5 = vcmask 9216  }
 0x65f   :  { %v1447_v35 = vmax.f32 %v1425_v46, %v2408_v40  ;;  %v1439_v2 = vsel %vm3831_vm3, %v2407_v48, %v2408_v40  ;;  %vm1860_vm3 = vcmask 15360  }
 0x660   :  { %v2409_v60 = vpack.i.bf16 %v1446_v39, %v1442_v32  ;;  %v1443_v50 = vmax.f32 %v1415_v8, %v1439_v2 }
 0x662   :  { %2410 = vrot.lane.b32.xlu1 %v2409_v60, %s2436_s17  ;;  %v2414_v38 = vpack.i.bf16 %v1447_v35, %v1443_v50 }
 0x664   :  { %2415 = vrot.lane.b32.xlu0 %v2414_v38, %s2436_s17 }
 0x666   :  { %1748 = vperm.xlu1 %2398, %v1744_v53  }
 0x668   :  { %1753 = vperm.xlu0 %2337, %v1745_v3  }
 0x6d4   :  { %v2411_v49 = vpop.permute.xlu1 %2410 }
 0x6d5   :  { %v2413_v63 = vunpack.i.h.bf16 %v2411_v49  ;;  %v2412_v19 = vunpack.i.l.bf16 %v2411_v49 }
 0x6d6   :  { %v2416_v27 = vpop.permute.xlu0 %2415 }
 0x6d7   :  { %v2418_v51 = vunpack.i.h.bf16 %v2416_v27  ;;  %v2417_v30 = vunpack.i.l.bf16 %v2416_v27  ;;  %v1460_v25 = vsel %vm1252_vm10, %v2412_v19, %v2413_v63 }
 0x6d8   :  { %v1464_v6 = vmax.f32 %v1442_v32, %v1460_v25 }
 0x6d9   :  { %v1461_v62 = vsel %vm1252_vm10, %v2417_v30, %v2418_v51  ;;  %vm2312_vm10 = vmpackc.low %vm1733_vm7, %vm1732_vm9 }
 0x6da   :  { %v1465_v15 = vmax.f32 %v1443_v50, %v1461_v62  ;;  %2202 = vmatprep.mubr.f32.mxu1 %v1464_v6  ;;  %2313 = vmatprep.subr.msk.bf16.mxu0 %vm2312_vm10, %v2433_v5 }
 0x6db   :  { %2315 = vmatpush3.bf16.msk.msra.mxu0 %vm2312_vm10, %v2433_v5 }
 0x6dc   :  { %2203 = vmatmul.mubr.f32.vlgmr.msra.gmra.mrb[6].mxu1 %v1465_v15  ;;  %2317 = vmatprep.subr.msk.bf16.mxu0 %vm2316_vm15, %v2433_v5 }
 0x6df   :  { %2319 = vmatpush3.bf16.msk.msra.mxu0 %vm2316_vm15, %v2433_v5  ;;  %v1604_v5 = vld [vmem:[%s3679_s5 + $0x38] sm:$0xff] }
 0x7af   :  { %v3581_v20 = vpop.f32.mrb[6].mxu1 }
 0x7b0   :  { %v1618_v58 = vmul.f32 %v3581_v20, %v1598_v43  ;;  %v1620_v44 = vmul.f32 %v3581_v20, %v1600_v22  ;;  %v3594_v59 = vpop.f32.mrb[7].mxu1  ;;  %v1622_v24 = vmul.f32 %v3581_v20, %v1602_v45  ;;  %v1624_v13 = vmul.f32 %v3581_v20, %v1604_v5 }
 0x7b1   :  { %v1617_v16 = vmul.f32 %v1597_v4, %v3594_v59  ;;  %v1619_v57 = vmul.f32 %v1599_v52, %v3594_v59  ;;  %v1621_v31 = vmul.f32 %v1601_v55, %v3594_v59  ;;  %v1623_v47 = vmul.f32 %v1603_v56, %v3594_v59 }
 0x7b2   :  { %v1625_v28 = vmul.f32 %v1605_v1, %v3594_v59  ;;  %v1626_v9 = vmul.f32 %v3581_v20, %v1606_v33  ;;  %v1627_v14 = vmul.f32 %v1607_v37, %v3594_v59  ;;  %v1628_v21 = vmul.f32 %v3581_v20, %v1608_v11 }
 0x7b3   :  { %v1638_v46 = vsel %vm1637_vm0, %v1617_v16, 0.0  ;;  %v1647_v8 = vsel %vm1637_vm0, %v1619_v57, 0.0  ;;  %v1629_v23 = vmul.f32 %v1609_v17, %v3594_v59  ;;  %v1630_v10 = vmul.f32 %v3581_v20, %v1610_v12 }
 0x7b4   :  { %v1631_v34 = vmul.f32 %v1611_v41, %v3594_v59  ;;  %v1632_v7 = vmul.f32 %v3581_v20, %v1612_v42  ;;  %v1639_v29 = vsel %vm1637_vm0, %v1618_v58, 0.0  ;;  %v1648_v61 = vsel %vm1637_vm0, %v1620_v44, 0.0  ;;  %v1613_v41 = vld [vmem:[%s3679_s5 + $0x80] sm:$0xff] }
 0x7b5   :  { %v1640_v39 = vadd.f32 %v1639_v29, %v1638_v46  ;;  %v1649_v0 = vadd.f32 %v1648_v61, %v1647_v8  ;;  %v1656_v40 = vsel %vm1637_vm0, %v1621_v31, 0.0  ;;  %v1657_v48 = vsel %vm1637_vm0, %v1622_v24, 0.0 }
 0x7b6   :  { %v1658_v32 = vadd.f32 %v1657_v48, %v1656_v40  ;;  %v1665_v35 = vsel %vm1637_vm0, %v1623_v47, 0.0  ;;  %v1666_v2 = vsel %vm1637_vm0, %v1624_v13, 0.0  ;;  %v1674_v60 = vsel %vm1637_vm0, %v1625_v28, 0.0 }
 0x7b7   :  { %v1641_v50 = vrot.slane %v1640_v39, 4  ;;  %v1650_v38 = vrot.slane %v1649_v0, 4  ;;  %v1667_v53 = vadd.f32 %v1666_v2, %v1665_v35  ;;  %v1675_v3 = vsel %vm1637_vm0, %v1626_v9, 0.0 }
 0x7b8   :  { %v1659_v49 = vrot.slane %v1658_v32, 4  ;;  %v1676_v63 = vadd.f32 %v1675_v3, %v1674_v60  ;;  %v1683_v19 = vsel %vm1637_vm0, %v1627_v14, 0.0  ;;  %v1684_v27 = vsel %vm1637_vm0, %v1628_v21, 0.0 }
 0x7b9   :  { %v1642_v51 = vadd.f32 %v1641_v50, %v1640_v39  ;;  %v1651_v30 = vadd.f32 %v1650_v38, %v1649_v0  ;;  %v1668_v25 = vrot.slane %v1667_v53, 4  ;;  %v1685_v6 = vadd.f32 %v1684_v27, %v1683_v19  ;;  %v1616_v39 = vld [vmem:[%s3679_s5 + $0x98] sm:$0xff] }
 0x7ba   :  { %v1660_v62 = vadd.f32 %v1659_v49, %v1658_v32  ;;  %v1677_v15 = vrot.slane %v1676_v63, 4  ;;  %v1692_v18 = vsel %vm1637_vm0, %v1629_v23, 0.0  ;;  %v1693_v36 = vsel %vm1637_vm0, %v1630_v10, 0.0  ;;  %v1614_v10 = vld [vmem:[%s3679_s5 + $0x88] sm:$0xff] }
 0x7bb   :  { %v1643_v54 = vrot.slane %v1642_v51, 2  ;;  %v1652_v26 = vrot.slane %v1651_v30, 2  ;;  %v1669_v43 = vadd.f32 %v1668_v25, %v1667_v53  ;;  %v1686_v22 = vrot.slane %v1685_v6, 4 }
 0x7bc   :  { %v1661_v4 = vrot.slane %v1660_v62, 2  ;;  %v1678_v52 = vadd.f32 %v1677_v15, %v1676_v63  ;;  %v1694_v45 = vadd.f32 %v1693_v36, %v1692_v18  ;;  %v1701_v5 = vsel %vm1637_vm0, %v1631_v34, 0.0  ;;  %v1615_v34 = vld [vmem:[%s3679_s5 + $0x90] sm:$0xff] }
 0x7bd   :  { %v1644_v55 = vadd.f32 %v1643_v54, %v1642_v51  ;;  %v1653_v56 = vadd.f32 %v1652_v26, %v1651_v30  ;;  %v1670_v1 = vrot.slane %v1669_v43, 2  ;;  %v1687_v33 = vadd.f32 %v1686_v22, %v1685_v6 }
 0x7be   :  { %v1662_v37 = vadd.f32 %v1661_v4, %v1660_v62  ;;  %v1679_v11 = vrot.slane %v1678_v52, 2  ;;  %v1695_v58 = vrot.slane %v1694_v45, 4  ;;  %v1702_v44 = vsel %vm1637_vm0, %v1632_v7, 0.0 }
 0x7bf   :  { %v1645_v17 = vrot.slane %v1644_v55, 1  ;;  %v1654_v12 = vrot.slane %v1653_v56, 1  ;;  %v1671_v24 = vadd.f32 %v1670_v1, %v1669_v43  ;;  %v1688_v13 = vrot.slane %v1687_v33, 2 }
 0x7c0   :  { %v1663_v16 = vrot.slane %v1662_v37, 1  ;;  %v1680_v57 = vadd.f32 %v1679_v11, %v1678_v52  ;;  %v1696_v31 = vadd.f32 %v1695_v58, %v1694_v45  ;;  %v1703_v47 = vadd.f32 %v1702_v44, %v1701_v5  ;;  %v1754_v58 = vpop.permute.xlu0 %1753 }
 0x7c1   :  { %v1646_v42 = vadd.f32 %v1645_v17, %v1644_v55  ;;  %v1655_v28 = vadd.f32 %v1654_v12, %v1653_v56  ;;  %v1672_v9 = vrot.slane %v1671_v24, 1  ;;  %v1689_v14 = vadd.f32 %v1688_v13, %v1687_v33  ;;  %v1749_v17 = vpop.permute.xlu1 %1748 }
 0x7c2   :  { %v1664_v21 = vadd.f32 %v1663_v16, %v1662_v37  ;;  %v1681_v46 = vrot.slane %v1680_v57, 1  ;;  %v1697_v8 = vrot.slane %v1696_v31, 2  ;;  %v1704_v23 = vrot.slane %v1703_v47, 4 }
 0x7c3   :  { %v1673_v7 = vadd.f32 %v1672_v9, %v1671_v24  ;;  %v1690_v29 = vrot.slane %v1689_v14, 1  ;;  %v1767_v61 = vsel %vm1766_vm11, %v1655_v28, %v1646_v42  ;;  %v1633_v0 = vmul.f32 %v1613_v41, %v3594_v59 }
 0x7c4   :  { %v1682_v40 = vadd.f32 %v1681_v46, %v1680_v57  ;;  %v1698_v48 = vadd.f32 %v1697_v8, %v1696_v31  ;;  %v1705_v32 = vadd.f32 %v1704_v23, %v1703_v47  ;;  %v1769_v35 = vsel %vm1768_vm1, %v1664_v21, %v1767_v61 }
 0x7c5   :  { %v1691_v2 = vadd.f32 %v1690_v29, %v1689_v14  ;;  %v1771_v60 = vsel %vm1770_vm6, %v1673_v7, %v1769_v35  ;;  %v1634_v50 = vmul.f32 %v3581_v20, %v1614_v10  ;;  %v1635_v38 = vmul.f32 %v1615_v34, %v3594_v59 }
 0x7c6   :  { %v1699_v53 = vrot.slane %v1698_v48, 1  ;;  %v1706_v3 = vrot.slane %v1705_v32, 2  ;;  %v1773_v49 = vsel %vm1772_vm2, %v1682_v40, %v1771_v60  ;;  %v1636_v63 = vmul.f32 %v3581_v20, %v1616_v39 }
 0x7c7   :  { %v1775_v19 = vsel %vm1774_vm14, %v1691_v2, %v1773_v49  ;;  %v1710_v27 = vsel %vm1637_vm0, %v1633_v0, 0.0  ;;  %v1711_v51 = vsel %vm1637_vm0, %v1634_v50, 0.0  ;;  %v1719_v30 = vsel %vm1637_vm0, %v1635_v38, 0.0 }
 0x7c8   :  { %v1700_v25 = vadd.f32 %v1699_v53, %v1698_v48  ;;  %v1707_v6 = vadd.f32 %v1706_v3, %v1705_v32  ;;  %v1712_v62 = vadd.f32 %v1711_v51, %v1710_v27  ;;  %v1720_v15 = vsel %vm1637_vm0, %v1636_v63, 0.0 }
 0x7c9   :  { %v1721_v59 = vadd.f32 %v1720_v15, %v1719_v30 }
 0x7ca   :  { %v1708_v18 = vrot.slane %v1707_v6, 1  ;;  %v1777_v36 = vsel %vm1776_vm8, %v1700_v25, %v1775_v19  ;;  %v1713_v54 = vrot.slane %v1712_v62, 4 }
 0x7cb   :  { %v1722_v20 = vrot.slane %v1721_v59, 4 }
 0x7cc   :  { %v1709_v26 = vadd.f32 %v1708_v18, %v1707_v6  ;;  %v1714_v43 = vadd.f32 %v1713_v54, %v1712_v62 }
 0x7cd   :  { %v1723_v22 = vadd.f32 %v1722_v20, %v1721_v59 }
 0x7ce   :  { %v1779_v4 = vsel %vm1778_vm4, %v1709_v26, %v1777_v36  ;;  %v1715_v52 = vrot.slane %v1714_v43, 2 }
 0x7cf   :  { %2213 = vmatprep.mubr.msk.f32.mxu0 %vm1637_vm0, %v1779_v4  ;;  %v1724_v45 = vrot.slane %v1723_v22, 2 }
 0x7d0   :  { %v1716_v5 = vadd.f32 %v1715_v52, %v1714_v43 }
 0x7d1   :  { %v1725_v55 = vadd.f32 %v1724_v45, %v1723_v22 }
 0x7d2   :  { %v1717_v56 = vrot.slane %v1716_v5, 1 }
 0x7d3   :  { %v1726_v1 = vrot.slane %v1725_v55, 1 }
 0x7d4   :  { %v1718_v33 = vadd.f32 %v1717_v56, %v1716_v5 }
 0x7d5   :  { %v1727_v37 = vadd.f32 %v1726_v1, %v1725_v55 }
 0x7d7   :  { %v1780_v11 = vsel %vm1766_vm11, %v1727_v37, %v1718_v33 }
 0x7d8   :  { %2214 = vmatmul.mubr.msk.f32.vlgmr.msra.gmra.mrb[6].mxu0 %vm1637_vm0, %v1780_v11 }
 0x8ab   :  { %v2215_v44 = vpop.f32.mrb[6].mxu0 }
 0x8ac   :  { %v1857_v12 = vadd.f32 %v2215_v44, %v1754_v58  ;;  %v1851_v24 = vpop.f32.mrb[7].mxu0 }
 0x8ad   :  { %v1852_v13 = vadd.f32 %v1851_v24, %v1749_v17 }
 0x8ae   :  { %1863 = vst.msk [vmem:[%s3680_s7 + $0x8] sm:$0x3] %vm1862_vm5, %v1857_v12 }
 0x8af   :  { %1861 = vst.msk [vmem:[%s3680_s7] sm:$0xff] %vm1860_vm3, %v1852_v13 }

</bundles_post_ra>
